<compile_context>
chip_gen: v6e
topology: v6e:2x2x1
jax: 0.10.0
libtpu: 0.0.40
codegen_flags: <defaults>
</compile_context>

<pallas_src>
import functools

import numpy as np
import jax
import jax.numpy as jnp
from jax.experimental import pallas as pl
from jax.experimental.pallas import tpu as pltpu


# --------------------------------------------------------------------------
# Config (small, consistent with the PyTorch module)
# --------------------------------------------------------------------------
class Config:
    image_size = 16
    patch_size = 4
    num_channels = 4
    hidden_size = 32
    vocab_size = 100
    max_position_embeddings = 32
    pad_token_id = 0
    layer_norm_eps = 1e-12
    hidden_dropout_prob = 0.0
    initializer_range = 0.02


HPAD = 128  # lane-dense padded hidden width written by the fused kernel


# --------------------------------------------------------------------------
# Fused kernel: visual ResBlock path + text embed/LN, one launch
# --------------------------------------------------------------------------
def _fused_embeddings_kernel(
        patches_ref, ids_ref,
        stem_w_ref, stem_b_ref,
        b1_w1sc_ref, b1_b1sc_ref, b1_w2_ref, b1_b2_ref, b1_w3_ref, b1_b3_ref,
        b2_w1sc_ref, b2_b1sc_ref, b2_w2_ref, b2_b2_ref, b2_w3_ref, b2_b3_ref,
        vpos_ref, mask_ref, word_ref, tpos_ref, lng_ref, lnb_ref,
        img_out_ref, txt_out_ref,
        *, tb, n_patch, wp, hd, eps):
    f32, bf16 = jnp.float32, jnp.bfloat16
    m_rows = tb * n_patch

    def conv3x3(h, w2p_ref, b2_ref):
        # 3x3 "same" conv: 9 sublane rolls (XLU) + 0/1 border masks (VPU) +
        # ONE packed MXU matmul with K = 9*C.  pltpu.roll follows jnp.roll
        # semantics, so shift = -delta (mod M) brings row (r + delta) to row r;
        # the masks zero every row whose 3x3 source is outside its image,
        # which also kills roll wrap-around and cross-image leakage.
        pieces = []
        for kh in range(3):
            for kw in range(3):
                k = kh * 3 + kw
                delta = (kh - 1) * wp + (kw - 1)
                if delta == 0:
                    shifted = h
                else:
                    shifted = pltpu.roll(h, (-delta) % m_rows, axis=0)
                pieces.append(shifted * mask_ref[k])            # (M, C) f32
        h9 = jnp.concatenate(pieces, axis=1).astype(bf16)       # (M, 9*C)
        return jnp.dot(h9, w2p_ref[...], preferred_element_type=f32) + b2_ref[...]

    def bottleneck(x, w1sc_ref, b1sc_ref, w2p_ref, b2_ref, w3_ref, b3_ref, n_out):
        # w1sc = [shortcut 1x1 | conv1 1x1] concat along N (shortcut first so
        # both lane slices start at multiples of 128).
        xb = x.astype(bf16)
        t = jnp.dot(xb, w1sc_ref[...], preferred_element_type=f32) + b1sc_ref[...]
        shortcut = t[:, :n_out]                                  # 1x1 shortcut (no relu)
        h = jnp.maximum(t[:, n_out:], 0.0)                       # conv1 1x1 + relu (f32)
        h2 = jnp.maximum(conv3x3(h, w2p_ref, b2_ref), 0.0).astype(bf16)
        out = jnp.dot(h2, w3_ref[...], preferred_element_type=f32) + b3_ref[...] + shortcut
        return jnp.maximum(out, 0.0)                             # final relu

    # ---------------- visual path ----------------
    # Patchify Conv2d(k=P, s=P) as one matmul over (kh, kw, cin) rows.
    x = jnp.dot(patches_ref[...], stem_w_ref[...],
                preferred_element_type=f32) + stem_b_ref[...]    # (M, 128)
    x = bottleneck(x, b1_w1sc_ref, b1_b1sc_ref, b1_w2_ref, b1_b2_ref,
                   b1_w3_ref, b1_b3_ref, 256)                    # 64 -> 256
    x = bottleneck(x, b2_w1sc_ref, b2_b1sc_ref, b2_w2_ref, b2_b2_ref,
                   b2_w3_ref, b2_b3_ref, HPAD)                   # 256 -> hidden (padded)
    vp = vpos_ref[...]                                           # (n_patch, HPAD)
    if tb > 1:
        vp = jnp.concatenate([vp] * tb, axis=0)                  # broadcast over batch
    img_out_ref[...] = (x + vp).astype(img_out_ref.dtype)        # lane-dense store

    # ---------------- text path ----------------
    ids = ids_ref[...]                                           # (R, 1) int32
    r_rows = ids.shape[0]
    vpad = word_ref.shape[0]
    onehot = (jax.lax.broadcasted_iota(jnp.int32, (r_rows, vpad), 1)
              == ids).astype(f32)                                # exact gather
    tx = jnp.dot(onehot, word_ref[...], preferred_element_type=f32)
    tp = tpos_ref[...]                                           # (Sp, HPAD)
    if tb > 1:
        tp = jnp.concatenate([tp] * tb, axis=0)
    tx = tx + tp
    # LayerNorm over the first hd lanes only (rest are zero padding).
    lane_ok = (jax.lax.broadcasted_iota(jnp.int32, tx.shape, 1) < hd).astype(f32)
    mean = jnp.sum(tx * lane_ok, axis=-1, keepdims=True) * (1.0 / hd)
    d = (tx - mean) * lane_ok
    var = jnp.sum(d * d, axis=-1, keepdims=True) * (1.0 / hd)
    y = d * jax.lax.rsqrt(var + eps)
    txt_out_ref[...] = (y * lng_ref[...] + lnb_ref[...]).astype(txt_out_ref.dtype)


# --------------------------------------------------------------------------
# Parameter construction / packing
# --------------------------------------------------------------------------
def build_tap_masks(hp, wp, tb):
    """(9, tb*hp*wp, 1) 0/1 masks: valid rows for each 3x3 tap (pad=1)."""
    n_patch = hp * wp
    m = tb * n_patch
    mask = np.zeros((9, m, 1), np.float32)
    for kh in range(3):
        for kw in range(3):
            k = kh * 3 + kw
            for b in range(tb):
                for i in range(hp):
                    for j in range(wp):
                        si, sj = i + kh - 1, j + kw - 1
                        if 0 <= si < hp and 0 <= sj < wp:
                            mask[k, b * n_patch + i * wp + j, 0] = 1.0
    return jnp.asarray(mask)


def init_params(key, cfg):
    ks = jax.random.split(key, 21)
    std = cfg.initializer_range
    f32, bf16 = jnp.float32, jnp.bfloat16
    nrm = lambda k, s: jax.random.normal(k, s, f32) * std
    P, C, Hd = cfg.patch_size, cfg.num_channels, cfg.hidden_size
    hp = cfg.image_size // P
    n_patch = hp * hp

    # ---- logical weights (conv kernels already flattened to matmul form) ----
    stem_w, stem_b = nrm(ks[0], (P * P * C, 64)), nrm(ks[1], (1, 64))

    b1_wsc, b1_bsc = nrm(ks[2], (64, 256)), nrm(ks[3], (1, 256))
    b1_w1, b1_b1 = nrm(ks[4], (64, 64)), nrm(ks[5], (1, 64))
    b1_w2, b1_b2 = nrm(ks[6], (9, 64, 64)), nrm(ks[7], (1, 64))
    b1_w3, b1_b3 = nrm(ks[8], (64, 256)), nrm(ks[9], (1, 256))

    b2_wsc, b2_bsc = nrm(ks[10], (256, Hd)), nrm(ks[11], (1, Hd))
    b2_w1, b2_b1 = nrm(ks[12], (256, 128)), nrm(ks[13], (1, 128))
    b2_w2, b2_b2 = nrm(ks[14], (9, 128, 128)), nrm(ks[15], (1, 128))
    b2_w3, b2_b3 = nrm(ks[16], (128, Hd)), nrm(ks[17], (1, Hd))

    vis_pos = nrm(ks[18], (n_patch, Hd))
    word_emb = nrm(ks[19], (cfg.vocab_size, Hd)).at[cfg.pad_token_id].set(0.0)
    txt_pos = nrm(ks[20], (cfg.max_position_embeddings, Hd))

    def pad_to(a, rows, cols):
        return jnp.pad(a, ((0, rows - a.shape[0]), (0, cols - a.shape[1])))

    def pack_w2(w2, cin_p, cout_p):
        # (9, cin, cout) -> (9*cin_p, cout_p), tap-major K so it matches the
        # in-kernel lane concatenation order (k*cin_p + ci).
        _, cin, cout = w2.shape
        w = jnp.pad(w2, ((0, 0), (0, cin_p - cin), (0, cout_p - cout)))
        return w.reshape(9 * cin_p, cout_p)

    vocab_pad = -(-cfg.vocab_size // 128) * 128

    # ---- pack to kernel layout: 128-lane padding, shortcut-first concat, bf16 ----
    params = {
        "stem_w": pad_to(stem_w, P * P * C, 128).astype(bf16),
        "stem_b": pad_to(stem_b, 1, 128),
        "b1_w1sc": pad_to(jnp.concatenate([b1_wsc, pad_to(b1_w1, 64, 128)], axis=1),
                          128, 384).astype(bf16),
        "b1_b1sc": jnp.concatenate([b1_bsc, pad_to(b1_b1, 1, 128)], axis=1),
        "b1_w2": pack_w2(b1_w2, 128, 128).astype(bf16),
        "b1_b2": pad_to(b1_b2, 1, 128),
        "b1_w3": pad_to(b1_w3, 128, 256).astype(bf16),
        "b1_b3": b1_b3,
        "b2_w1sc": jnp.concatenate([pad_to(b2_wsc, 256, HPAD), b2_w1], axis=1).astype(bf16),
        "b2_b1sc": jnp.concatenate([pad_to(b2_bsc, 1, HPAD), b2_b1], axis=1),
        "b2_w2": pack_w2(b2_w2, 128, 128).astype(bf16),
        "b2_b2": b2_b2,
        "b2_w3": pad_to(b2_w3, 128, HPAD).astype(bf16),
        "b2_b3": pad_to(b2_b3, 1, HPAD),
        "vis_pos_pad": pad_to(vis_pos, n_patch, HPAD),
        "word_emb": word_emb,                                    # unpadded: tgt gather
        "word_emb_pad": pad_to(word_emb, vocab_pad, HPAD),
        "txt_pos_pad": pad_to(txt_pos, cfg.max_position_embeddings, HPAD),
        "ln_g_pad": pad_to(jnp.ones((1, Hd), f32), 1, HPAD),
        "ln_b_pad": jnp.zeros((1, HPAD), f32),
    }
    return params


# --------------------------------------------------------------------------
# Forward pass
# --------------------------------------------------------------------------
def simvlm_embeddings_forward(params, image_nchw, prefix_text, tgt_text, cfg):
    B = image_nchw.shape[0]
    P, C, Hd = cfg.patch_size, cfg.num_channels, cfg.hidden_size
    hp = cfg.image_size // P
    n_patch = hp * hp
    Sp = prefix_text.shape[1]

    # Fold batch into the matmul M dimension: largest TB with TB*n_patch <= 256
    # rows per grid step; for B=2 this gives grid=(1,) (whole batch, one step).
    TB = B
    while TB * n_patch > 256 and TB % 2 == 0:
        TB //= 2
    assert B % TB == 0
    steps = B // TB
    M = TB * n_patch
    R = TB * Sp
    K0 = P * P * C

    # Patchify is a tiny XLA transpose; all downstream compute is in-kernel.
    # TODO(synk): fold the patch rearrange into the kernel for large images.
    img = jnp.transpose(image_nchw, (0, 2, 3, 1))                # NCHW -> NHWC
    patches = (img.reshape(B, hp, P, hp, P, C)
                  .transpose(0, 1, 3, 2, 4, 5)
                  .reshape(B * n_patch, K0)
                  .astype(jnp.bfloat16))
    ids = prefix_text.reshape(B * Sp, 1).astype(jnp.int32)
    tpos = params["txt_pos_pad"][:Sp]                            # (Sp, HPAD)
    masks = build_tap_masks(hp, hp, TB)                          # (9, M, 1)

    args = (patches, ids,
            params["stem_w"], params["stem_b"],
            params["b1_w1sc"], params["b1_b1sc"], params["b1_w2"], params["b1_b2"],
            params["b1_w3"], params["b1_b3"],
            params["b2_w1sc"], params["b2_b1sc"], params["b2_w2"], params["b2_b2"],
            params["b2_w3"], params["b2_b3"],
            params["vis_pos_pad"], masks, params["word_emb_pad"], tpos,
            params["ln_g_pad"], params["ln_b_pad"])

    in_specs = [pl.BlockSpec((M, K0), lambda g: (g, 0)),
                pl.BlockSpec((R, 1), lambda g: (g, 0))]
    # Weights / tables are grid-invariant (constant index_map); with steps == 1
    # (the common case here) there is no redundant re-DMA or buffer churn.
    for w in args[2:]:
        if w.ndim == 2:
            in_specs.append(pl.BlockSpec(w.shape, lambda g: (0, 0)))
        else:
            in_specs.append(pl.BlockSpec(w.shape, lambda g: (0, 0, 0)))

    kernel = functools.partial(_fused_embeddings_kernel,
                               tb=TB, n_patch=n_patch, wp=hp, hd=Hd,
                               eps=cfg.layer_norm_eps)

    vis_flat, txt_flat = pl.pallas_call(
        kernel,
        grid=(steps,),
        in_specs=in_specs,
        out_specs=[pl.BlockSpec((M, HPAD), lambda g: (g, 0)),
                   pl.BlockSpec((R, HPAD), lambda g: (g, 0))],
        out_shape=(jax.ShapeDtypeStruct((B * n_patch, HPAD), jnp.float32),
                   jax.ShapeDtypeStruct((B * Sp, HPAD), jnp.float32)),
        compiler_params=pltpu.CompilerParams(dimension_semantics=("parallel",)),
    )(*args)

    image_embeds = vis_flat[:, :Hd].reshape(B, n_patch, Hd)      # drop lane padding
    prefix_text_embeds = txt_flat[:, :Hd].reshape(B, Sp, Hd)
    # tgt embeddings are a pure table lookup (no pos / LN): single XLA gather.
    tgt_text_embeds = jnp.take(params["word_emb"], tgt_text, axis=0)
    co_embeds = jnp.concatenate([image_embeds, prefix_text_embeds], axis=1)

    return {"image_embeds": image_embeds,
            "prefix_text_embeds": prefix_text_embeds,
            "tgt_embeds": tgt_text_embeds,
            "co_embeds": co_embeds}


# --------------------------------------------------------------------------
if __name__ == "__main__":
    cfg = Config()
    params = init_params(jax.random.PRNGKey(0), cfg)

    key = jax.random.PRNGKey(0)
    k_img, k_pre, k_tgt = jax.random.split(key, 3)
    image = jax.random.normal(
        k_img, (2, cfg.num_channels, cfg.image_size, cfg.image_size), jnp.float32)
    prefix_text = jax.random.randint(k_pre, (2, 8), 0, cfg.vocab_size, dtype=jnp.int32)
    tgt_text = jax.random.randint(k_tgt, (2, 6), 0, cfg.vocab_size, dtype=jnp.int32)

    fwd = jax.jit(lambda p, im, pre, tgt: simvlm_embeddings_forward(p, im, pre, tgt, cfg))
    out = fwd(params, image, prefix_text, tgt_text)
    out = jax.tree_util.tree_map(jax.block_until_ready, out)

    num_patches = (cfg.image_size // cfg.patch_size) ** 2
    assert out["image_embeds"].shape == (2, num_patches, cfg.hidden_size)
    assert out["prefix_text_embeds"].shape == (2, 8, cfg.hidden_size)
    assert out["tgt_embeds"].shape == (2, 6, cfg.hidden_size)
    assert out["co_embeds"].shape == (2, num_patches + 8, cfg.hidden_size)

    # LayerNorm invariant (gamma=1, beta=0): per-token mean of prefix embeds ~ 0.
    row_mean = np.asarray(jnp.mean(out["prefix_text_embeds"], axis=-1))
    assert np.max(np.abs(row_mean)) < 1e-3, "text LayerNorm sanity check failed"

    print("KERNEL_OK")
</pallas_src>

<mosaic_0001>
module attributes {stable_mosaic.version = 11 : i64} {
  func.func @_fused_embeddings_kernel(%arg0: i32, %arg1: memref<32x64xbf16, #tpu.memory_space<vmem>>, %arg2: memref<16x1xi32, #tpu.memory_space<vmem>>, %arg3: memref<64x128xbf16, #tpu.memory_space<vmem>>, %arg4: memref<1x128xf32, #tpu.memory_space<vmem>>, %arg5: memref<128x384xbf16, #tpu.memory_space<vmem>>, %arg6: memref<1x384xf32, #tpu.memory_space<vmem>>, %arg7: memref<1152x128xbf16, #tpu.memory_space<vmem>>, %arg8: memref<1x128xf32, #tpu.memory_space<vmem>>, %arg9: memref<128x256xbf16, #tpu.memory_space<vmem>>, %arg10: memref<1x256xf32, #tpu.memory_space<vmem>>, %arg11: memref<256x256xbf16, #tpu.memory_space<vmem>>, %arg12: memref<1x256xf32, #tpu.memory_space<vmem>>, %arg13: memref<1152x128xbf16, #tpu.memory_space<vmem>>, %arg14: memref<1x128xf32, #tpu.memory_space<vmem>>, %arg15: memref<128x128xbf16, #tpu.memory_space<vmem>>, %arg16: memref<1x128xf32, #tpu.memory_space<vmem>>, %arg17: memref<16x128xf32, #tpu.memory_space<vmem>>, %arg18: memref<9x32x1xf32, #tpu.memory_space<vmem>>, %arg19: memref<128x128xf32, #tpu.memory_space<vmem>>, %arg20: memref<8x128xf32, #tpu.memory_space<vmem>>, %arg21: memref<1x128xf32, #tpu.memory_space<vmem>>, %arg22: memref<1x128xf32, #tpu.memory_space<vmem>>, %arg23: memref<32x128xf32, #tpu.memory_space<vmem>>, %arg24: memref<16x128xf32, #tpu.memory_space<vmem>>) attributes {dimension_semantics = [#tpu.dimension_semantics<parallel>], iteration_bounds = array<i64: 1>, scalar_prefetch = 0 : i64, scratch_operands = 0 : i64, tpu.core_type = #tpu.core_type<tc>, window_params = [{transform_indices = @transform_0, window_bounds = array<i64: 32, 64>}, {transform_indices = @transform_1, window_bounds = array<i64: 16, 1>}, {pipeline_mode = #tpu.pipeline_mode<synchronous>, transform_indices = @transform_2, window_bounds = array<i64: 64, 128>}, {pipeline_mode = #tpu.pipeline_mode<synchronous>, transform_indices = @transform_3, window_bounds = array<i64: 1, 128>}, {pipeline_mode = #tpu.pipeline_mode<synchronous>, transform_indices = @transform_4, window_bounds = array<i64: 128, 384>}, {pipeline_mode = #tpu.pipeline_mode<synchronous>, transform_indices = @transform_5, window_bounds = array<i64: 1, 384>}, {pipeline_mode = #tpu.pipeline_mode<synchronous>, transform_indices = @transform_6, window_bounds = array<i64: 1152, 128>}, {pipeline_mode = #tpu.pipeline_mode<synchronous>, transform_indices = @transform_7, window_bounds = array<i64: 1, 128>}, {pipeline_mode = #tpu.pipeline_mode<synchronous>, transform_indices = @transform_8, window_bounds = array<i64: 128, 256>}, {pipeline_mode = #tpu.pipeline_mode<synchronous>, transform_indices = @transform_9, window_bounds = array<i64: 1, 256>}, {pipeline_mode = #tpu.pipeline_mode<synchronous>, transform_indices = @transform_10, window_bounds = array<i64: 256, 256>}, {pipeline_mode = #tpu.pipeline_mode<synchronous>, transform_indices = @transform_11, window_bounds = array<i64: 1, 256>}, {pipeline_mode = #tpu.pipeline_mode<synchronous>, transform_indices = @transform_12, window_bounds = array<i64: 1152, 128>}, {pipeline_mode = #tpu.pipeline_mode<synchronous>, transform_indices = @transform_13, window_bounds = array<i64: 1, 128>}, {pipeline_mode = #tpu.pipeline_mode<synchronous>, transform_indices = @transform_14, window_bounds = array<i64: 128, 128>}, {pipeline_mode = #tpu.pipeline_mode<synchronous>, transform_indices = @transform_15, window_bounds = array<i64: 1, 128>}, {pipeline_mode = #tpu.pipeline_mode<synchronous>, transform_indices = @transform_16, window_bounds = array<i64: 16, 128>}, {pipeline_mode = #tpu.pipeline_mode<synchronous>, transform_indices = @transform_17, window_bounds = array<i64: 9, 32, 1>}, {pipeline_mode = #tpu.pipeline_mode<synchronous>, transform_indices = @transform_18, window_bounds = array<i64: 128, 128>}, {pipeline_mode = #tpu.pipeline_mode<synchronous>, transform_indices = @transform_19, window_bounds = array<i64: 8, 128>}, {pipeline_mode = #tpu.pipeline_mode<synchronous>, transform_indices = @transform_20, window_bounds = array<i64: 1, 128>}, {pipeline_mode = #tpu.pipeline_mode<synchronous>, transform_indices = @transform_21, window_bounds = array<i64: 1, 128>}, {transform_indices = @transform_22, window_bounds = array<i64: 32, 128>}, {transform_indices = @transform_23, window_bounds = array<i64: 16, 128>}]} {
    %c0 = arith.constant 0 : index
    %c0_0 = arith.constant 0 : index
    %0 = vector.load %arg1[%c0, %c0_0] : memref<32x64xbf16, #tpu.memory_space<vmem>>, vector<32x64xbf16>
    %c0_1 = arith.constant 0 : index
    %c0_2 = arith.constant 0 : index
    %1 = vector.load %arg3[%c0_1, %c0_2] : memref<64x128xbf16, #tpu.memory_space<vmem>>, vector<64x128xbf16>
    %cst = arith.constant dense<0.000000e+00> : vector<32x128xf32>
    %2 = tpu.matmul %0, %1, %cst {dimension_numbers = #tpu.dot_dimension_numbers<[1], [0], [0], [1], [0, 0, 1, 1], [], []>} : vector<32x64xbf16>, vector<64x128xbf16>, vector<32x128xf32> -> vector<32x128xf32>
    %c0_3 = arith.constant 0 : index
    %c0_4 = arith.constant 0 : index
    %3 = vector.load %arg4[%c0_3, %c0_4] : memref<1x128xf32, #tpu.memory_space<vmem>>, vector<1x128xf32>
    %4 = vector.broadcast %3 : vector<1x128xf32> to vector<32x128xf32>
    %5 = arith.addf %2, %4 : vector<32x128xf32>
    %6 = arith.truncf %5 : vector<32x128xf32> to vector<32x128xbf16>
    %c0_5 = arith.constant 0 : index
    %c0_6 = arith.constant 0 : index
    %7 = vector.load %arg5[%c0_5, %c0_6] : memref<128x384xbf16, #tpu.memory_space<vmem>>, vector<128x384xbf16>
    %cst_7 = arith.constant dense<0.000000e+00> : vector<32x384xf32>
    %8 = tpu.matmul %6, %7, %cst_7 {dimension_numbers = #tpu.dot_dimension_numbers<[1], [0], [0], [1], [0, 0, 1, 1], [], []>} : vector<32x128xbf16>, vector<128x384xbf16>, vector<32x384xf32> -> vector<32x384xf32>
    %c0_8 = arith.constant 0 : index
    %c0_9 = arith.constant 0 : index
    %9 = vector.load %arg6[%c0_8, %c0_9] : memref<1x384xf32, #tpu.memory_space<vmem>>, vector<1x384xf32>
    %10 = vector.broadcast %9 : vector<1x384xf32> to vector<32x384xf32>
    %11 = arith.addf %8, %10 : vector<32x384xf32>
    %12 = vector.extract_strided_slice %11 {offsets = [0, 0], sizes = [32, 256], strides = [1, 1]} : vector<32x384xf32> to vector<32x256xf32>
    %13 = vector.extract_strided_slice %11 {offsets = [0, 256], sizes = [32, 128], strides = [1, 1]} : vector<32x384xf32> to vector<32x128xf32>
    %cst_10 = arith.constant 0.000000e+00 : f32
    %14 = vector.broadcast %cst_10 : f32 to vector<32x128xf32>
    %15 = arith.maximumf %13, %14 : vector<32x128xf32>
    %c5_i32 = arith.constant 5 : i32
    %16 = tpu.dynamic_rotate %15 by %c5_i32 dim 0 : vector<32x128xf32>, i32 -> vector<32x128xf32>
    %c0_11 = arith.constant 0 : index
    %c0_12 = arith.constant 0 : index
    %c0_13 = arith.constant 0 : index
    %17 = vector.load %arg18[%c0_11, %c0_12, %c0_13] : memref<9x32x1xf32, #tpu.memory_space<vmem>>, vector<1x32x1xf32>
    %18 = vector.shape_cast %17 : vector<1x32x1xf32> to vector<32x1xf32>
    %19 = vector.broadcast %18 : vector<32x1xf32> to vector<32x128xf32>
    %20 = arith.mulf %16, %19 : vector<32x128xf32>
    %c4_i32 = arith.constant 4 : i32
    %21 = tpu.dynamic_rotate %15 by %c4_i32 dim 0 : vector<32x128xf32>, i32 -> vector<32x128xf32>
    %c1 = arith.constant 1 : index
    %c0_14 = arith.constant 0 : index
    %c0_15 = arith.constant 0 : index
    %22 = vector.load %arg18[%c1, %c0_14, %c0_15] : memref<9x32x1xf32, #tpu.memory_space<vmem>>, vector<1x32x1xf32>
    %23 = vector.shape_cast %22 : vector<1x32x1xf32> to vector<32x1xf32>
    %24 = vector.broadcast %23 : vector<32x1xf32> to vector<32x128xf32>
    %25 = arith.mulf %21, %24 : vector<32x128xf32>
    %c3_i32 = arith.constant 3 : i32
    %26 = tpu.dynamic_rotate %15 by %c3_i32 dim 0 : vector<32x128xf32>, i32 -> vector<32x128xf32>
    %c2 = arith.constant 2 : index
    %c0_16 = arith.constant 0 : index
    %c0_17 = arith.constant 0 : index
    %27 = vector.load %arg18[%c2, %c0_16, %c0_17] : memref<9x32x1xf32, #tpu.memory_space<vmem>>, vector<1x32x1xf32>
    %28 = vector.shape_cast %27 : vector<1x32x1xf32> to vector<32x1xf32>
    %29 = vector.broadcast %28 : vector<32x1xf32> to vector<32x128xf32>
    %30 = arith.mulf %26, %29 : vector<32x128xf32>
    %c1_i32 = arith.constant 1 : i32
    %31 = tpu.dynamic_rotate %15 by %c1_i32 dim 0 : vector<32x128xf32>, i32 -> vector<32x128xf32>
    %c3 = arith.constant 3 : index
    %c0_18 = arith.constant 0 : index
    %c0_19 = arith.constant 0 : index
    %32 = vector.load %arg18[%c3, %c0_18, %c0_19] : memref<9x32x1xf32, #tpu.memory_space<vmem>>, vector<1x32x1xf32>
    %33 = vector.shape_cast %32 : vector<1x32x1xf32> to vector<32x1xf32>
    %34 = vector.broadcast %33 : vector<32x1xf32> to vector<32x128xf32>
    %35 = arith.mulf %31, %34 : vector<32x128xf32>
    %c4 = arith.constant 4 : index
    %c0_20 = arith.constant 0 : index
    %c0_21 = arith.constant 0 : index
    %36 = vector.load %arg18[%c4, %c0_20, %c0_21] : memref<9x32x1xf32, #tpu.memory_space<vmem>>, vector<1x32x1xf32>
    %37 = vector.shape_cast %36 : vector<1x32x1xf32> to vector<32x1xf32>
    %38 = vector.broadcast %37 : vector<32x1xf32> to vector<32x128xf32>
    %39 = arith.mulf %15, %38 : vector<32x128xf32>
    %c31_i32 = arith.constant 31 : i32
    %40 = tpu.dynamic_rotate %15 by %c31_i32 dim 0 : vector<32x128xf32>, i32 -> vector<32x128xf32>
    %c5 = arith.constant 5 : index
    %c0_22 = arith.constant 0 : index
    %c0_23 = arith.constant 0 : index
    %41 = vector.load %arg18[%c5, %c0_22, %c0_23] : memref<9x32x1xf32, #tpu.memory_space<vmem>>, vector<1x32x1xf32>
    %42 = vector.shape_cast %41 : vector<1x32x1xf32> to vector<32x1xf32>
    %43 = vector.broadcast %42 : vector<32x1xf32> to vector<32x128xf32>
    %44 = arith.mulf %40, %43 : vector<32x128xf32>
    %c29_i32 = arith.constant 29 : i32
    %45 = tpu.dynamic_rotate %15 by %c29_i32 dim 0 : vector<32x128xf32>, i32 -> vector<32x128xf32>
    %c6 = arith.constant 6 : index
    %c0_24 = arith.constant 0 : index
    %c0_25 = arith.constant 0 : index
    %46 = vector.load %arg18[%c6, %c0_24, %c0_25] : memref<9x32x1xf32, #tpu.memory_space<vmem>>, vector<1x32x1xf32>
    %47 = vector.shape_cast %46 : vector<1x32x1xf32> to vector<32x1xf32>
    %48 = vector.broadcast %47 : vector<32x1xf32> to vector<32x128xf32>
    %49 = arith.mulf %45, %48 : vector<32x128xf32>
    %c28_i32 = arith.constant 28 : i32
    %50 = tpu.dynamic_rotate %15 by %c28_i32 dim 0 : vector<32x128xf32>, i32 -> vector<32x128xf32>
    %c7 = arith.constant 7 : index
    %c0_26 = arith.constant 0 : index
    %c0_27 = arith.constant 0 : index
    %51 = vector.load %arg18[%c7, %c0_26, %c0_27] : memref<9x32x1xf32, #tpu.memory_space<vmem>>, vector<1x32x1xf32>
    %52 = vector.shape_cast %51 : vector<1x32x1xf32> to vector<32x1xf32>
    %53 = vector.broadcast %52 : vector<32x1xf32> to vector<32x128xf32>
    %54 = arith.mulf %50, %53 : vector<32x128xf32>
    %c27_i32 = arith.constant 27 : i32
    %55 = tpu.dynamic_rotate %15 by %c27_i32 dim 0 : vector<32x128xf32>, i32 -> vector<32x128xf32>
    %c8 = arith.constant 8 : index
    %c0_28 = arith.constant 0 : index
    %c0_29 = arith.constant 0 : index
    %56 = vector.load %arg18[%c8, %c0_28, %c0_29] : memref<9x32x1xf32, #tpu.memory_space<vmem>>, vector<1x32x1xf32>
    %57 = vector.shape_cast %56 : vector<1x32x1xf32> to vector<32x1xf32>
    %58 = vector.broadcast %57 : vector<32x1xf32> to vector<32x128xf32>
    %59 = arith.mulf %55, %58 : vector<32x128xf32>
    %60 = tpu.concatenate %20, %25, %30, %35, %39, %44, %49, %54, %59 in 1 : vector<32x128xf32>, vector<32x128xf32>, vector<32x128xf32>, vector<32x128xf32>, vector<32x128xf32>, vector<32x128xf32>, vector<32x128xf32>, vector<32x128xf32>, vector<32x128xf32> -> vector<32x1152xf32>
    %61 = arith.truncf %60 : vector<32x1152xf32> to vector<32x1152xbf16>
    %c0_30 = arith.constant 0 : index
    %c0_31 = arith.constant 0 : index
    %62 = vector.load %arg7[%c0_30, %c0_31] : memref<1152x128xbf16, #tpu.memory_space<vmem>>, vector<1152x128xbf16>
    %cst_32 = arith.constant dense<0.000000e+00> : vector<32x128xf32>
    %63 = tpu.matmul %61, %62, %cst_32 {dimension_numbers = #tpu.dot_dimension_numbers<[1], [0], [0], [1], [0, 0, 1, 1], [], []>} : vector<32x1152xbf16>, vector<1152x128xbf16>, vector<32x128xf32> -> vector<32x128xf32>
    %c0_33 = arith.constant 0 : index
    %c0_34 = arith.constant 0 : index
    %64 = vector.load %arg8[%c0_33, %c0_34] : memref<1x128xf32, #tpu.memory_space<vmem>>, vector<1x128xf32>
    %65 = vector.broadcast %64 : vector<1x128xf32> to vector<32x128xf32>
    %66 = arith.addf %63, %65 : vector<32x128xf32>
    %cst_35 = arith.constant 0.000000e+00 : f32
    %67 = vector.broadcast %cst_35 : f32 to vector<32x128xf32>
    %68 = arith.maximumf %66, %67 : vector<32x128xf32>
    %69 = arith.truncf %68 : vector<32x128xf32> to vector<32x128xbf16>
    %c0_36 = arith.constant 0 : index
    %c0_37 = arith.constant 0 : index
    %70 = vector.load %arg9[%c0_36, %c0_37] : memref<128x256xbf16, #tpu.memory_space<vmem>>, vector<128x256xbf16>
    %cst_38 = arith.constant dense<0.000000e+00> : vector<32x256xf32>
    %71 = tpu.matmul %69, %70, %cst_38 {dimension_numbers = #tpu.dot_dimension_numbers<[1], [0], [0], [1], [0, 0, 1, 1], [], []>} : vector<32x128xbf16>, vector<128x256xbf16>, vector<32x256xf32> -> vector<32x256xf32>
    %c0_39 = arith.constant 0 : index
    %c0_40 = arith.constant 0 : index
    %72 = vector.load %arg10[%c0_39, %c0_40] : memref<1x256xf32, #tpu.memory_space<vmem>>, vector<1x256xf32>
    %73 = vector.broadcast %72 : vector<1x256xf32> to vector<32x256xf32>
    %74 = arith.addf %71, %73 : vector<32x256xf32>
    %75 = arith.addf %74, %12 : vector<32x256xf32>
    %cst_41 = arith.constant 0.000000e+00 : f32
    %76 = vector.broadcast %cst_41 : f32 to vector<32x256xf32>
    %77 = arith.maximumf %75, %76 : vector<32x256xf32>
    %78 = arith.truncf %77 : vector<32x256xf32> to vector<32x256xbf16>
    %c0_42 = arith.constant 0 : index
    %c0_43 = arith.constant 0 : index
    %79 = vector.load %arg11[%c0_42, %c0_43] : memref<256x256xbf16, #tpu.memory_space<vmem>>, vector<256x256xbf16>
    %cst_44 = arith.constant dense<0.000000e+00> : vector<32x256xf32>
    %80 = tpu.matmul %78, %79, %cst_44 {dimension_numbers = #tpu.dot_dimension_numbers<[1], [0], [0], [1], [0, 0, 1, 1], [], []>} : vector<32x256xbf16>, vector<256x256xbf16>, vector<32x256xf32> -> vector<32x256xf32>
    %c0_45 = arith.constant 0 : index
    %c0_46 = arith.constant 0 : index
    %81 = vector.load %arg12[%c0_45, %c0_46] : memref<1x256xf32, #tpu.memory_space<vmem>>, vector<1x256xf32>
    %82 = vector.broadcast %81 : vector<1x256xf32> to vector<32x256xf32>
    %83 = arith.addf %80, %82 : vector<32x256xf32>
    %84 = vector.extract_strided_slice %83 {offsets = [0, 0], sizes = [32, 128], strides = [1, 1]} : vector<32x256xf32> to vector<32x128xf32>
    %85 = vector.extract_strided_slice %83 {offsets = [0, 128], sizes = [32, 128], strides = [1, 1]} : vector<32x256xf32> to vector<32x128xf32>
    %cst_47 = arith.constant 0.000000e+00 : f32
    %86 = vector.broadcast %cst_47 : f32 to vector<32x128xf32>
    %87 = arith.maximumf %85, %86 : vector<32x128xf32>
    %c5_i32_48 = arith.constant 5 : i32
    %88 = tpu.dynamic_rotate %87 by %c5_i32_48 dim 0 : vector<32x128xf32>, i32 -> vector<32x128xf32>
    %c0_49 = arith.constant 0 : index
    %c0_50 = arith.constant 0 : index
    %c0_51 = arith.constant 0 : index
    %89 = vector.load %arg18[%c0_49, %c0_50, %c0_51] : memref<9x32x1xf32, #tpu.memory_space<vmem>>, vector<1x32x1xf32>
    %90 = vector.shape_cast %89 : vector<1x32x1xf32> to vector<32x1xf32>
    %91 = vector.broadcast %90 : vector<32x1xf32> to vector<32x128xf32>
    %92 = arith.mulf %88, %91 : vector<32x128xf32>
    %c4_i32_52 = arith.constant 4 : i32
    %93 = tpu.dynamic_rotate %87 by %c4_i32_52 dim 0 : vector<32x128xf32>, i32 -> vector<32x128xf32>
    %c1_53 = arith.constant 1 : index
    %c0_54 = arith.constant 0 : index
    %c0_55 = arith.constant 0 : index
    %94 = vector.load %arg18[%c1_53, %c0_54, %c0_55] : memref<9x32x1xf32, #tpu.memory_space<vmem>>, vector<1x32x1xf32>
    %95 = vector.shape_cast %94 : vector<1x32x1xf32> to vector<32x1xf32>
    %96 = vector.broadcast %95 : vector<32x1xf32> to vector<32x128xf32>
    %97 = arith.mulf %93, %96 : vector<32x128xf32>
    %c3_i32_56 = arith.constant 3 : i32
    %98 = tpu.dynamic_rotate %87 by %c3_i32_56 dim 0 : vector<32x128xf32>, i32 -> vector<32x128xf32>
    %c2_57 = arith.constant 2 : index
    %c0_58 = arith.constant 0 : index
    %c0_59 = arith.constant 0 : index
    %99 = vector.load %arg18[%c2_57, %c0_58, %c0_59] : memref<9x32x1xf32, #tpu.memory_space<vmem>>, vector<1x32x1xf32>
    %100 = vector.shape_cast %99 : vector<1x32x1xf32> to vector<32x1xf32>
    %101 = vector.broadcast %100 : vector<32x1xf32> to vector<32x128xf32>
    %102 = arith.mulf %98, %101 : vector<32x128xf32>
    %c1_i32_60 = arith.constant 1 : i32
    %103 = tpu.dynamic_rotate %87 by %c1_i32_60 dim 0 : vector<32x128xf32>, i32 -> vector<32x128xf32>
    %c3_61 = arith.constant 3 : index
    %c0_62 = arith.constant 0 : index
    %c0_63 = arith.constant 0 : index
    %104 = vector.load %arg18[%c3_61, %c0_62, %c0_63] : memref<9x32x1xf32, #tpu.memory_space<vmem>>, vector<1x32x1xf32>
    %105 = vector.shape_cast %104 : vector<1x32x1xf32> to vector<32x1xf32>
    %106 = vector.broadcast %105 : vector<32x1xf32> to vector<32x128xf32>
    %107 = arith.mulf %103, %106 : vector<32x128xf32>
    %c4_64 = arith.constant 4 : index
    %c0_65 = arith.constant 0 : index
    %c0_66 = arith.constant 0 : index
    %108 = vector.load %arg18[%c4_64, %c0_65, %c0_66] : memref<9x32x1xf32, #tpu.memory_space<vmem>>, vector<1x32x1xf32>
    %109 = vector.shape_cast %108 : vector<1x32x1xf32> to vector<32x1xf32>
    %110 = vector.broadcast %109 : vector<32x1xf32> to vector<32x128xf32>
    %111 = arith.mulf %87, %110 : vector<32x128xf32>
    %c31_i32_67 = arith.constant 31 : i32
    %112 = tpu.dynamic_rotate %87 by %c31_i32_67 dim 0 : vector<32x128xf32>, i32 -> vector<32x128xf32>
    %c5_68 = arith.constant 5 : index
    %c0_69 = arith.constant 0 : index
    %c0_70 = arith.constant 0 : index
    %113 = vector.load %arg18[%c5_68, %c0_69, %c0_70] : memref<9x32x1xf32, #tpu.memory_space<vmem>>, vector<1x32x1xf32>
    %114 = vector.shape_cast %113 : vector<1x32x1xf32> to vector<32x1xf32>
    %115 = vector.broadcast %114 : vector<32x1xf32> to vector<32x128xf32>
    %116 = arith.mulf %112, %115 : vector<32x128xf32>
    %c29_i32_71 = arith.constant 29 : i32
    %117 = tpu.dynamic_rotate %87 by %c29_i32_71 dim 0 : vector<32x128xf32>, i32 -> vector<32x128xf32>
    %c6_72 = arith.constant 6 : index
    %c0_73 = arith.constant 0 : index
    %c0_74 = arith.constant 0 : index
    %118 = vector.load %arg18[%c6_72, %c0_73, %c0_74] : memref<9x32x1xf32, #tpu.memory_space<vmem>>, vector<1x32x1xf32>
    %119 = vector.shape_cast %118 : vector<1x32x1xf32> to vector<32x1xf32>
    %120 = vector.broadcast %119 : vector<32x1xf32> to vector<32x128xf32>
    %121 = arith.mulf %117, %120 : vector<32x128xf32>
    %c28_i32_75 = arith.constant 28 : i32
    %122 = tpu.dynamic_rotate %87 by %c28_i32_75 dim 0 : vector<32x128xf32>, i32 -> vector<32x128xf32>
    %c7_76 = arith.constant 7 : index
    %c0_77 = arith.constant 0 : index
    %c0_78 = arith.constant 0 : index
    %123 = vector.load %arg18[%c7_76, %c0_77, %c0_78] : memref<9x32x1xf32, #tpu.memory_space<vmem>>, vector<1x32x1xf32>
    %124 = vector.shape_cast %123 : vector<1x32x1xf32> to vector<32x1xf32>
    %125 = vector.broadcast %124 : vector<32x1xf32> to vector<32x128xf32>
    %126 = arith.mulf %122, %125 : vector<32x128xf32>
    %c27_i32_79 = arith.constant 27 : i32
    %127 = tpu.dynamic_rotate %87 by %c27_i32_79 dim 0 : vector<32x128xf32>, i32 -> vector<32x128xf32>
    %c8_80 = arith.constant 8 : index
    %c0_81 = arith.constant 0 : index
    %c0_82 = arith.constant 0 : index
    %128 = vector.load %arg18[%c8_80, %c0_81, %c0_82] : memref<9x32x1xf32, #tpu.memory_space<vmem>>, vector<1x32x1xf32>
    %129 = vector.shape_cast %128 : vector<1x32x1xf32> to vector<32x1xf32>
    %130 = vector.broadcast %129 : vector<32x1xf32> to vector<32x128xf32>
    %131 = arith.mulf %127, %130 : vector<32x128xf32>
    %132 = tpu.concatenate %92, %97, %102, %107, %111, %116, %121, %126, %131 in 1 : vector<32x128xf32>, vector<32x128xf32>, vector<32x128xf32>, vector<32x128xf32>, vector<32x128xf32>, vector<32x128xf32>, vector<32x128xf32>, vector<32x128xf32>, vector<32x128xf32> -> vector<32x1152xf32>
    %133 = arith.truncf %132 : vector<32x1152xf32> to vector<32x1152xbf16>
    %c0_83 = arith.constant 0 : index
    %c0_84 = arith.constant 0 : index
    %134 = vector.load %arg13[%c0_83, %c0_84] : memref<1152x128xbf16, #tpu.memory_space<vmem>>, vector<1152x128xbf16>
    %cst_85 = arith.constant dense<0.000000e+00> : vector<32x128xf32>
    %135 = tpu.matmul %133, %134, %cst_85 {dimension_numbers = #tpu.dot_dimension_numbers<[1], [0], [0], [1], [0, 0, 1, 1], [], []>} : vector<32x1152xbf16>, vector<1152x128xbf16>, vector<32x128xf32> -> vector<32x128xf32>
    %c0_86 = arith.constant 0 : index
    %c0_87 = arith.constant 0 : index
    %136 = vector.load %arg14[%c0_86, %c0_87] : memref<1x128xf32, #tpu.memory_space<vmem>>, vector<1x128xf32>
    %137 = vector.broadcast %136 : vector<1x128xf32> to vector<32x128xf32>
    %138 = arith.addf %135, %137 : vector<32x128xf32>
    %cst_88 = arith.constant 0.000000e+00 : f32
    %139 = vector.broadcast %cst_88 : f32 to vector<32x128xf32>
    %140 = arith.maximumf %138, %139 : vector<32x128xf32>
    %141 = arith.truncf %140 : vector<32x128xf32> to vector<32x128xbf16>
    %c0_89 = arith.constant 0 : index
    %c0_90 = arith.constant 0 : index
    %142 = vector.load %arg15[%c0_89, %c0_90] : memref<128x128xbf16, #tpu.memory_space<vmem>>, vector<128x128xbf16>
    %cst_91 = arith.constant dense<0.000000e+00> : vector<32x128xf32>
    %143 = tpu.matmul %141, %142, %cst_91 {dimension_numbers = #tpu.dot_dimension_numbers<[1], [0], [0], [1], [0, 0, 1, 1], [], []>} : vector<32x128xbf16>, vector<128x128xbf16>, vector<32x128xf32> -> vector<32x128xf32>
    %c0_92 = arith.constant 0 : index
    %c0_93 = arith.constant 0 : index
    %144 = vector.load %arg16[%c0_92, %c0_93] : memref<1x128xf32, #tpu.memory_space<vmem>>, vector<1x128xf32>
    %145 = vector.broadcast %144 : vector<1x128xf32> to vector<32x128xf32>
    %146 = arith.addf %143, %145 : vector<32x128xf32>
    %147 = arith.addf %146, %84 : vector<32x128xf32>
    %cst_94 = arith.constant 0.000000e+00 : f32
    %148 = vector.broadcast %cst_94 : f32 to vector<32x128xf32>
    %149 = arith.maximumf %147, %148 : vector<32x128xf32>
    %c0_95 = arith.constant 0 : index
    %c0_96 = arith.constant 0 : index
    %150 = vector.load %arg17[%c0_95, %c0_96] : memref<16x128xf32, #tpu.memory_space<vmem>>, vector<16x128xf32>
    %151 = tpu.concatenate %150, %150 in 0 : vector<16x128xf32>, vector<16x128xf32> -> vector<32x128xf32>
    %152 = arith.addf %149, %151 : vector<32x128xf32>
    %c0_97 = arith.constant 0 : index
    %c0_98 = arith.constant 0 : index
    %153 = vector.load %arg23[%c0_97, %c0_98] : memref<32x128xf32, #tpu.memory_space<vmem>>, vector<32x128xf32>
    tpu.vector_store %arg23[%c0_97, %c0_98], %152 {strides = array<i32>} : memref<32x128xf32, #tpu.memory_space<vmem>>, vector<32x128xf32>,
    %c0_99 = arith.constant 0 : index
    %c0_100 = arith.constant 0 : index
    %154 = vector.load %arg2[%c0_99, %c0_100] : memref<16x1xi32, #tpu.memory_space<vmem>>, vector<16x1xi32>
    %155 = tpu.iota {dimensions = array<i32: 1>} : vector<16x128xi32>
    %156 = vector.broadcast %154 : vector<16x1xi32> to vector<16x128xi32>
    %157 = arith.cmpi eq, %155, %156 : vector<16x128xi32>
    %158 = arith.extui %157 : vector<16x128xi1> to vector<16x128xi32>
    %159 = arith.sitofp %158 : vector<16x128xi32> to vector<16x128xf32>
    %c0_101 = arith.constant 0 : index
    %c0_102 = arith.constant 0 : index
    %160 = vector.load %arg19[%c0_101, %c0_102] : memref<128x128xf32, #tpu.memory_space<vmem>>, vector<128x128xf32>
    %cst_103 = arith.constant dense<0.000000e+00> : vector<16x128xf32>
    %161 = tpu.matmul %159, %160, %cst_103 {dimension_numbers = #tpu.dot_dimension_numbers<[1], [0], [0], [1], [0, 0, 1, 1], [], []>} : vector<16x128xf32>, vector<128x128xf32>, vector<16x128xf32> -> vector<16x128xf32>
    %c0_104 = arith.constant 0 : index
    %c0_105 = arith.constant 0 : index
    %162 = vector.load %arg20[%c0_104, %c0_105] : memref<8x128xf32, #tpu.memory_space<vmem>>, vector<8x128xf32>
    %163 = tpu.concatenate %162, %162 in 0 : vector<8x128xf32>, vector<8x128xf32> -> vector<16x128xf32>
    %164 = arith.addf %161, %163 : vector<16x128xf32>
    %165 = tpu.iota {dimensions = array<i32: 1>} : vector<16x128xi32>
    %c32_i32 = arith.constant 32 : i32
    %166 = vector.broadcast %c32_i32 : i32 to vector<16x128xi32>
    %167 = arith.cmpi slt, %165, %166 : vector<16x128xi32>
    %168 = arith.extui %167 : vector<16x128xi1> to vector<16x128xi32>
    %169 = arith.sitofp %168 : vector<16x128xi32> to vector<16x128xf32>
    %170 = arith.mulf %164, %169 : vector<16x128xf32>
    %cst_106 = arith.constant dense<0.000000e+00> : vector<16xf32>
    %171 = vector.multi_reduction <add>, %170, %cst_106 [1] : vector<16x128xf32> to vector<16xf32>
    %172 = vector.shape_cast %171 : vector<16xf32> to vector<16x1xf32>
    %cst_107 = arith.constant 3.125000e-02 : f32
    %173 = vector.broadcast %cst_107 : f32 to vector<16x1xf32>
    %174 = arith.mulf %172, %173 : vector<16x1xf32>
    %175 = vector.broadcast %174 : vector<16x1xf32> to vector<16x128xf32>
    %176 = arith.subf %164, %175 : vector<16x128xf32>
    %177 = arith.mulf %176, %169 : vector<16x128xf32>
    %178 = arith.mulf %177, %177 : vector<16x128xf32>
    %cst_108 = arith.constant dense<0.000000e+00> : vector<16xf32>
    %179 = vector.multi_reduction <add>, %178, %cst_108 [1] : vector<16x128xf32> to vector<16xf32>
    %180 = vector.shape_cast %179 : vector<16xf32> to vector<16x1xf32>
    %cst_109 = arith.constant 3.125000e-02 : f32
    %181 = vector.broadcast %cst_109 : f32 to vector<16x1xf32>
    %182 = arith.mulf %180, %181 : vector<16x1xf32>
    %cst_110 = arith.constant 9.99999996E-13 : f32
    %183 = vector.broadcast %cst_110 : f32 to vector<16x1xf32>
    %184 = arith.addf %182, %183 : vector<16x1xf32>
    %185 = math.rsqrt %184 : vector<16x1xf32>
    %186 = vector.broadcast %185 : vector<16x1xf32> to vector<16x128xf32>
    %187 = arith.mulf %177, %186 : vector<16x128xf32>
    %c0_111 = arith.constant 0 : index
    %c0_112 = arith.constant 0 : index
    %188 = vector.load %arg21[%c0_111, %c0_112] : memref<1x128xf32, #tpu.memory_space<vmem>>, vector<1x128xf32>
    %189 = vector.broadcast %188 : vector<1x128xf32> to vector<16x128xf32>
    %190 = arith.mulf %187, %189 : vector<16x128xf32>
    %c0_113 = arith.constant 0 : index
    %c0_114 = arith.constant 0 : index
    %191 = vector.load %arg22[%c0_113, %c0_114] : memref<1x128xf32, #tpu.memory_space<vmem>>, vector<1x128xf32>
    %192 = vector.broadcast %191 : vector<1x128xf32> to vector<16x128xf32>
    %193 = arith.addf %190, %192 : vector<16x128xf32>
    %c0_115 = arith.constant 0 : index
    %c0_116 = arith.constant 0 : index
    %194 = vector.load %arg24[%c0_115, %c0_116] : memref<16x128xf32, #tpu.memory_space<vmem>>, vector<16x128xf32>
    tpu.vector_store %arg24[%c0_115, %c0_116], %193 {strides = array<i32>} : memref<16x128xf32, #tpu.memory_space<vmem>>, vector<16x128xf32>,
    return
  }
  func.func @transform_0(%arg0: i32) -> (i32, i32) {
    %c0_i32 = arith.constant 0 : i32
    %c0_i32_0 = arith.constant 0 : i32
    return %arg0, %c0_i32 : i32, i32
  }
  func.func @transform_1(%arg0: i32) -> (i32, i32) {
    %c0_i32 = arith.constant 0 : i32
    %c0_i32_0 = arith.constant 0 : i32
    return %arg0, %c0_i32 : i32, i32
  }
  func.func @transform_2(%arg0: i32) -> (i32, i32) {
    %c0_i32 = arith.constant 0 : i32
    %c0_i32_0 = arith.constant 0 : i32
    %c0_i32_1 = arith.constant 0 : i32
    return %c0_i32, %c0_i32_0 : i32, i32
  }
  func.func @transform_3(%arg0: i32) -> (i32, i32) {
    %c0_i32 = arith.constant 0 : i32
    %c0_i32_0 = arith.constant 0 : i32
    %c0_i32_1 = arith.constant 0 : i32
    return %c0_i32, %c0_i32_0 : i32, i32
  }
  func.func @transform_4(%arg0: i32) -> (i32, i32) {
    %c0_i32 = arith.constant 0 : i32
    %c0_i32_0 = arith.constant 0 : i32
    %c0_i32_1 = arith.constant 0 : i32
    return %c0_i32, %c0_i32_0 : i32, i32
  }
  func.func @transform_5(%arg0: i32) -> (i32, i32) {
    %c0_i32 = arith.constant 0 : i32
    %c0_i32_0 = arith.constant 0 : i32
    %c0_i32_1 = arith.constant 0 : i32
    return %c0_i32, %c0_i32_0 : i32, i32
  }
  func.func @transform_6(%arg0: i32) -> (i32, i32) {
    %c0_i32 = arith.constant 0 : i32
    %c0_i32_0 = arith.constant 0 : i32
    %c0_i32_1 = arith.constant 0 : i32
    return %c0_i32, %c0_i32_0 : i32, i32
  }
  func.func @transform_7(%arg0: i32) -> (i32, i32) {
    %c0_i32 = arith.constant 0 : i32
    %c0_i32_0 = arith.constant 0 : i32
    %c0_i32_1 = arith.constant 0 : i32
    return %c0_i32, %c0_i32_0 : i32, i32
  }
  func.func @transform_8(%arg0: i32) -> (i32, i32) {
    %c0_i32 = arith.constant 0 : i32
    %c0_i32_0 = arith.constant 0 : i32
    %c0_i32_1 = arith.constant 0 : i32
    return %c0_i32, %c0_i32_0 : i32, i32
  }
  func.func @transform_9(%arg0: i32) -> (i32, i32) {
    %c0_i32 = arith.constant 0 : i32
    %c0_i32_0 = arith.constant 0 : i32
    %c0_i32_1 = arith.constant 0 : i32
    return %c0_i32, %c0_i32_0 : i32, i32
  }
  func.func @transform_10(%arg0: i32) -> (i32, i32) {
    %c0_i32 = arith.constant 0 : i32
    %c0_i32_0 = arith.constant 0 : i32
    %c0_i32_1 = arith.constant 0 : i32
    return %c0_i32, %c0_i32_0 : i32, i32
  }
  func.func @transform_11(%arg0: i32) -> (i32, i32) {
    %c0_i32 = arith.constant 0 : i32
    %c0_i32_0 = arith.constant 0 : i32
    %c0_i32_1 = arith.constant 0 : i32
    return %c0_i32, %c0_i32_0 : i32, i32
  }
  func.func @transform_12(%arg0: i32) -> (i32, i32) {
    %c0_i32 = arith.constant 0 : i32
    %c0_i32_0 = arith.constant 0 : i32
    %c0_i32_1 = arith.constant 0 : i32
    return %c0_i32, %c0_i32_0 : i32, i32
  }
  func.func @transform_13(%arg0: i32) -> (i32, i32) {
    %c0_i32 = arith.constant 0 : i32
    %c0_i32_0 = arith.constant 0 : i32
    %c0_i32_1 = arith.constant 0 : i32
    return %c0_i32, %c0_i32_0 : i32, i32
  }
  func.func @transform_14(%arg0: i32) -> (i32, i32) {
    %c0_i32 = arith.constant 0 : i32
    %c0_i32_0 = arith.constant 0 : i32
    %c0_i32_1 = arith.constant 0 : i32
    return %c0_i32, %c0_i32_0 : i32, i32
  }
  func.func @transform_15(%arg0: i32) -> (i32, i32) {
    %c0_i32 = arith.constant 0 : i32
    %c0_i32_0 = arith.constant 0 : i32
    %c0_i32_1 = arith.constant 0 : i32
    return %c0_i32, %c0_i32_0 : i32, i32
  }
  func.func @transform_16(%arg0: i32) -> (i32, i32) {
    %c0_i32 = arith.constant 0 : i32
    %c0_i32_0 = arith.constant 0 : i32
    %c0_i32_1 = arith.constant 0 : i32
    return %c0_i32, %c0_i32_0 : i32, i32
  }
  func.func @transform_17(%arg0: i32) -> (i32, i32, i32) {
    %c0_i32 = arith.constant 0 : i32
    %c0_i32_0 = arith.constant 0 : i32
    %c0_i32_1 = arith.constant 0 : i32
    %c0_i32_2 = arith.constant 0 : i32
    return %c0_i32, %c0_i32_0, %c0_i32_1 : i32, i32, i32
  }
  func.func @transform_18(%arg0: i32) -> (i32, i32) {
    %c0_i32 = arith.constant 0 : i32
    %c0_i32_0 = arith.constant 0 : i32
    %c0_i32_1 = arith.constant 0 : i32
    return %c0_i32, %c0_i32_0 : i32, i32
  }
  func.func @transform_19(%arg0: i32) -> (i32, i32) {
    %c0_i32 = arith.constant 0 : i32
    %c0_i32_0 = arith.constant 0 : i32
    %c0_i32_1 = arith.constant 0 : i32
    return %c0_i32, %c0_i32_0 : i32, i32
  }
  func.func @transform_20(%arg0: i32) -> (i32, i32) {
    %c0_i32 = arith.constant 0 : i32
    %c0_i32_0 = arith.constant 0 : i32
    %c0_i32_1 = arith.constant 0 : i32
    return %c0_i32, %c0_i32_0 : i32, i32
  }
  func.func @transform_21(%arg0: i32) -> (i32, i32) {
    %c0_i32 = arith.constant 0 : i32
    %c0_i32_0 = arith.constant 0 : i32
    %c0_i32_1 = arith.constant 0 : i32
    return %c0_i32, %c0_i32_0 : i32, i32
  }
  func.func @transform_22(%arg0: i32) -> (i32, i32) {
    %c0_i32 = arith.constant 0 : i32
    %c0_i32_0 = arith.constant 0 : i32
    return %arg0, %c0_i32 : i32, i32
  }
  func.func @transform_23(%arg0: i32) -> (i32, i32) {
    %c0_i32 = arith.constant 0 : i32
    %c0_i32_0 = arith.constant 0 : i32
    return %arg0, %c0_i32 : i32, i32
  }
}

</mosaic_0001>

<bundles_post_ra>
// kernel: _lambda_.1
= control target key start
LH: loop header
LB: loop body
LE: loop exit
PB: predicated region body
PF: predicated region fallthrough
CT: control target
= control target key end

     0   :  { %s5940_s0 = inlined_call_operand.vmem [shape: bf16[32,64], index: 0, kind: input, shape index: {}]   ;;  %s5941_s1 = inlined_call_operand.vmem [shape: s32[16,1], index: 1, kind: input, shape index: {}]   ;;  %s5942_s2 = inlined_call_operand.hbm [shape: bf16[64,128], index: 2, kind: input, shape index: {}]   ;;  %s5943_s3 = inlined_call_operand.hbm [shape: f32[1,128], index: 3, kind: input, shape index: {}]   ;;  %s5944_s4 = inlined_call_operand.vmem [shape: bf16[128,384], index: 4, kind: input, shape index: {}]   ;;  %s5945_s5 = inlined_call_operand.vmem [shape: f32[1,384], index: 5, kind: input, shape index: {}]   ;;  %s5946_s6 = inlined_call_operand.vmem [shape: bf16[1152,128], index: 6, kind: input, shape index: {}]   ;;  %s5947_s7 = inlined_call_operand.vmem [shape: f32[1,128], index: 7, kind: input, shape index: {}]   ;;  %s5948_s8 = inlined_call_operand.hbm [shape: bf16[128,256], index: 8, kind: input, shape index: {}]   ;;  %s5949_s9 = inlined_call_operand.vmem [shape: f32[1,256], index: 9, kind: input, shape index: {}]   ;;  %s5950_s10 = inlined_call_operand.hbm [shape: bf16[256,256], index: 10, kind: input, shape index: {}]   ;;  %s5951_s11 = inlined_call_operand.hbm [shape: f32[1,256], index: 11, kind: input, shape index: {}]   ;;  %s5952_s12 = inlined_call_operand.vmem [shape: bf16[1152,128], index: 12, kind: input, shape index: {}]   ;;  %s5953_s13 = inlined_call_operand.hbm [shape: f32[1,128], index: 13, kind: input, shape index: {}]   ;;  %s5954_s14 = inlined_call_operand.hbm [shape: bf16[128,128], index: 14, kind: input, shape index: {}]   ;;  %s5955_s15 = inlined_call_operand.hbm [shape: f32[1,128], index: 15, kind: input, shape index: {}]   ;;  %s5956_s16 = inlined_call_operand.hbm [shape: f32[16,128], index: 16, kind: input, shape index: {}]   ;;  %s5957_s17 = inlined_call_operand.hbm [shape: f32[9,32,1], index: 17, kind: input, shape index: {}]   ;;  %s5958_s18 = inlined_call_operand.hbm [shape: f32[128,128], index: 18, kind: input, shape index: {}]   ;;  %s5959_s19 = inlined_call_operand.vmem [shape: f32[8,128], index: 19, kind: input, shape index: {}]   ;;  %s5960_s20 = inlined_call_operand.hbm [shape: f32[1,128], index: 20, kind: input, shape index: {}]   ;;  %s5961_s21 = inlined_call_operand.hbm [shape: f32[1,128], index: 21, kind: input, shape index: {}]   ;;  %s5962_s22 = inlined_call_operand.vmem [shape: f32[32,128], index: 22, kind: output, shape index: {0}]   ;;  %s5963_s23 = inlined_call_operand.vmem [shape: f32[16,128], index: 23, kind: output, shape index: {1}]  }
   0x1   :  { %5999 = sst [smem:[#allocation58_spill]] %s5940_s0 }
   0x2   :  { %6000 = sst [smem:[#allocation59_spill]] %s5941_s1 }
   0x3   :  { %6001 = sst [smem:[#allocation60_spill]] %s5942_s2 }
   0x4   :  { %6002 = sst [smem:[#allocation61_spill]] %s5943_s3 }
   0x5   :  { %6003 = sst [smem:[#allocation62_spill]] %s5944_s4 }
   0x6   :  { %6004 = sst [smem:[#allocation63_spill]] %s5945_s5 }
   0x7   :  { %6005 = sst [smem:[#allocation64_spill]] %s5946_s6 }
   0x8   :  { %6006 = sst [smem:[#allocation65_spill]] %s5947_s7 }
   0x9   :  { %29 = vsyncpa [#allocation3], 0 }
   0xa   :  { %30 = vsyncpa [#allocation5], 0 }
   0xb   :  { %31 = vsyncpa [#allocation8], 0 }
   0xc   :  { %32 = vsyncpa [#allocation11], 0 }
   0xd   :  { %33 = vsyncpa [#allocation14], 0 }
   0xe   :  { %34 = vsyncpa [#allocation17], 0 }
   0xf   :  { %35 = vsyncpa [#allocation20], 0  ;;  %s4691_s4 = smov [#allocation4]  }
  0x10   :  { %s58_s30 = sshll.u32 %s4691_s4, 4  ;;  %s59_s30 = int_to_ptr.vmem [resolvable:$true] %s58_s30 }
  0x11   :  { %s4425_s24 = scalar_lea.vmem %s59_s30, 16  ;;  %s4429_s25 = scalar_lea.vmem %s59_s30, 32 }
  0x12   :  { %p4426_p0 = scmp.ne.s32.totalorder %s59_s30, %s4425_s24  ;;  %p4430_p1 = scmp.lt.s32.totalorder %s59_s30, %s59_s30 }
  0x13   :  { %p4431_p2 = scmp.lt.s32.totalorder %s4429_s25, %s4425_s24 }
  0x15   :  { %p4432_p3 = por %p4431_p2, %p4430_p1 }
  0x17   :  { %p4433_p4 = pnand %p4432_p3, %p4426_p0 }
  0x19   :  { %4436 = shalt.err (!%p4433_p4)
}
  0x1a   :  { %s6007_s26 = sld [smem:[#allocation61_spill]]  ;;  %s4692_s2 = smov [#allocation7]  }
  0x1b   :  { %s89_s6 = sshll.u32 %s4692_s2, 4  ;;  %s4693_s27 = smov [#allocation10]   ;;  %s90_s6 = int_to_ptr.vmem [resolvable:$true] %s89_s6 }
  0x1c   :  { %s114_s7 = sshll.u32 %s4693_s27, 4  ;;  %s4445_s28 = scalar_lea.vmem %s90_s6, 4096  ;;  %s115_s7 = int_to_ptr.vmem [resolvable:$true] %s114_s7 }
  0x1d   :  { %p4446_p5 = scmp.ne.s32.totalorder %s90_s6, %s4445_s28  ;;  %p4450_p6 = scmp.lt.s32.totalorder %s90_s6, %s90_s6 }
  0x1e   :  { %p4451_p7 = scmp.lt.s32.totalorder %s4445_s28, %s4445_s28 }
  0x20   :  { %61 = dma.hbm_to_vmem [thread:$0]  %s6007_s26, 16, %s59_s30, [#allocation5]  }
  0x21   :  { %p4452_p8 = por %p4451_p7, %p4450_p6 }
  0x23   :  { %p4453_p9 = pnand %p4452_p8, %p4446_p5 }
  0x25   :  { %4456 = shalt.err (!%p4453_p9)
}
  0x26   :  { %s4694_s29 = smov 128   ;;  %s4695_s3 = smov 8  }
  0x27   :  { %95 = dma.hbm_to_vmem [thread:$0]  %s5950_s10, 4096, %s90_s6, [#allocation8], %s4694_s29, %s4694_s29, %s4695_s3  }
  0x28   :  { %s4465_s30 = scalar_lea.vmem %s115_s7, 16  ;;  %s4469_s24 = scalar_lea.vmem %s115_s7, 32 }
  0x29   :  { %p4466_p10 = scmp.ne.s32.totalorder %s115_s7, %s4465_s30  ;;  %p4470_p11 = scmp.lt.s32.totalorder %s115_s7, %s115_s7 }
  0x2a   :  { %p4471_p12 = scmp.lt.s32.totalorder %s4469_s24, %s4465_s30 }
  0x2c   :  { %p4472_p13 = por %p4471_p12, %p4470_p11 }
  0x2e   :  { %p4473_p0 = pnand %p4472_p13, %p4466_p10 }
  0x30   :  { %4476 = shalt.err (!%p4473_p0)
}
  0x31   :  { %117 = dma.hbm_to_vmem [thread:$0]  %s5953_s13, 16, %s115_s7, [#allocation11]  }
  0x32   :  { %s4696_s1 = smov [#allocation13]   ;;  %s4697_s2 = smov [#allocation16]  }
  0x33   :  { %s136_s26 = sshll.u32 %s4696_s1, 4  ;;  %s157_s27 = sshll.u32 %s4697_s2, 4  ;;  %s137_s26 = int_to_ptr.vmem [resolvable:$true] %s136_s26  ;;  %s158_s27 = int_to_ptr.vmem [resolvable:$true] %s157_s27 }
  0x34   :  { %s4485_s28 = scalar_lea.vmem %s137_s26, 16  ;;  %s4489_s10 = scalar_lea.vmem %s137_s26, 32 }
  0x35   :  { %p4486_p1 = scmp.ne.s32.totalorder %s137_s26, %s4485_s28  ;;  %p4490_p2 = scmp.lt.s32.totalorder %s137_s26, %s137_s26 }
  0x36   :  { %p4491_p3 = scmp.lt.s32.totalorder %s4489_s10, %s4485_s28 }
  0x38   :  { %p4492_p4 = por %p4491_p3, %p4490_p2 }
  0x3a   :  { %p4493_p5 = pnand %p4492_p4, %p4486_p1 }
  0x3c   :  { %4496 = shalt.err (!%p4493_p5)
}
  0x3d   :  { %139 = dma.hbm_to_vmem [thread:$0]  %s5955_s15, 16, %s137_s26, [#allocation14]  }
  0x3e   :  { %s4505_s4 = scalar_lea.vmem %s158_s27, 4608  ;;  %p4510_p7 = scmp.lt.s32.totalorder %s158_s27, %s158_s27 }
  0x3f   :  { %p4506_p6 = scmp.ne.s32.totalorder %s158_s27, %s4505_s4  ;;  %p4511_p8 = scmp.lt.s32.totalorder %s4505_s4, %s4505_s4 }
  0x41   :  { %p4512_p9 = por %p4511_p8, %p4510_p7 }
  0x43   :  { %p4513_p10 = pnand %p4512_p9, %p4506_p6 }
  0x45   :  { %4516 = shalt.err (!%p4513_p10)
}
  0x46   :  { %163 = dma.hbm_to_vmem [thread:$0]  %s5957_s17, 4608, %s158_s27, [#allocation17], %s4694_s29, %s4694_s29, %s4695_s3  }
  0x47   :  { %s4698_s30 = smov [#allocation19]   ;;  %s4699_s25 = smov [#allocation2]  }
  0x48   :  { %s184_s24 = sshll.u32 %s4698_s30, 4  ;;  %s45_s15 = sshll.u32 %s4699_s25, 4  ;;  %s185_s24 = int_to_ptr.vmem [resolvable:$true] %s184_s24  ;;  %s46_s15 = int_to_ptr.vmem [resolvable:$true] %s45_s15 }
  0x49   :  { %s4525_s5 = scalar_lea.vmem %s185_s24, 16  ;;  %s4529_s1 = scalar_lea.vmem %s185_s24, 32 }
  0x4a   :  { %p4526_p11 = scmp.ne.s32.totalorder %s185_s24, %s4525_s5  ;;  %p4530_p12 = scmp.lt.s32.totalorder %s185_s24, %s185_s24 }
  0x4b   :  { %p4531_p13 = scmp.lt.s32.totalorder %s4529_s1, %s4525_s5 }
  0x4d   :  { %p4532_p0 = por %p4531_p13, %p4530_p12 }
  0x4f   :  { %p4533_p1 = pnand %p4532_p0, %p4526_p11 }
  0x51   :  { %4536 = shalt.err (!%p4533_p1)
}
  0x52   :  { %187 = dma.hbm_to_vmem [thread:$0]  %s5960_s20, 16, %s185_s24, [#allocation20]  }
  0x53   :  { %s4545_s28 = scalar_lea.vmem %s46_s15, 512  ;;  %p4550_p3 = scmp.lt.s32.totalorder %s46_s15, %s46_s15 }
  0x54   :  { %p4546_p2 = scmp.ne.s32.totalorder %s46_s15, %s4545_s28  ;;  %p4551_p4 = scmp.lt.s32.totalorder %s4545_s28, %s4545_s28 }
  0x56   :  { %p4552_p5 = por %p4551_p4, %p4550_p3 }
  0x58   :  { %p4553_p6 = pnand %p4552_p5, %p4546_p2 }
  0x5a   :  { %4556 = shalt.err (!%p4553_p6)
}
  0x5b   :  { %s4700_s17 = smov 64   ;;  %s4701_s27 = smov 4  }
  0x5c   :  { %s6008_s0 = sld [smem:[#allocation60_spill]]  ;;  %s4702_s4 = smov [#allocation6]  }
  0x5d   :  { %s75_s13 = sshll.u32 %s4702_s4, 4  ;;  %s4703_s20 = smov [#allocation9]   ;;  %s76_s13 = int_to_ptr.vmem [resolvable:$true] %s75_s13 }
  0x5e   :  { %s102_s7 = sshll.u32 %s4703_s20, 4  ;;  %s4565_s30 = scalar_lea.vmem %s76_s13, 2048  ;;  %s103_s7 = int_to_ptr.vmem [resolvable:$true] %s102_s7 }
  0x5f   :  { %p4566_p7 = scmp.ne.s32.totalorder %s76_s13, %s4565_s30  ;;  %p4570_p8 = scmp.lt.s32.totalorder %s76_s13, %s76_s13 }
  0x60   :  { %p4571_p9 = scmp.lt.s32.totalorder %s4565_s30, %s4565_s30 }
  0x62   :  { %51 = dma.hbm_to_vmem [thread:$0]  %s6008_s0, 512, %s46_s15, [#allocation3], %s4700_s17, %s4700_s17, %s4701_s27  }
  0x63   :  { %p4572_p10 = por %p4571_p9, %p4570_p8 }
  0x65   :  { %p4573_p11 = pnand %p4572_p10, %p4566_p7 }
  0x67   :  { %4576 = shalt.err (!%p4573_p11)
}
  0x68   :  { %81 = dma.hbm_to_vmem [thread:$0]  %s5948_s8, 2048, %s76_s13, [#allocation5], %s4694_s29, %s4694_s29, %s4695_s3  }
  0x69   :  { %s4585_s15 = scalar_lea.vmem %s103_s7, 32  ;;  %p4590_p13 = scmp.lt.s32.totalorder %s103_s7, %s103_s7 }
  0x6a   :  { %p4586_p12 = scmp.ne.s32.totalorder %s103_s7, %s4585_s15  ;;  %p4591_p0 = scmp.lt.s32.totalorder %s4585_s15, %s4585_s15 }
  0x6c   :  { %p4592_p1 = por %p4591_p0, %p4590_p13 }
  0x6e   :  { %p4593_p2 = pnand %p4592_p1, %p4586_p12 }
  0x70   :  { %4596 = shalt.err (!%p4593_p2)
}
  0x71   :  { %105 = dma.hbm_to_vmem [thread:$0]  %s5951_s11, 32, %s103_s7, [#allocation8]  }
  0x72   :  { %s4704_s26 = smov [#allocation12]   ;;  %s4705_s28 = smov [#allocation15]  }
  0x73   :  { %s123_s2 = sshll.u32 %s4704_s26, 4  ;;  %s145_s10 = sshll.u32 %s4705_s28, 4  ;;  %s124_s2 = int_to_ptr.vmem [resolvable:$true] %s123_s2  ;;  %s146_s10 = int_to_ptr.vmem [resolvable:$true] %s145_s10 }
  0x74   :  { %s4605_s6 = scalar_lea.vmem %s124_s2, 1024  ;;  %p4610_p4 = scmp.lt.s32.totalorder %s124_s2, %s124_s2 }
  0x75   :  { %p4606_p3 = scmp.ne.s32.totalorder %s124_s2, %s4605_s6  ;;  %p4611_p5 = scmp.lt.s32.totalorder %s4605_s6, %s4605_s6 }
  0x77   :  { %p4612_p6 = por %p4611_p5, %p4610_p4 }
  0x79   :  { %p4613_p7 = pnand %p4612_p6, %p4606_p3 }
  0x7b   :  { %4616 = shalt.err (!%p4613_p7)
}
  0x7c   :  { %129 = dma.hbm_to_vmem [thread:$0]  %s5954_s14, 1024, %s124_s2, [#allocation11], %s4700_s17, %s4700_s17, %s4701_s27  }
  0x7d   :  { %s4625_s11 = scalar_lea.vmem %s146_s10, 256  ;;  %p4630_p9 = scmp.lt.s32.totalorder %s146_s10, %s146_s10 }
  0x7e   :  { %p4626_p8 = scmp.ne.s32.totalorder %s146_s10, %s4625_s11  ;;  %p4631_p10 = scmp.lt.s32.totalorder %s4625_s11, %s4625_s11 }
  0x80   :  { %p4632_p11 = por %p4631_p10, %p4630_p9 }
  0x82   :  { %p4633_p12 = pnand %p4632_p11, %p4626_p8 }
  0x84   :  { %4636 = shalt.err (!%p4633_p12)
}
  0x85   :  { %151 = dma.hbm_to_vmem [thread:$0]  %s5956_s16, 256, %s146_s10, [#allocation14], %s4694_s29, %s4694_s29, %s4695_s3  }
  0x86   :  { %s4706_s20 = smov [#allocation18]   ;;  %s4707_s30 = smov [#allocation21]  }
  0x87   :  { %s169_s7 = sshll.u32 %s4706_s20, 4  ;;  %s194_s14 = sshll.u32 %s4707_s30, 4  ;;  %s170_s7 = int_to_ptr.vmem [resolvable:$true] %s169_s7  ;;  %s195_s14 = int_to_ptr.vmem [resolvable:$true] %s194_s14 }
  0x88   :  { %s4645_s17 = scalar_lea.vmem %s170_s7, 2048  ;;  %p4650_p0 = scmp.lt.s32.totalorder %s170_s7, %s170_s7 }
  0x89   :  { %p4646_p13 = scmp.ne.s32.totalorder %s170_s7, %s4645_s17  ;;  %p4651_p1 = scmp.lt.s32.totalorder %s4645_s17, %s4645_s17 }
  0x8b   :  { %p4652_p2 = por %p4651_p1, %p4650_p0 }
  0x8d   :  { %p4653_p3 = pnand %p4652_p2, %p4646_p13 }
  0x8f   :  { %4656 = shalt.err (!%p4653_p3)
}
  0x90   :  { %175 = dma.hbm_to_vmem [thread:$0]  %s5958_s18, 2048, %s170_s7, [#allocation17], %s4694_s29, %s4694_s29, %s4695_s3  }
  0x91   :  { %s4665_s16 = scalar_lea.vmem %s195_s14, 16  ;;  %s4669_s25 = scalar_lea.vmem %s195_s14, 32 }
  0x92   :  { %p4666_p4 = scmp.ne.s32.totalorder %s195_s14, %s4665_s16  ;;  %p4670_p5 = scmp.lt.s32.totalorder %s195_s14, %s195_s14 }
  0x93   :  { %p4671_p6 = scmp.lt.s32.totalorder %s4669_s25, %s4665_s16 }
  0x95   :  { %p4672_p7 = por %p4671_p6, %p4670_p5 }
  0x97   :  { %p4673_p8 = pnand %p4672_p7, %p4666_p4 }
  0x99   :  { %4676 = shalt.err (!%p4673_p8)
}
  0x9a   :  { %197 = dma.hbm_to_vmem [thread:$0]  %s5961_s21, 16, %s195_s14, [#allocation20]  }
  0x9b   :  { %4677 = dma.done.wait [#allocation3], 512  }
  0x9c   :  { %4678 = vsyncadd [#allocation3], 4294966784 }
  0x9d   :  { %4679 = dma.done.wait [#allocation5], 2064  }
  0x9e   :  { %4680 = vsyncadd [#allocation5], 4294965232 }
  0x9f   :  { %4681 = dma.done.wait [#allocation8], 4128  }
  0xa0   :  { %4682 = vsyncadd [#allocation8], 4294963168 }
  0xa1   :  { %4683 = dma.done.wait [#allocation11], 1040  }
  0xa2   :  { %4684 = vsyncadd [#allocation11], 4294966256 }
  0xa3   :  { %4685 = dma.done.wait [#allocation14], 272  }
  0xa4   :  { %4686 = vsyncadd [#allocation14], 4294967024 }
  0xa5   :  { %4687 = dma.done.wait [#allocation17], 6656  }
  0xa6   :  { %4688 = vsyncadd [#allocation17], 4294960640 }
  0xa7   :  { %4689 = dma.done.wait [#allocation20], 32  }
  0xa8   :  { %4690 = vsyncadd [#allocation20], 4294967264  ;;  %v4151_v0 = vld [vmem:[#allocation2 + $0x18] sm:$0xff]   ;;  %v4152_v1 = vld [vmem:[#allocation2 + $0x10] sm:$0xff]   ;;  %vm291_vm0 = vcmask 523264   ;;  %s6009_s29 = sld [smem:[#allocation58_spill]] }
  0xa9   :  { %4002 = vmatprep.subr.bf16.mxu0 %v4151_v0  ;;  %v4153_v2 = vld [vmem:[#allocation2 + $0x8] sm:$0xff]   ;;  %s6010_s26 = sld [smem:[#allocation62_spill]]  ;;  %v4154_v6 = vld [vmem:[#allocation2] sm:$0xff]   ;;  %v5969_v30 = vmov 0   ;;  %v681_v31 = vld [vmem:[#allocation16 + $0x20] sm:$0xff] }
  0xaa   :  { %4003 = vmatpush3.bf16.msra.mxu0 %v4151_v0  ;;  %558 = vmatprep.mubr.bf16.mxu1 %v5969_v30  ;;  %v643_v32 = vld [vmem:[#allocation16] sm:$0xff]  ;;  %v682_v33 = vld [vmem:[#allocation16 + $0x28] sm:$0xff]  ;;  %v683_v35 = vld [vmem:[#allocation16 + $0x30] sm:$0xff]  ;;  %s6011_s1 = sld [smem:[#allocation64_spill]] }
  0xab   :  { %4004 = vmatprep.subr.bf16.mxu0 %v4152_v1  ;;  %4149 = vset.pattern.permute.xlu0 %v5969_v30  ;;  %v644_v34 = vld [vmem:[#allocation16 + $0x8] sm:$0xff]  ;;  %v684_v36 = vld [vmem:[#allocation16 + $0x38] sm:$0xff]  ;;  %v645_v37 = vld [vmem:[#allocation16 + $0x10] sm:$0xff]  ;;  %s6012_s8 = sld [smem:[#allocation59_spill]] }
  0xac   :  { %4150 = vset.pattern.permute.xlu1 %v5969_v30  ;;  %687 = vperm.xlu0 %4149, %v681_v31   ;;  %v646_v38 = vld [vmem:[#allocation16 + $0x18] sm:$0xff]  ;;  %v757_v39 = vld [vmem:[#allocation16 + $0x60] sm:$0xff]  ;;  %v758_v40 = vld [vmem:[#allocation16 + $0x68] sm:$0xff]  ;;  %s6043_s28 = sld [smem:[#allocation65_spill]] }
  0xad   :  { %649 = vperm.xlu1 %4150, %v643_v32   ;;  %v719_v41 = vld [vmem:[#allocation16 + $0x40] sm:$0xff]  ;;  %v720_v42 = vld [vmem:[#allocation16 + $0x48] sm:$0xff]  ;;  %v759_v47 = vld [vmem:[#allocation16 + $0x70] sm:$0xff] }
  0xae   :  { %v4155_v3 = vld [vmem:[%s6009_s29] sm:$0xff]   ;;  %4005 = vmatpush3.bf16.msra.mxu0 %v4152_v1  ;;  %v4156_v10 = vld [vmem:[%s6009_s29 + $0x8] sm:$0xff]   ;;  %v824_v43 = vld [vmem:[#allocation16 + $0xa0] sm:$0xff] }
  0xaf   :  { %4010 = vmatprep.mubr.msk.bf16.mxu0 %vm291_vm0, %v4155_v3  ;;  %v4157_v4 = vld [vmem:[%s6010_s26 + $0xac] ss:$12 sps:$4 sm:$0xff]   ;;  %v4159_v5 = vld [vmem:[%s6010_s26 + $0xa8] ss:$12 sps:$4 sm:$0xff]   ;;  %4006 = vmatprep.subr.bf16.mxu0 %v4153_v2  ;;  %v4163_v8 = vld [vmem:[%s6010_s26 + $0x90] ss:$12 sps:$4 sm:$0xff]  }
  0xb0   :  { %526 = vmatprep.subr.bf16.mxu1 %v4157_v4  ;;  %v4161_v7 = vld [vmem:[%s6010_s26 + $0x94] ss:$12 sps:$4 sm:$0xff]   ;;  %v4165_v9 = vld [vmem:[%s6010_s26 + $0x7c] ss:$12 sps:$4 sm:$0xff]   ;;  %v4167_v12 = vld [vmem:[%s6010_s26 + $0x78] ss:$12 sps:$4 sm:$0xff]   ;;  %692 = vperm.xlu0 %4149, %v682_v33  }
  0xb1   :  { %527 = vmatpush1.bf16.msra.mxu1 %v4159_v5  ;;  %v4160_v11 = vld [vmem:[%s6010_s26 + $0xb0] ss:$12 sps:$4 sm:$0xff]   ;;  %v4164_v14 = vld [vmem:[%s6010_s26 + $0x98] ss:$12 sps:$4 sm:$0xff]   ;;  %v4171_v15 = vld [vmem:[%s6010_s26 + $0x60] ss:$12 sps:$4 sm:$0xff]   ;;  %654 = vperm.xlu1 %4150, %v644_v34  }
  0xb2   :  { %4007 = vmatpush3.bf16.msra.mxu0 %v4153_v2  ;;  %528 = vmatprep.subr.bf16.mxu1 %v4161_v7  ;;  %v4169_v13 = vld [vmem:[%s6010_s26 + $0x64] ss:$12 sps:$4 sm:$0xff]   ;;  %v4168_v16 = vld [vmem:[%s6010_s26 + $0x80] ss:$12 sps:$4 sm:$0xff]   ;;  %v4175_v18 = vld [vmem:[%s6010_s26 + $0x48] ss:$12 sps:$4 sm:$0xff]  }
  0xb3   :  { %4008 = vmatprep.subr.bf16.mxu0 %v4154_v6  ;;  %v4173_v17 = vld [vmem:[%s6010_s26 + $0x4c] ss:$12 sps:$4 sm:$0xff]   ;;  %v4177_v19 = vld [vmem:[%s6010_s26 + $0x34] ss:$12 sps:$4 sm:$0xff]   ;;  %v4176_v21 = vld [vmem:[%s6010_s26 + $0x50] ss:$12 sps:$4 sm:$0xff]  }
  0xb4   :  { %v4172_v20 = vld [vmem:[%s6010_s26 + $0x68] ss:$12 sps:$4 sm:$0xff]   ;;  %v4179_v22 = vld [vmem:[%s6010_s26 + $0x30] ss:$12 sps:$4 sm:$0xff]   ;;  %v4180_v23 = vld [vmem:[%s6010_s26 + $0x38] ss:$12 sps:$4 sm:$0xff]   ;;  %697 = vperm.xlu0 %4149, %v683_v35  }
  0xb5   :  { %529 = vmatpush1.bf16.msra.mxu1 %v4163_v8  ;;  %v4181_v24 = vld [vmem:[%s6010_s26 + $0x1c] ss:$12 sps:$4 sm:$0xff]   ;;  %v4183_v25 = vld [vmem:[%s6010_s26 + $0x18] ss:$12 sps:$4 sm:$0xff]   ;;  %v4184_v26 = vld [vmem:[%s6010_s26 + $0x20] ss:$12 sps:$4 sm:$0xff]   ;;  %702 = vperm.xlu1 %4150, %v684_v36  }
  0xb6   :  { %530 = vmatprep.subr.bf16.mxu1 %v4165_v9  ;;  %4009 = vmatpush3.bf16.msra.mxu0 %v4154_v6  ;;  %v4185_v27 = vld [vmem:[%s6010_s26 + $0x4] ss:$12 sps:$4 sm:$0xff]   ;;  %v4187_v28 = vld [vmem:[%s6010_s26] ss:$12 sps:$4 sm:$0xff]   ;;  %v4188_v29 = vld [vmem:[%s6010_s26 + $0x8] ss:$12 sps:$4 sm:$0xff]  }
  0xb7   :  { %4014 = vmatprep.subr.bf16.mxu0 %v4160_v11  ;;  %v825_v44 = vld [vmem:[#allocation16 + $0xa8] sm:$0xff]  ;;  %v786_v45 = vld [vmem:[#allocation16 + $0x80] sm:$0xff]  ;;  %v760_v48 = vld [vmem:[#allocation16 + $0x78] sm:$0xff]  ;;  %s6022_s26 = sld [smem:[#allocation63_spill]] }
  0xb8   :  { %659 = vperm.xlu0 %4149, %v645_v37   ;;  %v787_v46 = vld [vmem:[#allocation16 + $0x88] sm:$0xff]  ;;  %v721_v49 = vld [vmem:[#allocation16 + $0x50] sm:$0xff]  ;;  %v722_v50 = vld [vmem:[#allocation16 + $0x58] sm:$0xff] }
  0xb9   :  { %531 = vmatpush1.bf16.msra.mxu1 %v4167_v12  ;;  %4011 = vmatmul.mubr.msk.bf16.vlgmr.msra.gmra.mxu0 %vm291_vm0, %v4156_v10  ;;  %v826_v51 = vld [vmem:[#allocation16 + $0xb0] sm:$0xff]  ;;  %v827_v52 = vld [vmem:[#allocation16 + $0xb8] sm:$0xff]  ;;  %v882_v55 = vld [vmem:[#allocation16 + $0xe0] sm:$0xff] }
  0xba   :  { %532 = vmatprep.subr.bf16.mxu1 %v4169_v13  ;;  %4015 = vmatpush3.bf16.msra.mxu0 %v4160_v11  ;;  %v788_v53 = vld [vmem:[#allocation16 + $0x90] sm:$0xff]  ;;  %v789_v54 = vld [vmem:[#allocation16 + $0x98] sm:$0xff]  ;;  %v4189_v56 = vld [vmem:[%s6011_s1 + $0x78] sm:$0xff]  }
  0xbb   :  { %4016 = vmatprep.subr.bf16.mxu0 %v4164_v14  ;;  %664 = vperm.xlu1 %4150, %v646_v38   ;;  %v4190_v57 = vld [vmem:[%s6011_s1 + $0xf8] sm:$0xff]   ;;  %v883_v58 = vld [vmem:[#allocation16 + $0xe8] sm:$0xff]  ;;  %v913_v63 = vld [vmem:[#allocation16 + $0x110] sm:$0xff] }
  0xbc   :  { %763 = vperm.xlu0 %4149, %v757_v39   ;;  %v853_v59 = vld [vmem:[#allocation16 + $0xc0] sm:$0xff]  ;;  %v854_v60 = vld [vmem:[#allocation16 + $0xc8] sm:$0xff]  ;;  %v914_v0 = vld [vmem:[#allocation16 + $0x118] sm:$0xff] }
  0xbd   :  { %533 = vmatpush1.bf16.msra.mxu1 %v4171_v15  ;;  %v911_v61 = vld [vmem:[#allocation16 + $0x100] sm:$0xff]  ;;  %v912_v62 = vld [vmem:[#allocation16 + $0x108] sm:$0xff]  ;;  %v884_v1 = vld [vmem:[#allocation16 + $0xf0] sm:$0xff] }
  0xbe   :  { %534 = vmatprep.subr.bf16.mxu1 %v4173_v17  ;;  %4017 = vmatpush3.bf16.msra.mxu0 %v4164_v14  ;;  %v885_v2 = vld [vmem:[#allocation16 + $0xf8] sm:$0xff]  ;;  %v855_v3 = vld [vmem:[#allocation16 + $0xd0] sm:$0xff]  ;;  %v3299_v5 = vld [vmem:[%s6012_s8] sm:$0xff] }
  0xbf   :  { %4018 = vmatprep.subr.bf16.mxu0 %v4168_v16  ;;  %768 = vperm.xlu1 %4150, %v758_v40   ;;  %v856_v4 = vld [vmem:[#allocation16 + $0xd8] sm:$0xff]  ;;  %v3300_v6 = vld [vmem:[%s6012_s8 + $0x8] sm:$0xff]  ;;  %v3471_v10 = vld [vmem:[#allocation4] ss:$0 sm:$0xff] }
  0xc0   :  { %725 = vperm.xlu0 %4149, %v719_v41   ;;  %v4191_v17 = vld [vmem:[%s6011_s1 + $0x38] sm:$0xff]   ;;  %v4203_v31 = vld [vmem:[%s6011_s1 + $0x20] sm:$0xff]   ;;  %v4209_v37 = vld [vmem:[%s6011_s1 + $0x50] sm:$0xff]  }
  0xc1   :  { %535 = vmatpush1.bf16.msra.mxu1 %v4175_v18  ;;  %v4192_v18 = vld [vmem:[%s6011_s1 + $0xb8] sm:$0xff]   ;;  %v4204_v32 = vld [vmem:[%s6011_s1 + $0xa0] sm:$0xff]   ;;  %v4210_v38 = vld [vmem:[%s6011_s1 + $0xd0] sm:$0xff]  }
  0xc2   :  { %536 = vmatprep.subr.bf16.mxu1 %v4177_v19  ;;  %4019 = vmatpush3.bf16.msra.mxu0 %v4168_v16  ;;  %v4205_v33 = vld [vmem:[%s6011_s1 + $0x58] sm:$0xff]   ;;  %v4211_v39 = vld [vmem:[%s6011_s1 + $0x10] sm:$0xff]   ;;  %v4213_v41 = vld [vmem:[%s6011_s1 + $0x48] sm:$0xff]  }
  0xc3   :  { %4020 = vmatprep.subr.bf16.mxu0 %v4172_v20  ;;  %730 = vperm.xlu1 %4150, %v720_v42   ;;  %v4206_v34 = vld [vmem:[%s6011_s1 + $0xd8] sm:$0xff]   ;;  %v4212_v40 = vld [vmem:[%s6011_s1 + $0x90] sm:$0xff]   ;;  %v4214_v42 = vld [vmem:[%s6011_s1 + $0xc8] sm:$0xff]  }
  0xc4   :  { %830 = vperm.xlu0 %4149, %v824_v43   ;;  %v4207_v35 = vld [vmem:[%s6011_s1 + $0x18] sm:$0xff]   ;;  %v4215_v43 = vld [vmem:[%s6011_s1 + $0x8] sm:$0xff]  }
  0xc5   :  { %537 = vmatpush1.bf16.msra.mxu1 %v4179_v22  ;;  %v4195_v22 = vld [vmem:[%s6011_s1 + $0x30] sm:$0xff]   ;;  %v4208_v36 = vld [vmem:[%s6011_s1 + $0x98] sm:$0xff]  }
  0xc6   :  { %4021 = vmatpush3.bf16.msra.mxu0 %v4172_v20  ;;  %538 = vmatprep.subr.bf16.mxu1 %v4181_v24  ;;  %v4193_v20 = vld [vmem:[%s6011_s1 + $0x70] sm:$0xff]   ;;  %v4197_v24 = vld [vmem:[%s6011_s1 + $0x68] sm:$0xff]  }
  0xc7   :  { %4022 = vmatprep.subr.bf16.mxu0 %v4176_v21  ;;  %835 = vperm.xlu1 %4150, %v825_v44   ;;  %v4216_v44 = vld [vmem:[%s6011_s1 + $0x88] sm:$0xff]  }
  0xc8   :  { %792 = vperm.xlu0 %4149, %v786_v45   ;;  %v4217_v45 = vld [vmem:[%s6011_s1 + $0x40] sm:$0xff]  }
  0xc9   :  { %539 = vmatpush1.bf16.msra.mxu1 %v4183_v25  ;;  %v4198_v25 = vld [vmem:[%s6011_s1 + $0xe8] sm:$0xff]  }
  0xca   :  { %4023 = vmatpush3.bf16.msra.mxu0 %v4176_v21  ;;  %540 = vmatprep.subr.bf16.mxu1 %v4185_v27  ;;  %v4194_v21 = vld [vmem:[%s6011_s1 + $0xf0] sm:$0xff]   ;;  %v4200_v27 = vld [vmem:[%s6011_s1 + $0xa8] sm:$0xff]  }
  0xcb   :  { %4024 = vmatprep.subr.bf16.mxu0 %v4180_v23  ;;  %797 = vperm.xlu1 %4150, %v787_v46   ;;  %v4218_v46 = vld [vmem:[%s6011_s1 + $0xc0] sm:$0xff]  }
  0xcc   :  { %773 = vperm.xlu0 %4149, %v759_v47   ;;  %v4219_v47 = vld [vmem:[%s6011_s1] sm:$0xff]  }
  0xcd   :  { %541 = vmatpush1.bf16.msra.mxu1 %v4187_v28  ;;  %v4201_v28 = vld [vmem:[%s6011_s1 + $0x60] sm:$0xff]  }
  0xce   :  { %4025 = vmatpush3.bf16.msra.mxu0 %v4180_v23  ;;  %3730 = vmatprep.subr.bf16.mxu1 %v4189_v56  ;;  %v4196_v23 = vld [vmem:[%s6011_s1 + $0xb0] sm:$0xff]  }
  0xcf   :  { %4026 = vmatprep.subr.bf16.mxu0 %v4184_v26  ;;  %778 = vperm.xlu1 %4150, %v760_v48   ;;  %v4220_v48 = vld [vmem:[%s6011_s1 + $0x80] sm:$0xff]  }
  0xd0   :  { %735 = vperm.xlu0 %4149, %v721_v49   ;;  %v4221_v49 = vld [vmem:[%s6011_s1 + $0x178] sm:$0xff]  }
  0xd2   :  { %4027 = vmatpush3.bf16.msra.mxu0 %v4184_v26  ;;  %v4199_v26 = vld [vmem:[%s6011_s1 + $0x28] sm:$0xff]  }
  0xd3   :  { %4028 = vmatprep.subr.bf16.mxu0 %v4188_v29  ;;  %740 = vperm.xlu1 %4150, %v722_v50   ;;  %v4222_v50 = vld [vmem:[%s6011_s1 + $0x1f8] sm:$0xff]  }
  0xd4   :  { %840 = vperm.xlu0 %4149, %v826_v51  }
  0xd6   :  { %4029 = vmatpush3.bf16.msra.mxu0 %v4188_v29  ;;  %v4202_v29 = vld [vmem:[%s6011_s1 + $0xe0] sm:$0xff]  }
  0xd7   :  { %845 = vperm.xlu1 %4150, %v827_v52   ;;  %3758 = vmatprep.subr.bf16.mxu0 %v4190_v57 }
  0xd8   :  { %802 = vperm.xlu0 %4149, %v788_v53  }
  0xdb   :  { %807 = vperm.xlu1 %4150, %v789_v54  }
  0xdc   :  { %888 = vperm.xlu0 %4149, %v882_v55  }
  0xdf   :  { %893 = vperm.xlu1 %4150, %v883_v58  }
  0xe0   :  { %859 = vperm.xlu0 %4149, %v853_v59  }
  0xe3   :  { %864 = vperm.xlu1 %4150, %v854_v60  }
  0xe4   :  { %917 = vperm.xlu0 %4149, %v911_v61  }
  0xe7   :  { %922 = vperm.xlu1 %4150, %v912_v62  }
  0xe8   :  { %927 = vperm.xlu0 %4149, %v913_v63  }
  0xeb   :  { %932 = vperm.xlu1 %4150, %v914_v0  }
  0xec   :  { %898 = vperm.xlu0 %4149, %v884_v1   ;;  %v5968_v1 = vlaneseq }
  0xef   :  { %903 = vperm.xlu1 %4150, %v885_v2   ;;  %v5112_v2 = vshrl.u32 %v5968_v1, 7 }
  0xf0   :  { %869 = vperm.xlu0 %4149, %v855_v3  }
  0xf1   :  { %vm638_vm1 = vcmp.lt.s32.totalorder %v5112_v2, 5  ;;  %vm675_vm2 = vcmp.lt.s32.totalorder %v5112_v2, 4  ;;  %vm751_vm3 = vcmp.lt.s32.totalorder %v5112_v2, 1  ;;  %vm713_vm4 = vcmp.lt.s32.totalorder %v5112_v2, 3 }
  0xf2   :  { %vm818_vm5 = vcmp.lt.s32.totalorder %v5112_v2, 7 }
  0xf3   :  { %874 = vperm.xlu1 %4150, %v856_v4  }
  0xf4   :  { %3304 = vperm.xlu0 %4149, %v3299_v5   ;;  %v393_v5 = vsub.s32 2, %v5112_v2 }
  0xf7   :  { %3307 = vperm.xlu1 %4150, %v3300_v6   ;;  %v5122_v6 = vld [vmem:[%s6022_s26] sm:$0x7] }
 0x127   :  { %v5083_v51 = vpop.permute.xlu0 %687 }
 0x128   :  { %v5085_v52 = vpop.permute.xlu1 %649 }
 0x129   :  { %6013 = vst [vmem:[#allocation29_spill] sm:$0xff] %v5085_v52 }
 0x12b   :  { %v5087_v53 = vpop.permute.xlu0 %692 }
 0x12c   :  { %v5089_v54 = vpop.permute.xlu1 %654 }
 0x12f   :  { %v5091_v55 = vpop.permute.xlu0 %697 }
 0x130   :  { %6014 = vst [vmem:[#allocation30_spill] sm:$0xff] %v5091_v55  ;;  %v5093_v56 = vpop.permute.xlu1 %702 }
 0x131   :  { %6015 = vst [vmem:[#allocation31_spill] sm:$0xff] %v5093_v56 }
 0x133   :  { %v5095_v57 = vpop.permute.xlu0 %659 }
 0x134   :  { %6016 = vst [vmem:[#allocation32_spill] sm:$0xff] %v5095_v57 }
 0x136   :  { %v5097_v58 = vpop.permute.xlu1 %664 }
 0x137   :  { %6017 = vst [vmem:[#allocation33_spill] sm:$0xff] %v5097_v58  ;;  %v5099_v59 = vpop.permute.xlu0 %763 }
 0x138   :  { %6018 = vst [vmem:[#allocation34_spill] sm:$0xff] %v5099_v59 }
 0x13a   :  { %v5101_v60 = vpop.permute.xlu1 %768 }
 0x13b   :  { %6019 = vst [vmem:[#allocation35_spill] sm:$0xff] %v5101_v60  ;;  %v5103_v61 = vpop.permute.xlu0 %725 }
 0x13c   :  { %6020 = vst [vmem:[#allocation36_spill] sm:$0xff] %v5103_v61 }
 0x13e   :  { %v5105_v62 = vpop.permute.xlu1 %730 }
 0x13f   :  { %6021 = vst [vmem:[#allocation37_spill] sm:$0xff] %v5105_v62  ;;  %v5107_v63 = vpop.permute.xlu0 %830 }
 0x142   :  { %v5109_v0 = vpop.permute.xlu1 %835 }
 0x143   :  { %v5114_v3 = vpop.permute.xlu0 %792 }
 0x146   :  { %v5116_v4 = vpop.permute.xlu1 %797 }
 0x179   :  { %v4012_v7 = vpop.f32.mrf.mxu0 }
 0x17a   :  { %v341_v15 = vadd.f32 %v4012_v7, %v3471_v10  ;;  %v5124_v7 = vpop.permute.xlu0 %773 }
 0x17b   :  { %v332_v8 = vpop.f32.mrf.mxu0  ;;  %6023 = vst [vmem:[#allocation38_spill] sm:$0xff] %v5124_v7 }
 0x17c   :  { %v333_v13 = vadd.f32 %v3471_v10, %v332_v8  ;;  %v5126_v8 = vpop.permute.xlu1 %778 }
 0x17d   :  { %v4013_v9 = vpop.f32.mrf.mxu0  ;;  %6024 = vst [vmem:[#allocation39_spill] sm:$0xff] %v5126_v8 }
 0x17e   :  { %v344_v11 = vadd.f32 %v4013_v9, %v3471_v10  ;;  %v394_v9 = vrot.slane %v5122_v6, %v393_v5 }
 0x17f   :  { %v335_v12 = vpop.f32.mrf.mxu0 }
 0x180   :  { %v336_v14 = vadd.f32 %v3471_v10, %v335_v12  ;;  %v348_v19 = vpack.c.bf16 %v344_v11, %v341_v15  ;;  %v5129_v15 = vpop.permute.xlu0 %735 }
 0x181   :  { %6025 = vst [vmem:[#allocation40_spill] sm:$0xff] %v5129_v15 }
 0x182   :  { %v347_v16 = vpack.c.bf16 %v336_v14, %v333_v13 }
 0x184   :  { %559 = vmatmul.mubr.bf16.vlgmr.msra.gmra.mxu1 %v347_v16  ;;  %4030 = vmatprep.mubr.bf16.mxu0 %v347_v16 }
 0x185   :  { %4031 = vmatmul.mubr.bf16.vlgmr.msra.gmra.mxu0 %v348_v19  ;;  %568 = vmatprep.mubr.bf16.mxu1 %v5969_v30 }
 0x186   :  { %3731 = vmatpush3.bf16.msra.mxu1 %v4191_v17  ;;  %3759 = vmatpush3.bf16.msra.mxu0 %v4192_v18  ;;  %v5133_v18 = vpop.permute.xlu1 %740 }
 0x187   :  { %3732 = vmatprep.subr.bf16.mxu1 %v4193_v20  ;;  %3760 = vmatprep.subr.bf16.mxu0 %v4194_v21  ;;  %6026 = vst [vmem:[#allocation41_spill] sm:$0xff] %v5133_v18 }
 0x18a   :  { %3733 = vmatpush3.bf16.msra.mxu1 %v4195_v22  ;;  %3761 = vmatpush3.bf16.msra.mxu0 %v4196_v23 }
 0x18b   :  { %3734 = vmatprep.subr.bf16.mxu1 %v4197_v24  ;;  %3762 = vmatprep.subr.bf16.mxu0 %v4198_v25 }
 0x18c   :  { %569 = vmatmul.mubr.bf16.gmra.mxu1 %v348_v19 }
 0x18e   :  { %3735 = vmatpush3.bf16.msra.mxu1 %v4199_v26  ;;  %3763 = vmatpush3.bf16.msra.mxu0 %v4200_v27 }
 0x18f   :  { %3736 = vmatprep.subr.bf16.mxu1 %v4201_v28  ;;  %3764 = vmatprep.subr.bf16.mxu0 %v4202_v29 }
 0x192   :  { %3737 = vmatpush3.bf16.msra.mxu1 %v4203_v31  ;;  %3765 = vmatpush3.bf16.msra.mxu0 %v4204_v32 }
 0x193   :  { %3738 = vmatprep.subr.bf16.mxu1 %v4205_v33  ;;  %3766 = vmatprep.subr.bf16.mxu0 %v4206_v34  ;;  %v5156_v33 = vpop.permute.xlu0 %840  ;;  %v5158_v34 = vpop.permute.xlu1 %845 }
 0x194   :  { %6027 = vst [vmem:[#allocation42_spill] sm:$0xff] %v5156_v33  ;;  %6028 = vst [vmem:[#allocation43_spill] sm:$0xff] %v5158_v34 }
 0x196   :  { %3739 = vmatpush3.bf16.msra.mxu1 %v4207_v35  ;;  %3767 = vmatpush3.bf16.msra.mxu0 %v4208_v36 }
 0x197   :  { %3740 = vmatprep.subr.bf16.mxu1 %v4209_v37  ;;  %3768 = vmatprep.subr.bf16.mxu0 %v4210_v38 }
 0x19a   :  { %3741 = vmatpush3.bf16.msra.mxu1 %v4211_v39  ;;  %3769 = vmatpush3.bf16.msra.mxu0 %v4212_v40 }
 0x19b   :  { %3742 = vmatprep.subr.bf16.mxu1 %v4213_v41  ;;  %3770 = vmatprep.subr.bf16.mxu0 %v4214_v42 }
 0x19e   :  { %3743 = vmatpush3.bf16.msra.mxu1 %v4215_v43  ;;  %3771 = vmatpush3.bf16.msra.mxu0 %v4216_v44 }
 0x19f   :  { %3744 = vmatprep.subr.bf16.mxu1 %v4217_v45  ;;  %3772 = vmatprep.subr.bf16.mxu0 %v4218_v46 }
 0x1a2   :  { %3745 = vmatpush3.bf16.msra.mxu1 %v4219_v47  ;;  %3773 = vmatpush3.bf16.msra.mxu0 %v4220_v48 }
 0x1a3   :  { %3786 = vmatprep.subr.bf16.mxu1 %v4221_v49  ;;  %3814 = vmatprep.subr.bf16.mxu0 %v4222_v50 }
 0x245   :  { %v4032_v10 = vpop.f32.mrf.mxu0 }
 0x246   :  { %v622_v13 = vadd.f32 %v4032_v10, %v394_v9 }
 0x247   :  { %v613_v11 = vpop.f32.mrf.mxu0 }
 0x248   :  { %v614_v12 = vadd.f32 %v613_v11, %v394_v9  ;;  %v5137_v22 = vmax.f32 %v622_v13, 0.0 }
 0x249   :  { %v4033_v14 = vpop.f32.mrf.mxu0 }
 0x24a   :  { %v5131_v16 = vmax.f32 %v614_v12, 0.0  ;;  %v625_v17 = vadd.f32 %v4033_v14, %v394_v9  ;;  %v634_v35 = vrot.slane %v5137_v22, 3  ;;  %v673_v37 = vrot.slane %v5137_v22, 4  ;;  %v4223_v14 = vld [vmem:[%s6011_s1 + $0x138] sm:$0xff]  }
 0x24b   :  { %v616_v19 = vpop.f32.mrf.mxu0  ;;  %v749_v38 = vrot.slane %v5137_v22, 7 }
 0x24c   :  { %v5135_v20 = vmax.f32 %v625_v17, 0.0  ;;  %v617_v21 = vadd.f32 %v616_v19, %v394_v9  ;;  %v632_v24 = vrot.slane %v5131_v16, 3  ;;  %v671_v27 = vrot.slane %v5131_v16, 4 }
 0x24d   :  { %v747_v36 = vrot.slane %v5131_v16, 7  ;;  %v709_v46 = vrot.slane %v5131_v16, 5 }
 0x24e   :  { %v635_v23 = vrot.slane %v5135_v20, 3  ;;  %v5142_v25 = vmax.f32 %v617_v21, 0.0  ;;  %v674_v26 = vrot.slane %v5135_v20, 4  ;;  %v750_v32 = vrot.slane %v5135_v20, 7  ;;  %v5211_v21 = vpop.permute.xlu0 %802 }
 0x24f   :  { %v712_v42 = vrot.slane %v5135_v20, 5  ;;  %6029 = vst [vmem:[#allocation44_spill] sm:$0xff] %v5211_v21 }
 0x250   :  { %v5151_v28 = vsel %vm638_vm1, %v635_v23, %v632_v24  ;;  %v633_v29 = vrot.slane %v5142_v25, 3  ;;  %v672_v31 = vrot.slane %v5142_v25, 4  ;;  %v5170_v40 = vsel %vm675_vm2, %v674_v26, %v671_v27 }
 0x251   :  { %v748_v41 = vrot.slane %v5142_v25, 7  ;;  %v667_v43 = vmul.f32 %v5085_v52, %v5151_v28  ;;  %v705_v44 = vmul.f32 %v5083_v51, %v5170_v40  ;;  %v755_v48 = vsel %vm751_vm3, %v750_v32, %v747_v36 }
 0x252   :  { %v5166_v39 = vsel %vm675_vm2, %v671_v27, %v672_v31  ;;  %v5187_v49 = vsel %vm638_vm1, %v632_v24, %v633_v29  ;;  %v710_v50 = vrot.slane %v5142_v25, 5  ;;  %v781_v9 = vmul.f32 %v5099_v59, %v755_v48  ;;  %v5213_v24 = vpop.permute.xlu1 %807 }
 0x253   :  { %v706_v45 = vmul.f32 %v5087_v53, %v5166_v39  ;;  %v754_v47 = vsel %vm751_vm3, %v747_v36, %v748_v41  ;;  %v668_v11 = vmul.f32 %v5089_v54, %v5187_v49  ;;  %v5200_v13 = vsel %vm713_vm4, %v712_v42, %v709_v46  ;;  %6030 = vst [vmem:[#allocation45_spill] sm:$0xff] %v5213_v24 }
 0x254   :  { %v782_v10 = vmul.f32 %v5101_v60, %v754_v47  ;;  %v5196_v12 = vsel %vm713_vm4, %v709_v46, %v710_v50  ;;  %v5207_v17 = vsel %vm675_vm2, %v673_v37, %v674_v26  ;;  %v677_v19 = vsel %vm675_vm2, %v672_v31, %v673_v37  ;;  %v4225_v26 = vld [vmem:[%s6011_s1 + $0x170] sm:$0xff]   ;;  %v4224_v37 = vld [vmem:[%s6011_s1 + $0x1b8] sm:$0xff]  }
 0x255   :  { %v940_v5 = vpack.c.bf16 %v706_v45, %v705_v44  ;;  %v939_v36 = vpack.c.bf16 %v668_v11, %v667_v43  ;;  %v743_v44 = vmul.f32 %v5103_v61, %v5200_v13  ;;  %v744_v45 = vmul.f32 %v5105_v62, %v5196_v12 }
 0x256   :  { %v942_v27 = vpack.c.bf16 %v782_v10, %v781_v9  ;;  %v5224_v31 = vsel %vm638_vm1, %v634_v35, %v635_v23  ;;  %v707_v43 = vmul.f32 %v5091_v55, %v677_v19  ;;  %v708_v46 = vmul.f32 %v5093_v56, %v5207_v17  ;;  %v4226_v9 = vld [vmem:[%s6011_s1 + $0x1f0] sm:$0xff]  }
 0x257   :  { %1572 = vmatprep.mubr.bf16.mxu1 %v940_v5  ;;  %v752_v47 = vsel %vm751_vm3, %v749_v38, %v750_v32  ;;  %v941_v48 = vpack.c.bf16 %v744_v45, %v743_v44  ;;  %v753_v5 = vsel %vm751_vm3, %v748_v41, %v749_v38  ;;  %v711_v10 = vrot.slane %v5137_v22, 5  ;;  %v4227_v32 = vld [vmem:[%s6011_s1 + $0x130] sm:$0xff]   ;;  %v4229_v41 = vld [vmem:[%s6011_s1 + $0x168] sm:$0xff]  }
 0x258   :  { %1621 = vmatprep.mubr.bf16.mxu0 %v942_v27  ;;  %1573 = vmatmul.mubr.bf16.vlgmr.msra.gmra.mxu1 %v939_v36  ;;  %v784_v23 = vmul.f32 %v5126_v8, %v752_v47  ;;  %v949_v11 = vpack.c.bf16 %v708_v46, %v707_v43  ;;  %v783_v1 = vmul.f32 %v5124_v7, %v753_v5  ;;  %v815_v38 = vrot.slane %v5142_v25, 1  ;;  %v5268_v43 = vpop.permute.xlu0 %888  ;;  %v5270_v46 = vpop.permute.xlu1 %893  ;;  %v3504_v7 = vld [vmem:[%s6043_s28] ss:$0 sm:$0xff] }
 0x259   :  { %3787 = vmatpush3.bf16.msra.mxu1 %v4223_v14  ;;  %v5247_v27 = vsel %vm638_vm1, %v633_v29, %v634_v35  ;;  %1622 = vmatmul.mubr.bf16.vlgmr.msra.gmra.mxu0 %v941_v48  ;;  %v816_v36 = vrot.slane %v5137_v22, 1  ;;  %v4228_v29 = vld [vmem:[%s6011_s1 + $0x1b0] sm:$0xff]   ;;  %v5261_v35 = vsel %vm713_vm4, %v711_v10, %v712_v42  ;;  %v5265_v45 = vsel %vm713_vm4, %v710_v50, %v711_v10  ;;  %v4231_v50 = vld [vmem:[%s6011_s1 + $0x128] sm:$0xff]  }
 0x25a   :  { %3788 = vmatprep.subr.bf16.mxu1 %v4225_v26  ;;  %v669_v14 = vmul.f32 %v5095_v57, %v5247_v27  ;;  %3815 = vmatpush3.bf16.msra.mxu0 %v4224_v37  ;;  %v951_v44 = vpack.c.bf16 %v784_v23, %v783_v1  ;;  %v814_v26 = vrot.slane %v5131_v16, 1  ;;  %6031 = vst [vmem:[#allocation46_spill] sm:$0xff] %v5268_v43  ;;  %6032 = vst [vmem:[#allocation47_spill] sm:$0xff] %v5270_v46  ;;  %v4230_v37 = vld [vmem:[%s6011_s1 + $0x1e8] sm:$0xff]  }
 0x25b   :  { %1580 = vmatprep.mubr.bf16.mxu1 %v949_v11  ;;  %v670_v1 = vmul.f32 %v5097_v58, %v5224_v31  ;;  %3816 = vmatprep.subr.bf16.mxu0 %v4226_v9  ;;  %v745_v42 = vmul.f32 %v5129_v15, %v5265_v45  ;;  %v820_v47 = vsel %vm818_vm5, %v815_v38, %v816_v36 }
 0x25c   :  { %1629 = vmatprep.mubr.bf16.mxu0 %v951_v44  ;;  %v821_v48 = vsel %vm818_vm5, %v814_v26, %v815_v38  ;;  %v906_v5 = vmul.f32 %v5268_v43, %v5166_v39  ;;  %v746_v9 = vmul.f32 %v5133_v18, %v5261_v35  ;;  %v849_v11 = vmul.f32 %v5109_v0, %v820_v47  ;;  %v5310_v47 = vpop.permute.xlu0 %859 }
 0x25d   :  { %3789 = vmatpush3.bf16.msra.mxu1 %v4227_v32  ;;  %v948_v23 = vpack.c.bf16 %v670_v1, %v669_v14  ;;  %v848_v10 = vmul.f32 %v5107_v63, %v821_v48  ;;  %v4232_v32 = vld [vmem:[%s6011_s1 + $0x1a8] sm:$0xff]   ;;  %v907_v44 = vmul.f32 %v5270_v46, %v677_v19  ;;  %v4234_v14 = vld [vmem:[%s6011_s1 + $0x1e0] sm:$0xff]   ;;  %6033 = vst [vmem:[#allocation48_spill] sm:$0xff] %v5310_v47  ;;  %v5312_v19 = vpop.permute.xlu1 %864  ;;  %v4239_v48 = vld [vmem:[%s6011_s1 + $0x118] sm:$0xff]  }
 0x25e   :  { %3790 = vmatprep.subr.bf16.mxu1 %v4229_v41  ;;  %3817 = vmatpush3.bf16.msra.mxu0 %v4228_v29  ;;  %v950_v38 = vpack.c.bf16 %v746_v9, %v745_v42  ;;  %v4233_v41 = vld [vmem:[%s6011_s1 + $0x160] sm:$0xff]   ;;  %6034 = vst [vmem:[#allocation49_spill] sm:$0xff] %v5312_v19 }
 0x25f   :  { %3818 = vmatprep.subr.bf16.mxu0 %v4230_v37  ;;  %v944_v39 = vpack.c.bf16 %v849_v11, %v848_v10  ;;  %v946_v29 = vpack.c.bf16 %v907_v44, %v906_v5  ;;  %v4235_v1 = vld [vmem:[%s6011_s1 + $0x120] sm:$0xff]   ;;  %v4237_v37 = vld [vmem:[%s6011_s1 + $0x158] sm:$0xff]   ;;  %v4241_v5 = vld [vmem:[%s6011_s1 + $0x150] sm:$0xff]  }
 0x260   :  { %1581 = vmatmul.mubr.bf16.gmra.mxu1 %v948_v23  ;;  %v4236_v42 = vld [vmem:[%s6011_s1 + $0x1a0] sm:$0xff]   ;;  %v4240_v23 = vld [vmem:[%s6011_s1 + $0x198] sm:$0xff]   ;;  %v5332_v9 = vpop.permute.xlu0 %917  ;;  %v4242_v11 = vld [vmem:[%s6011_s1 + $0x1d0] sm:$0xff]  }
 0x261   :  { %3791 = vmatpush3.bf16.msra.mxu1 %v4231_v50  ;;  %1630 = vmatmul.mubr.bf16.gmra.mxu0 %v950_v38  ;;  %v4238_v50 = vld [vmem:[%s6011_s1 + $0x1d8] sm:$0xff]   ;;  %6035 = vst [vmem:[#allocation50_spill] sm:$0xff] %v5332_v9  ;;  %v5334_v10 = vpop.permute.xlu1 %922  ;;  %v4245_v44 = vld [vmem:[%s6011_s1 + $0x148] sm:$0xff]   ;;  %v4244_v38 = vld [vmem:[%s6011_s1 + $0x190] sm:$0xff]  }
 0x262   :  { %1670 = vmatprep.mubr.bf16.mxu1 %v944_v39  ;;  %3819 = vmatpush3.bf16.msra.mxu0 %v4232_v32  ;;  %6036 = vst [vmem:[#allocation51_spill] sm:$0xff] %v5334_v10  ;;  %v4243_v32 = vld [vmem:[%s6011_s1 + $0x110] sm:$0xff]   ;;  %v4246_v39 = vld [vmem:[%s6011_s1 + $0x1c8] sm:$0xff]  }
 0x263   :  { %1719 = vmatprep.mubr.bf16.mxu0 %v946_v29  ;;  %3792 = vmatprep.subr.bf16.mxu1 %v4233_v41  ;;  %v817_v41 = vrot.slane %v5135_v20, 1 }
 0x264   :  { %3820 = vmatprep.subr.bf16.mxu0 %v4234_v14  ;;  %v4247_v14 = vld [vmem:[%s6011_s1 + $0x108] sm:$0xff]   ;;  %v5355_v29 = vpop.permute.xlu0 %927 }
 0x265   :  { %3793 = vmatpush3.bf16.msra.mxu1 %v4235_v1  ;;  %6037 = vst [vmem:[#allocation52_spill] sm:$0xff] %v5355_v29  ;;  %v5357_v1 = vpop.permute.xlu1 %932 }
 0x266   :  { %3794 = vmatprep.subr.bf16.mxu1 %v4237_v37  ;;  %3821 = vmatpush3.bf16.msra.mxu0 %v4236_v42  ;;  %6038 = vst [vmem:[#allocation53_spill] sm:$0xff] %v5357_v1  ;;  %v4249_v37 = vld [vmem:[%s6011_s1 + $0x140] sm:$0xff]   ;;  %v4248_v42 = vld [vmem:[%s6011_s1 + $0x188] sm:$0xff]  }
 0x267   :  { %3822 = vmatprep.subr.bf16.mxu0 %v4238_v50  ;;  %v4250_v50 = vld [vmem:[%s6011_s1 + $0x1c0] sm:$0xff]  }
 0x269   :  { %3795 = vmatpush3.bf16.msra.mxu1 %v4239_v48  ;;  %v819_v48 = vsel %vm818_vm5, %v816_v36, %v817_v41  ;;  %v4252_v36 = vld [vmem:[%s6011_s1 + $0x180] sm:$0xff]  }
 0x26a   :  { %3796 = vmatprep.subr.bf16.mxu1 %v4241_v5  ;;  %3823 = vmatpush3.bf16.msra.mxu0 %v4240_v23  ;;  %v822_v5 = vsel %vm818_vm5, %v817_v41, %v814_v26  ;;  %v4251_v23 = vld [vmem:[%s6011_s1 + $0x100] sm:$0xff]   ;;  %v850_v26 = vmul.f32 %v5156_v33, %v819_v48  ;;  %v878_v41 = vmul.f32 %v5312_v19, %v5247_v27 }
 0x26b   :  { %3824 = vmatprep.subr.bf16.mxu0 %v4242_v11  ;;  %v811_v11 = vmul.f32 %v5116_v4, %v5142_v25  ;;  %v877_v25 = vmul.f32 %v5310_v47, %v5187_v49  ;;  %v4254_v49 = vld [vmem:[%s6011_s1 + $0x230] sm:$0xff]  }
 0x26d   :  { %3797 = vmatpush3.bf16.msra.mxu1 %v4243_v32  ;;  %v4253_v32 = vld [vmem:[%s6011_s1 + $0x238] sm:$0xff]   ;;  %v945_v27 = vpack.c.bf16 %v878_v41, %v877_v25  ;;  %v4256_v25 = vld [vmem:[%s6011_s1 + $0x220] sm:$0xff]  }
 0x26e   :  { %3798 = vmatprep.subr.bf16.mxu1 %v4245_v44  ;;  %3825 = vmatpush3.bf16.msra.mxu0 %v4244_v38  ;;  %v851_v44 = vmul.f32 %v5158_v34, %v822_v5  ;;  %v5389_v38 = vpop.permute.xlu0 %898 }
 0x26f   :  { %3826 = vmatprep.subr.bf16.mxu0 %v4246_v39  ;;  %6039 = vst [vmem:[#allocation54_spill] sm:$0xff] %v5389_v38  ;;  %v5391_v39 = vpop.permute.xlu1 %903 }
 0x270   :  { %6040 = vst [vmem:[#allocation55_spill] sm:$0xff] %v5391_v39  ;;  %v953_v5 = vpack.c.bf16 %v851_v44, %v850_v26  ;;  %v812_v26 = vmul.f32 %v5211_v21, %v5137_v22  ;;  %v4258_v22 = vld [vmem:[%s6011_s1 + $0x210] sm:$0xff]  }
 0x271   :  { %3799 = vmatpush3.bf16.msra.mxu1 %v4247_v14  ;;  %v810_v14 = vmul.f32 %v5114_v3, %v5131_v16  ;;  %v813_v16 = vmul.f32 %v5213_v24, %v5135_v20 }
 0x272   :  { %3800 = vmatprep.subr.bf16.mxu1 %v4249_v37  ;;  %3827 = vmatpush3.bf16.msra.mxu0 %v4248_v42  ;;  %v908_v37 = vmul.f32 %v5389_v38, %v5207_v17  ;;  %v909_v42 = vmul.f32 %v5391_v39, %v5170_v40  ;;  %v4255_v40 = vld [vmem:[%s6011_s1 + $0x228] sm:$0xff]   ;;  %v5411_v17 = vpop.permute.xlu0 %869 }
 0x273   :  { %3828 = vmatprep.subr.bf16.mxu0 %v4250_v50  ;;  %v943_v48 = vpack.c.bf16 %v811_v11, %v810_v14  ;;  %6041 = vst [vmem:[#allocation56_spill] sm:$0xff] %v5411_v17  ;;  %v935_v11 = vmul.f32 %v5332_v9, %v5196_v12  ;;  %v952_v44 = vpack.c.bf16 %v813_v16, %v812_v26  ;;  %v4267_v16 = vld [vmem:[#allocation6 + $0x50] ss:$8 sps:$4 sm:$0xff]   ;;  %v4281_v26 = vld [vmem:[#allocation6 + $0x14] ss:$8 sps:$4 sm:$0xff]  }
 0x274   :  { %v955_v50 = vpack.c.bf16 %v909_v42, %v908_v37  ;;  %v938_v14 = vmul.f32 %v5357_v1, %v5200_v13  ;;  %v937_v37 = vmul.f32 %v5355_v29, %v5261_v35  ;;  %v4270_v13 = vld [vmem:[#allocation6 + $0x40] ss:$8 sps:$4 sm:$0xff]   ;;  %v4275_v35 = vld [vmem:[#allocation6 + $0x34] ss:$8 sps:$4 sm:$0xff]  }
 0x275   :  { %3801 = vmatpush3.bf16.msra.mxu1 %v4251_v23  ;;  %v5413_v23 = vpop.permute.xlu1 %874 }
 0x276   :  { %4034 = vmatprep.subr.bf16.mxu1 %v4253_v32  ;;  %3829 = vmatpush3.bf16.msra.mxu0 %v4252_v36  ;;  %6042 = vst [vmem:[#allocation57_spill] sm:$0xff] %v5413_v23  ;;  %v879_v36 = vmul.f32 %v5411_v17, %v5224_v31  ;;  %v880_v20 = vmul.f32 %v5413_v23, %v5151_v28  ;;  %v4257_v28 = vld [vmem:[%s6011_s1 + $0x218] sm:$0xff]   ;;  %v4259_v31 = vld [vmem:[%s6011_s1 + $0x208] sm:$0xff]  }
 0x277   :  { %v956_v42 = vpack.c.bf16 %v938_v14, %v937_v37  ;;  %v4296_v14 = vld [vmem:[#allocation7 + $0x44] ss:$8 sps:$4 sm:$0xff]   ;;  %v4294_v37 = vld [vmem:[#allocation7 + $0x40] ss:$8 sps:$4 sm:$0xff]  }
 0x278   :  { %1671 = vmatmul.mubr.bf16.vlgmr.msra.gmra.mxu1 %v943_v48  ;;  %v954_v41 = vpack.c.bf16 %v880_v20, %v879_v36  ;;  %v4261_v48 = vld [vmem:[#allocation6 + $0x70] ss:$8 sps:$4 sm:$0xff]   ;;  %v4278_v36 = vld [vmem:[#allocation6 + $0x24] ss:$8 sps:$4 sm:$0xff]  }
 0x279   :  { %1678 = vmatprep.mubr.bf16.mxu1 %v953_v5  ;;  %4035 = vmatpush3.bf16.msra.mxu1 %v4253_v32  ;;  %v936_v32 = vmul.f32 %v5334_v10, %v5265_v45  ;;  %v4260_v45 = vld [vmem:[%s6011_s1 + $0x200] sm:$0xff]   ;;  %v4279_v20 = vld [vmem:[#allocation6 + $0x10] ss:$8 sps:$4 sm:$0xff]  }
 0x27a   :  { %1720 = vmatmul.mubr.bf16.vlgmr.msra.gmra.mxu0 %v945_v27  ;;  %4036 = vmatprep.subr.bf16.mxu1 %v4254_v49  ;;  %v4264_v5 = vld [vmem:[#allocation6 + $0x60] ss:$8 sps:$4 sm:$0xff]   ;;  %v4266_v27 = vld [vmem:[#allocation6 + $0x64] ss:$8 sps:$4 sm:$0xff]  }
 0x27b   :  { %1727 = vmatprep.mubr.bf16.mxu0 %v955_v50  ;;  %v947_v12 = vpack.c.bf16 %v936_v32, %v935_v11  ;;  %v4269_v50 = vld [vmem:[#allocation6 + $0x54] ss:$8 sps:$4 sm:$0xff]   ;;  %v4273_v11 = vld [vmem:[#allocation6 + $0x30] ss:$8 sps:$4 sm:$0xff]   ;;  %v4276_v32 = vld [vmem:[#allocation6 + $0x20] ss:$8 sps:$4 sm:$0xff]  }
 0x27d   :  { %4037 = vmatpush3.bf16.msra.mxu1 %v4254_v49  ;;  %v4263_v49 = vld [vmem:[#allocation6 + $0x74] ss:$8 sps:$4 sm:$0xff]  }
 0x27e   :  { %4038 = vmatprep.subr.bf16.mxu1 %v4255_v40  ;;  %1899 = vmatprep.subr.bf16.mxu0 %v4263_v49  ;;  %v4302_v49 = vld [vmem:[#allocation7 + $0x24] ss:$8 sps:$4 sm:$0xff]  }
 0x27f   :  { %1900 = vmatpush1.bf16.msra.mxu0 %v4261_v48  ;;  %v4297_v48 = vld [vmem:[#allocation7 + $0x30] ss:$8 sps:$4 sm:$0xff]  }
 0x280   :  { %1679 = vmatmul.mubr.bf16.gmra.mxu1 %v952_v44  ;;  %1901 = vmatprep.subr.bf16.mxu0 %v4266_v27  ;;  %v4284_v44 = vld [vmem:[#allocation6 + $0x4] ss:$8 sps:$4 sm:$0xff]   ;;  %v4300_v27 = vld [vmem:[#allocation7 + $0x20] ss:$8 sps:$4 sm:$0xff]  }
 0x281   :  { %4039 = vmatpush3.bf16.msra.mxu1 %v4255_v40  ;;  %4050 = vmatprep.mubr.bf16.mxu1 %v947_v12  ;;  %v4272_v40 = vld [vmem:[#allocation6 + $0x44] ss:$8 sps:$4 sm:$0xff]   ;;  %v4285_v12 = vld [vmem:[#allocation7 + $0x70] ss:$8 sps:$4 sm:$0xff]  }
 0x282   :  { %1728 = vmatmul.mubr.bf16.gmra.mxu0 %v954_v41  ;;  %4040 = vmatprep.subr.bf16.mxu1 %v4256_v25  ;;  %v4287_v41 = vld [vmem:[#allocation7 + $0x74] ss:$8 sps:$4 sm:$0xff]  }
 0x283   :  { %1931 = vmatprep.mubr.bf16.mxu0 %v5969_v30  ;;  %1902 = vmatpush1.bf16.msra.mxu0 %v4264_v5  ;;  %v5445_v5 = vpop.f32.mrf.mxu1 }
 0x284   :  { %1903 = vmatprep.subr.bf16.mxu0 %v4269_v50  ;;  %v4305_v50 = vld [vmem:[#allocation7 + $0x14] ss:$8 sps:$4 sm:$0xff]  }
 0x285   :  { %4041 = vmatpush3.bf16.msra.mxu1 %v4256_v25  ;;  %v4282_v25 = vld [vmem:[#allocation6] ss:$8 sps:$4 sm:$0xff]  }
 0x286   :  { %4042 = vmatprep.subr.bf16.mxu1 %v4257_v28 }
 0x287   :  { %1904 = vmatpush1.bf16.msra.mxu0 %v4267_v16  ;;  %v5447_v16 = vpop.f32.mrf.mxu1 }
 0x288   :  { %1905 = vmatprep.subr.bf16.mxu0 %v4272_v40  ;;  %v4303_v40 = vld [vmem:[#allocation7 + $0x10] ss:$8 sps:$4 sm:$0xff]  }
 0x289   :  { %4043 = vmatpush3.bf16.msra.mxu1 %v4257_v28  ;;  %v4290_v28 = vld [vmem:[#allocation7 + $0x64] ss:$8 sps:$4 sm:$0xff]  }
 0x28a   :  { %4044 = vmatprep.subr.bf16.mxu1 %v4258_v22 }
 0x28b   :  { %1906 = vmatpush1.bf16.msra.mxu0 %v4270_v13  ;;  %v4308_v13 = vld [vmem:[#allocation7 + $0x4] ss:$8 sps:$4 sm:$0xff]  }
 0x28c   :  { %1907 = vmatprep.subr.bf16.mxu0 %v4275_v35  ;;  %v5449_v35 = vpop.f32.mrf.mxu1 }
 0x28d   :  { %4045 = vmatpush3.bf16.msra.mxu1 %v4258_v22  ;;  %v4288_v22 = vld [vmem:[#allocation7 + $0x60] ss:$8 sps:$4 sm:$0xff]  }
 0x28e   :  { %4046 = vmatprep.subr.bf16.mxu1 %v4259_v31 }
 0x28f   :  { %1908 = vmatpush1.bf16.msra.mxu0 %v4273_v11  ;;  %v4306_v11 = vld [vmem:[#allocation7] ss:$8 sps:$4 sm:$0xff]  }
 0x290   :  { %1909 = vmatprep.subr.bf16.mxu0 %v4278_v36  ;;  %v5451_v36 = vpop.f32.mrf.mxu1 }
 0x291   :  { %4047 = vmatpush3.bf16.msra.mxu1 %v4259_v31  ;;  %v4293_v31 = vld [vmem:[#allocation7 + $0x54] ss:$8 sps:$4 sm:$0xff]  }
 0x292   :  { %4048 = vmatprep.subr.bf16.mxu1 %v4260_v45 }
 0x293   :  { %1910 = vmatpush1.bf16.msra.mxu0 %v4276_v32  ;;  %v4311_v32 = vld [vmem:[#allocation7 + $0xf4] ss:$8 sps:$4 sm:$0xff]  }
 0x294   :  { %1911 = vmatprep.subr.bf16.mxu0 %v4281_v26  ;;  %v4314_v26 = vld [vmem:[#allocation7 + $0xe4] ss:$8 sps:$4 sm:$0xff]  }
 0x295   :  { %4049 = vmatpush3.bf16.msra.mxu1 %v4260_v45  ;;  %v4291_v45 = vld [vmem:[#allocation7 + $0x50] ss:$8 sps:$4 sm:$0xff]  }
 0x296   :  { %2176 = vmatprep.subr.bf16.mxu1 %v4287_v41 }
 0x297   :  { %1912 = vmatpush1.bf16.msra.mxu0 %v4279_v20  ;;  %v4309_v20 = vld [vmem:[#allocation7 + $0xf0] ss:$8 sps:$4 sm:$0xff]  }
 0x298   :  { %4051 = vmatmul.mubr.bf16.vlgmr.msra.gmra.mxu1 %v956_v42  ;;  %1913 = vmatprep.subr.bf16.mxu0 %v4284_v44  ;;  %v4299_v42 = vld [vmem:[#allocation7 + $0x34] ss:$8 sps:$4 sm:$0xff]   ;;  %v5453_v44 = vpop.f32.mrf.mxu1 }
 0x299   :  { %2177 = vmatpush1.bf16.msra.mxu1 %v4285_v12  ;;  %v4317_v12 = vld [vmem:[#allocation7 + $0xd4] ss:$8 sps:$4 sm:$0xff]  }
 0x29a   :  { %2178 = vmatprep.subr.bf16.mxu1 %v4290_v28  ;;  %v5455_v41 = vpop.f32.mrf.mxu1  ;;  %v4315_v28 = vld [vmem:[#allocation7 + $0xd0] ss:$8 sps:$4 sm:$0xff]  }
 0x29b   :  { %1914 = vmatpush1.bf16.msra.mxu0 %v4282_v25  ;;  %v4312_v25 = vld [vmem:[#allocation7 + $0xe0] ss:$8 sps:$4 sm:$0xff]  }
 0x29d   :  { %2179 = vmatpush1.bf16.msra.mxu1 %v4288_v22  ;;  %v4320_v22 = vld [vmem:[#allocation7 + $0xc4] ss:$8 sps:$4 sm:$0xff]  }
 0x29e   :  { %2180 = vmatprep.subr.bf16.mxu1 %v4293_v31  ;;  %v5457_v31 = vpop.f32.mrf.mxu1 }
 0x2a1   :  { %2181 = vmatpush1.bf16.msra.mxu1 %v4291_v45  ;;  %v4318_v45 = vld [vmem:[#allocation7 + $0xc0] ss:$8 sps:$4 sm:$0xff]  }
 0x2a2   :  { %2182 = vmatprep.subr.bf16.mxu1 %v4296_v14  ;;  %v5459_v14 = vpop.f32.mrf.mxu1 }
 0x2a5   :  { %2183 = vmatpush1.bf16.msra.mxu1 %v4294_v37 }
 0x2a6   :  { %2184 = vmatprep.subr.bf16.mxu1 %v4299_v42 }
 0x2a9   :  { %2185 = vmatpush1.bf16.msra.mxu1 %v4297_v48 }
 0x2aa   :  { %2186 = vmatprep.subr.bf16.mxu1 %v4302_v49 }
 0x2ad   :  { %2187 = vmatpush1.bf16.msra.mxu1 %v4300_v27 }
 0x2ae   :  { %2188 = vmatprep.subr.bf16.mxu1 %v4305_v50 }
 0x2b1   :  { %2189 = vmatpush1.bf16.msra.mxu1 %v4303_v40 }
 0x2b2   :  { %2190 = vmatprep.subr.bf16.mxu1 %v4308_v13 }
 0x2b5   :  { %2191 = vmatpush1.bf16.msra.mxu1 %v4306_v11 }
 0x2b6   :  { %2192 = vmatprep.subr.bf16.mxu1 %v4311_v32 }
 0x2b9   :  { %2193 = vmatpush2.bf16.msra.mxu1 %v4309_v20 }
 0x2ba   :  { %2194 = vmatprep.subr.bf16.mxu1 %v4314_v26 }
 0x2bd   :  { %2195 = vmatpush2.bf16.msra.mxu1 %v4312_v25 }
 0x2be   :  { %2196 = vmatprep.subr.bf16.mxu1 %v4317_v12 }
 0x2c1   :  { %2197 = vmatpush2.bf16.msra.mxu1 %v4315_v28 }
 0x2c2   :  { %2198 = vmatprep.subr.bf16.mxu1 %v4320_v22 }
 0x2c5   :  { %2199 = vmatpush2.bf16.msra.mxu1 %v4318_v45 }
 0x318   :  { %v3746_v37 = vpop.f32.mrf.mxu1 }
 0x319   :  { %v3774_v48 = vpop.f32.mrf.mxu0 }
 0x31a   :  { %v3747_v42 = vpop.f32.mrf.mxu1 }
 0x31b   :  { %v3775_v27 = vpop.f32.mrf.mxu0  ;;  %v3748_v18 = vadd.f32 %v3747_v42, %v3746_v37 }
 0x31c   :  { %v3749_v49 = vpop.f32.mrf.mxu1  ;;  %v3776_v23 = vadd.f32 %v3775_v27, %v3774_v48 }
 0x31d   :  { %v3777_v40 = vpop.f32.mrf.mxu0  ;;  %v1575_v1 = vadd.f32 %v3748_v18, %v3504_v7 }
 0x31e   :  { %v3750_v50 = vpop.f32.mrf.mxu1 }
 0x31f   :  { %v3778_v11 = vpop.f32.mrf.mxu0  ;;  %v3751_v8 = vadd.f32 %v3750_v50, %v3749_v49  ;;  %v1624_v9 = vadd.f32 %v3776_v23, %v1575_v1 }
 0x320   :  { %v3752_v13 = vpop.f32.mrf.mxu1  ;;  %v3779_v10 = vadd.f32 %v3778_v11, %v3777_v40 }
 0x321   :  { %v3780_v20 = vpop.f32.mrf.mxu0  ;;  %v1578_v17 = vadd.f32 %v3751_v8, %v3504_v7 }
 0x322   :  { %v3753_v32 = vpop.f32.mrf.mxu1 }
 0x323   :  { %v3781_v25 = vpop.f32.mrf.mxu0  ;;  %v3754_v57 = vadd.f32 %v3753_v32, %v3752_v13  ;;  %v1627_v37 = vadd.f32 %v3779_v10, %v1578_v17  ;;  %v4327_v32 = vld [vmem:[#allocation7 + $0x90] ss:$8 sps:$4 sm:$0xff]  }
 0x324   :  { %v3755_v26 = vpop.f32.mrf.mxu1  ;;  %v3782_v48 = vadd.f32 %v3781_v25, %v3780_v20  ;;  %v4332_v20 = vld [vmem:[#allocation7 + $0x84] ss:$8 sps:$4 sm:$0xff]   ;;  %v4335_v25 = vld [vmem:[%s5952_s12 + $0x78] sm:$0xff]  }
 0x325   :  { %v3783_v28 = vpop.f32.mrf.mxu0  ;;  %v1583_v56 = vadd.f32 %v3754_v57, %v3504_v7  ;;  %3852 = vmatprep.subr.bf16.mxu0 %v4335_v25 }
 0x326   :  { %v3756_v12 = vpop.f32.mrf.mxu1 }
 0x327   :  { %v3784_v22 = vpop.f32.mrf.mxu0  ;;  %v3757_v60 = vadd.f32 %v3756_v12, %v3755_v26  ;;  %v4333_v26 = vld [vmem:[%s5952_s12 + $0x178] sm:$0xff]  }
 0x328   :  { %v3785_v49 = vadd.f32 %v3784_v22, %v3783_v28  ;;  %v4337_v12 = vld [vmem:[%s5952_s12 + $0x38] sm:$0xff]   ;;  %v4339_v28 = vld [vmem:[%s5952_s12 + $0x70] sm:$0xff]  }
 0x329   :  { %v1586_v42 = vadd.f32 %v3757_v60, %v3504_v7  ;;  %v4341_v22 = vld [vmem:[%s5952_s12 + $0x30] sm:$0xff]  }
 0x32b   :  { %v1635_v27 = vadd.f32 %v3785_v49, %v1586_v42  ;;  %v5487_v42 = vsub.s32 1, %v5112_v2 }
 0x338   :  { %v3802_v30 = vpop.f32.mrf.mxu1 }
 0x33a   :  { %v3803_v47 = vpop.f32.mrf.mxu1  ;;  %v3830_v39 = vpop.f32.mrf.mxu0 }
 0x33b   :  { %v3804_v59 = vadd.f32 %v3803_v47, %v3802_v30 }
 0x33c   :  { %v3805_v38 = vpop.f32.mrf.mxu1  ;;  %v3831_v45 = vpop.f32.mrf.mxu0 }
 0x33d   :  { %v1673_v55 = vadd.f32 %v3804_v59, %v1624_v9  ;;  %v3832_v50 = vadd.f32 %v3831_v45, %v3830_v39  ;;  %v1807_v45 = vld [vmem:[%s5949_s9] sm:$0x3] }
 0x33e   :  { %v3806_v19 = vpop.f32.mrf.mxu1  ;;  %v3833_v43 = vpop.f32.mrf.mxu0 }
 0x33f   :  { %v3807_v21 = vadd.f32 %v3806_v19, %v3805_v38  ;;  %v1722_v13 = vadd.f32 %v3832_v50, %v1673_v55  ;;  %v1632_v19 = vadd.f32 %v3782_v48, %v1583_v56  ;;  %v6044_v55 = vmov 0  }
 0x340   :  { %v3808_v46 = vpop.f32.mrf.mxu1  ;;  %v3834_v15 = vpop.f32.mrf.mxu0 }
 0x341   :  { %v1676_v18 = vadd.f32 %v3807_v21, %v1627_v37  ;;  %v3835_v30 = vadd.f32 %v3834_v15, %v3833_v43  ;;  %v4321_v43 = vld [vmem:[#allocation7 + $0xb0] ss:$8 sps:$4 sm:$0xff]   ;;  %v5484_v37 = vsub.s32 0, %v5112_v2 }
 0x342   :  { %v3809_v62 = vpop.f32.mrf.mxu1  ;;  %v3836_v61 = vpop.f32.mrf.mxu0  ;;  %v4390_v2 = vld [vmem:[%s5952_s12 + $0x1b8] sm:$0xff]  }
 0x343   :  { %v3810_v47 = vadd.f32 %v3809_v62, %v3808_v46  ;;  %v1725_v60 = vadd.f32 %v3835_v30, %v1676_v18  ;;  %v4323_v46 = vld [vmem:[#allocation7 + $0xb4] ss:$8 sps:$4 sm:$0xff]   ;;  %v1812_v49 = vrot.slane %v1807_v45, %v5484_v37  ;;  %v386_v50 = vrot.slane %v5122_v6, %v5484_v37 }
 0x344   :  { %v3811_v29 = vpop.f32.mrf.mxu1  ;;  %v3837_v58 = vpop.f32.mrf.mxu0  ;;  %2200 = vmatprep.subr.bf16.mxu1 %v4323_v46  ;;  %v1816_v18 = vrot.slane %v1807_v45, %v5487_v42  ;;  %v4343_v45 = vld [vmem:[%s5952_s12 + $0x68] sm:$0xff]  }
 0x345   :  { %v1681_v57 = vadd.f32 %v3810_v47, %v1632_v19  ;;  %v3838_v17 = vadd.f32 %v3837_v58, %v3836_v61  ;;  %2201 = vmatpush2.bf16.msra.mxu1 %v4321_v43  ;;  %v4326_v58 = vld [vmem:[#allocation7 + $0xa4] ss:$8 sps:$4 sm:$0xff]   ;;  %v4329_v61 = vld [vmem:[#allocation7 + $0x94] ss:$8 sps:$4 sm:$0xff]   ;;  %v561_v47 = vadd.f32 %v5445_v5, %v386_v50  ;;  %v565_v19 = vadd.f32 %v5449_v35, %v386_v50 }
 0x346   :  { %v3812_v24 = vpop.f32.mrf.mxu1  ;;  %v3839_v52 = vpop.f32.mrf.mxu0  ;;  %2202 = vmatprep.subr.bf16.mxu1 %v4326_v58  ;;  %v571_v5 = vadd.f32 %v5453_v44, %v386_v50  ;;  %v4334_v43 = vld [vmem:[%s5952_s12 + $0x138] sm:$0xff]   ;;  %v4336_v44 = vld [vmem:[%s5952_s12 + $0x170] sm:$0xff]  }
 0x347   :  { %v3813_v33 = vadd.f32 %v3812_v24, %v3811_v29  ;;  %v1730_v29 = vadd.f32 %v3838_v17, %v1681_v57 }
 0x348   :  { %v3840_v1 = vpop.f32.mrf.mxu0 }
 0x349   :  { %v1684_v38 = vadd.f32 %v3813_v33, %v1635_v27  ;;  %v3841_v7 = vadd.f32 %v3840_v1, %v3839_v52  ;;  %v4324_v52 = vld [vmem:[#allocation7 + $0xa0] ss:$8 sps:$4 sm:$0xff]  }
 0x34a   :  { %2203 = vmatpush2.bf16.msra.mxu1 %v4324_v52 }
 0x34b   :  { %v1733_v21 = vadd.f32 %v3841_v7, %v1684_v38  ;;  %2204 = vmatprep.subr.bf16.mxu1 %v4329_v61 }
 0x34e   :  { %2205 = vmatpush2.bf16.msra.mxu1 %v4327_v32 }
 0x34f   :  { %2206 = vmatprep.subr.bf16.mxu1 %v4332_v20 }
 0x358   :  { %v4052_v34 = vpop.f32.mrf.mxu1 }
 0x359   :  { %v1779_v15 = vadd.f32 %v4052_v34, %v1730_v29  ;;  %v4330_v34 = vld [vmem:[#allocation7 + $0x80] ss:$8 sps:$4 sm:$0xff]  }
 0x35a   :  { %v1770_v8 = vpop.f32.mrf.mxu1  ;;  %2207 = vmatpush2.bf16.msra.mxu1 %v4330_v34  ;;  %v4338_v34 = vld [vmem:[%s5952_s12 + $0x130] sm:$0xff]  }
 0x35b   :  { %v1771_v10 = vadd.f32 %v1770_v8, %v1722_v13  ;;  %v1787_v56 = vmax.f32 %v1779_v15, 0.0  ;;  %3908 = vmatprep.subr.bf16.mxu1 %v4333_v26  ;;  %v390_v8 = vrot.slane %v5122_v6, %v5487_v42  ;;  %v4340_v26 = vld [vmem:[%s5952_s12 + $0x168] sm:$0xff]  }
 0x35c   :  { %v4053_v23 = vpop.f32.mrf.mxu1 }
 0x35d   :  { %v1785_v39 = vmax.f32 %v1771_v10, 0.0  ;;  %v1782_v40 = vadd.f32 %v4053_v23, %v1733_v21  ;;  %v563_v23 = vadd.f32 %v5447_v16, %v390_v8  ;;  %v573_v15 = vadd.f32 %v5455_v41, %v390_v8 }
 0x35e   :  { %v1773_v59 = vpop.f32.mrf.mxu1  ;;  %v577_v52 = vadd.f32 %v5459_v14, %v390_v8 }
 0x35f   :  { %v1774_v9 = vadd.f32 %v1773_v59, %v1725_v60  ;;  %v1788_v62 = vmax.f32 %v1782_v40, 0.0  ;;  %v567_v59 = vadd.f32 %v5451_v36, %v390_v8  ;;  %v575_v36 = vadd.f32 %v5457_v31, %v386_v50  ;;  %v4345_v50 = vld [vmem:[%s5952_s12 + $0x28] sm:$0xff]   ;;  %v4348_v8 = vld [vmem:[%s5952_s12 + $0x158] sm:$0xff]  }
 0x361   :  { %v1786_v24 = vmax.f32 %v1774_v9, 0.0  ;;  %v1790_v33 = vpack.c.bf16 %v1788_v62, %v1787_v56 }
 0x363   :  { %v1789_v11 = vpack.c.bf16 %v1786_v24, %v1785_v39 }
 0x365   :  { %1932 = vmatmul.mubr.bf16.vlgmr.msra.gmra.mxu0 %v1789_v11 }
 0x366   :  { %1941 = vmatprep.mubr.bf16.mxu0 %v6044_v55  ;;  %3853 = vmatpush3.bf16.msra.mxu0 %v4337_v12 }
 0x367   :  { %3854 = vmatprep.subr.bf16.mxu0 %v4339_v28 }
 0x36a   :  { %3855 = vmatpush3.bf16.msra.mxu0 %v4341_v22  ;;  %v4342_v22 = vld [vmem:[%s5952_s12 + $0x128] sm:$0xff]  }
 0x36b   :  { %3856 = vmatprep.subr.bf16.mxu0 %v4343_v45 }
 0x36d   :  { %1942 = vmatmul.mubr.bf16.gmra.mxu0 %v1790_v33 }
 0x36e   :  { %3857 = vmatpush3.bf16.msra.mxu0 %v4345_v50 }
 0x425   :  { %v1933_v48 = vpop.f32.mrf.mxu0 }
 0x426   :  { %v1934_v27 = vadd.f32 %v1933_v48, %v1812_v49  ;;  %v4347_v48 = vld [vmem:[%s5952_s12 + $0x60] sm:$0xff]  }
 0x427   :  { %v1935_v30 = vpop.f32.mrf.mxu0  ;;  %3858 = vmatprep.subr.bf16.mxu0 %v4347_v48 }
 0x428   :  { %v1936_v13 = vadd.f32 %v1935_v30, %v1816_v18  ;;  %v1952_v38 = vadd.f32 %v1934_v27, %v561_v47  ;;  %v4349_v27 = vld [vmem:[%s5952_s12 + $0x20] sm:$0xff]   ;;  %v4350_v30 = vld [vmem:[%s5952_s12 + $0x118] sm:$0xff]  }
 0x429   :  { %v1937_v1 = vpop.f32.mrf.mxu0  ;;  %v4351_v47 = vld [vmem:[%s5952_s12 + $0x58] sm:$0xff]   ;;  %3859 = vmatpush3.bf16.msra.mxu0 %v4349_v27 }
 0x42a   :  { %v1938_v10 = vadd.f32 %v1937_v1, %v1812_v49  ;;  %v1953_v57 = vadd.f32 %v1936_v13, %v563_v23  ;;  %v1960_v6 = vmax.f32 %v1952_v38, 0.0  ;;  %v4352_v13 = vld [vmem:[%s5952_s12 + $0x150] sm:$0xff]   ;;  %v4353_v1 = vld [vmem:[%s5952_s12 + $0x18] sm:$0xff]   ;;  %3860 = vmatprep.subr.bf16.mxu0 %v4351_v47  ;;  %v4356_v38 = vld [vmem:[%s5952_s12 + $0x148] sm:$0xff]  }
 0x42b   :  { %v1939_v60 = vpop.f32.mrf.mxu0  ;;  %v4354_v23 = vld [vmem:[%s5952_s12 + $0x110] sm:$0xff]  }
 0x42c   :  { %v1954_v7 = vadd.f32 %v1938_v10, %v565_v19  ;;  %v1940_v9 = vadd.f32 %v1939_v60, %v1816_v18  ;;  %v1961_v40 = vmax.f32 %v1953_v57, 0.0  ;;  %v4355_v19 = vld [vmem:[%s5952_s12 + $0x50] sm:$0xff]   ;;  %v4358_v60 = vld [vmem:[%s5952_s12 + $0x108] sm:$0xff]   ;;  %v4360_v57 = vld [vmem:[%s5952_s12 + $0x140] sm:$0xff]  }
 0x42d   :  { %v1943_v17 = vpop.f32.mrf.mxu0  ;;  %3861 = vmatpush3.bf16.msra.mxu0 %v4353_v1  ;;  %v4357_v10 = vld [vmem:[%s5952_s12 + $0x10] sm:$0xff]  }
 0x42e   :  { %v1962_v39 = vmax.f32 %v1954_v7, 0.0  ;;  %v1955_v21 = vadd.f32 %v1940_v9, %v567_v59  ;;  %v1944_v24 = vadd.f32 %v1943_v17, %v1812_v49  ;;  %v4359_v59 = vld [vmem:[%s5952_s12 + $0x48] sm:$0xff]   ;;  %3862 = vmatprep.subr.bf16.mxu0 %v4355_v19  ;;  %v4362_v9 = vld [vmem:[%s5952_s12 + $0x100] sm:$0xff]  }
 0x42f   :  { %v1945_v29 = vpop.f32.mrf.mxu0  ;;  %v4361_v7 = vld [vmem:[%s5952_s12 + $0x8] sm:$0xff]   ;;  %v4363_v17 = vld [vmem:[%s5952_s12 + $0x40] sm:$0xff]  }
 0x430   :  { %v1968_v16 = vpack.c.bf16 %v1962_v39, %v1960_v6  ;;  %v1963_v11 = vmax.f32 %v1955_v21, 0.0  ;;  %v1946_v35 = vadd.f32 %v1945_v29, %v1816_v18  ;;  %v1956_v62 = vadd.f32 %v1944_v24, %v571_v5  ;;  %v5584_v6 = vld [vmem:[%s5952_s12 + $0x238] sm:$0xff]   ;;  %v4365_v39 = vld [vmem:[%s5952_s12] sm:$0xff]  }
 0x431   :  { %v1947_v55 = vpop.f32.mrf.mxu0  ;;  %3863 = vmatpush3.bf16.msra.mxu0 %v4357_v10  ;;  %v4366_v21 = vld [vmem:[%s5952_s12 + $0xf8] sm:$0xff]   ;;  %v5593_v24 = vld [vmem:[#allocation9] sm:$0x3] }
 0x432   :  { %v1948_v56 = vadd.f32 %v1947_v55, %v1812_v49  ;;  %v1969_v33 = vpack.c.bf16 %v1963_v11, %v1961_v40  ;;  %v1957_v58 = vadd.f32 %v1946_v35, %v573_v15  ;;  %v1964_v31 = vmax.f32 %v1956_v62, 0.0  ;;  %v4344_v49 = vld [vmem:[%s5952_s12 + $0x160] sm:$0xff]   ;;  %3864 = vmatprep.subr.bf16.mxu0 %v4359_v59 }
 0x433   :  { %v1949_v46 = vpop.f32.mrf.mxu0  ;;  %v2013_v29 = vrot.slane %v5593_v24, %v5487_v42 }
 0x434   :  { %v1958_v61 = vadd.f32 %v1948_v56, %v575_v36  ;;  %v1950_v41 = vadd.f32 %v1949_v46, %v1816_v18  ;;  %2208 = vmatprep.mubr.bf16.mxu1 %v1969_v33  ;;  %v1965_v25 = vmax.f32 %v1957_v58, 0.0  ;;  %v4346_v18 = vld [vmem:[%s5952_s12 + $0x120] sm:$0xff]  }
 0x435   :  { %2209 = vmatmul.mubr.bf16.vlgmr.msra.gmra.mxu1 %v1968_v16  ;;  %3865 = vmatpush3.bf16.msra.mxu0 %v4361_v7 }
 0x436   :  { %v1966_v32 = vmax.f32 %v1958_v61, 0.0  ;;  %v1959_v20 = vadd.f32 %v1950_v41, %v577_v52  ;;  %3909 = vmatpush3.bf16.msra.mxu1 %v4334_v43  ;;  %3866 = vmatprep.subr.bf16.mxu0 %v4363_v17 }
 0x437   :  { %3910 = vmatprep.subr.bf16.mxu1 %v4336_v44 }
 0x438   :  { %v1967_v14 = vmax.f32 %v1959_v20, 0.0  ;;  %v1970_v12 = vpack.c.bf16 %v1966_v32, %v1964_v31 }
 0x439   :  { %3867 = vmatpush3.bf16.msra.mxu0 %v4365_v39 }
 0x43a   :  { %v1971_v28 = vpack.c.bf16 %v1967_v14, %v1965_v25  ;;  %3911 = vmatpush3.bf16.msra.mxu1 %v4338_v34  ;;  %3880 = vmatprep.subr.bf16.mxu0 %v4366_v21 }
 0x43b   :  { %3912 = vmatprep.subr.bf16.mxu1 %v4340_v26 }
 0x43c   :  { %2218 = vmatprep.mubr.bf16.mxu1 %v1971_v28 }
 0x43d   :  { %2219 = vmatmul.mubr.bf16.gmra.mxu1 %v1970_v12 }
 0x43e   :  { %3913 = vmatpush3.bf16.msra.mxu1 %v4342_v22 }
 0x43f   :  { %3914 = vmatprep.subr.bf16.mxu1 %v4344_v49 }
 0x442   :  { %3915 = vmatpush3.bf16.msra.mxu1 %v4346_v18 }
 0x443   :  { %3916 = vmatprep.subr.bf16.mxu1 %v4348_v8 }
 0x446   :  { %3917 = vmatpush3.bf16.msra.mxu1 %v4350_v30 }
 0x447   :  { %3918 = vmatprep.subr.bf16.mxu1 %v4352_v13 }
 0x44a   :  { %3919 = vmatpush3.bf16.msra.mxu1 %v4354_v23 }
 0x44b   :  { %3920 = vmatprep.subr.bf16.mxu1 %v4356_v38  ;;  %v6045_v38 = vld [vmem:[#allocation42_spill] sm:$0xff] }
 0x44e   :  { %3921 = vmatpush3.bf16.msra.mxu1 %v4358_v60  ;;  %v6046_v60 = vld [vmem:[#allocation43_spill] sm:$0xff] }
 0x44f   :  { %3922 = vmatprep.subr.bf16.mxu1 %v4360_v57  ;;  %v6047_v57 = vld [vmem:[#allocation29_spill] sm:$0xff] }
 0x452   :  { %3923 = vmatpush3.bf16.msra.mxu1 %v4362_v9 }
 0x453   :  { %4054 = vmatprep.subr.bf16.mxu1 %v5584_v6 }
 0x4f5   :  { %v5595_v5 = vpop.f32.mrf.mxu1 }
 0x4f7   :  { %v2212_v40 = vpop.f32.mrf.mxu1 }
 0x4f8   :  { %v2213_v11 = vadd.f32 %v2212_v40, %v2013_v29 }
 0x4f9   :  { %v5599_v16 = vpop.f32.mrf.mxu1 }
 0x4fa   :  { %v5603_v36 = vmax.f32 %v2213_v11, 0.0  ;;  %v4368_v11 = vld [vmem:[%s5952_s12 + $0xb8] sm:$0xff]  }
 0x4fb   :  { %v2216_v35 = vpop.f32.mrf.mxu1 }
 0x4fc   :  { %v2217_v15 = vadd.f32 %v2216_v35, %v2013_v29  ;;  %v2285_v52 = vrot.slane %v5603_v36, 1  ;;  %v2233_v61 = vrot.slane %v5603_v36, 3  ;;  %v2245_v26 = vrot.slane %v5603_v36, 4  ;;  %v6048_v35 = vld [vmem:[#allocation31_spill] sm:$0xff] }
 0x4fd   :  { %v5601_v55 = vpop.f32.mrf.mxu1  ;;  %v2281_v25 = vmul.f32 %v5603_v36, %v5114_v3  ;;  %v2257_v17 = vrot.slane %v5603_v36, 5 }
 0x4fe   :  { %v5605_v62 = vmax.f32 %v2217_v15, 0.0 }
 0x4ff   :  { %v2222_v56 = vpop.f32.mrf.mxu1 }
 0x500   :  { %v2223_v33 = vadd.f32 %v2222_v56, %v2013_v29  ;;  %v2286_v43 = vrot.slane %v5605_v62, 1  ;;  %v2234_v42 = vrot.slane %v5605_v62, 3  ;;  %v2246_v58 = vrot.slane %v5605_v62, 4  ;;  %v6049_v56 = vld [vmem:[#allocation30_spill] sm:$0xff] }
 0x501   :  { %v5608_v46 = vpop.f32.mrf.mxu1  ;;  %v2282_v31 = vmul.f32 %v5605_v62, %v5116_v4  ;;  %v2258_v50 = vrot.slane %v5605_v62, 5 }
 0x502   :  { %v5611_v44 = vmax.f32 %v2223_v33, 0.0  ;;  %v2291_v34 = vsel %vm818_vm5, %v2285_v52, %v2286_v43  ;;  %v5631_v4 = vsel %vm675_vm2, %v2245_v26, %v2246_v58  ;;  %v5637_v22 = vsel %vm638_vm1, %v2233_v61, %v2234_v42 }
 0x503   :  { %v2226_v41 = vpop.f32.mrf.mxu1  ;;  %v2293_v45 = vmul.f32 %v2291_v34, %v5107_v63  ;;  %v2313_v49 = vpack.c.bf16 %v2282_v31, %v2281_v25  ;;  %v2254_v47 = vmul.f32 %v5631_v4, %v5087_v53  ;;  %v2242_v63 = vmul.f32 %v5637_v22, %v5089_v54  ;;  %v4367_v53 = vld [vmem:[%s5952_s12 + $0x230] sm:$0xff]  }
 0x504   :  { %v2227_v32 = vadd.f32 %v2226_v41, %v2013_v29  ;;  %v2287_v20 = vrot.slane %v5611_v44, 1  ;;  %v2247_v14 = vrot.slane %v5611_v44, 4  ;;  %v2259_v27 = vrot.slane %v5611_v44, 5 }
 0x505   :  { %v5705_v41 = vsel %vm713_vm4, %v2257_v17, %v2258_v50 }
 0x506   :  { %v5625_v12 = vmax.f32 %v2227_v32, 0.0  ;;  %v2290_v28 = vsel %vm818_vm5, %v2286_v43, %v2287_v20  ;;  %v5681_v39 = vsel %vm713_vm4, %v2258_v50, %v2259_v27  ;;  %v4369_v43 = vld [vmem:[%s5952_s12 + $0xf0] sm:$0xff]   ;;  %v2269_v32 = vrot.slane %v5603_v36, 7  ;;  %v4387_v36 = vld [vmem:[%s5952_s12 + $0xc0] sm:$0xff]  }
 0x507   :  { %v2294_v3 = vmul.f32 %v2290_v28, %v5109_v0  ;;  %v5652_v0 = vsel %vm675_vm2, %v2246_v58, %v2247_v14 }
 0x508   :  { %v2236_v18 = vrot.slane %v5625_v12, 3  ;;  %v2248_v48 = vrot.slane %v5625_v12, 4  ;;  %v2288_v8 = vrot.slane %v5625_v12, 1  ;;  %v2255_v33 = vmul.f32 %v5652_v0, %v6049_v56 }
 0x509   :  { %v2314_v30 = vpack.c.bf16 %v2294_v3, %v2293_v45  ;;  %v2272_v58 = vrot.slane %v5625_v12, 7  ;;  %v4371_v45 = vld [vmem:[%s5952_s12 + $0xb0] sm:$0xff]  }
 0x50a   :  { %v5656_v13 = vsel %vm675_vm2, %v2248_v48, %v2245_v26  ;;  %v2289_v1 = vsel %vm818_vm5, %v2287_v20, %v2288_v8  ;;  %v2292_v23 = vsel %vm818_vm5, %v2288_v8, %v2285_v52  ;;  %v2240_v54 = vsel %vm638_vm1, %v2236_v18, %v2233_v61  ;;  %v6050_v52 = vld [vmem:[#allocation45_spill] sm:$0xff]  ;;  %v4370_v61 = vld [vmem:[%s5952_s12 + $0x228] sm:$0xff]   ;;  %v6051_v26 = vld [vmem:[#allocation44_spill] sm:$0xff] }
 0x50b   :  { %3040 = vmatprep.mubr.bf16.mxu1 %v2314_v30  ;;  %v2253_v19 = vmul.f32 %v5656_v13, %v5083_v51  ;;  %v2295_v10 = vmul.f32 %v2289_v1, %v6045_v38  ;;  %v2296_v59 = vmul.f32 %v2292_v23, %v6046_v60  ;;  %v2241_v7 = vmul.f32 %v2240_v54, %v6047_v57  ;;  %v4372_v8 = vld [vmem:[%s5952_s12 + $0xe8] sm:$0xff]   ;;  %v6054_v30 = vld [vmem:[#allocation33_spill] sm:$0xff]  ;;  %v6055_v23 = vld [vmem:[#allocation32_spill] sm:$0xff] }
 0x50c   :  { %3041 = vmatmul.mubr.bf16.vlgmr.msra.gmra.mxu1 %v2313_v49  ;;  %v5674_v9 = vsel %vm675_vm2, %v2247_v14, %v2248_v48  ;;  %v2235_v51 = vrot.slane %v5611_v44, 3  ;;  %v2270_v20 = vrot.slane %v5605_v62, 7  ;;  %v2283_v25 = vmul.f32 %v5611_v44, %v6051_v26  ;;  %v6052_v14 = vld [vmem:[#allocation51_spill] sm:$0xff]  ;;  %v6066_v62 = vld [vmem:[#allocation38_spill] sm:$0xff] }
 0x50d   :  { %4055 = vmatpush3.bf16.msra.mxu1 %v5584_v6  ;;  %v2310_v21 = vpack.c.bf16 %v2254_v47, %v2253_v19  ;;  %v2323_v29 = vpack.c.bf16 %v2296_v59, %v2295_v10  ;;  %v2309_v40 = vpack.c.bf16 %v2242_v63, %v2241_v7  ;;  %v2256_v15 = vmul.f32 %v5674_v9, %v6048_v35  ;;  %v6056_v19 = vld [vmem:[#allocation34_spill] sm:$0xff]  ;;  %v6057_v59 = vld [vmem:[#allocation35_spill] sm:$0xff] }
 0x50e   :  { %4056 = vmatprep.subr.bf16.mxu1 %v4367_v53  ;;  %v2284_v6 = vmul.f32 %v5625_v12, %v6050_v52  ;;  %v2237_v31 = vsel %vm638_vm1, %v2235_v51, %v2236_v18  ;;  %v2306_v28 = vmul.f32 %v5681_v39, %v6052_v14  ;;  %v5722_v3 = vsel %vm638_vm1, %v2234_v42, %v2235_v51  ;;  %v6053_v18 = vld [vmem:[#allocation50_spill] sm:$0xff]  ;;  %v4376_v51 = vld [vmem:[%s5952_s12 + $0x218] sm:$0xff]   ;;  %v4381_v52 = vld [vmem:[%s5952_s12 + $0xd0] sm:$0xff]  }
 0x50f   :  { %2942 = vmatprep.mubr.bf16.mxu0 %v2310_v21  ;;  %3048 = vmatprep.mubr.bf16.mxu1 %v2323_v29  ;;  %v2319_v34 = vpack.c.bf16 %v2256_v15, %v2255_v33  ;;  %v2276_v49 = vsel %vm751_vm3, %v2272_v58, %v2269_v32  ;;  %v2305_v48 = vmul.f32 %v5705_v41, %v6053_v18  ;;  %v4373_v42 = vld [vmem:[%s5952_s12 + $0x220] sm:$0xff]   ;;  %v4374_v10 = vld [vmem:[%s5952_s12 + $0xa8] sm:$0xff]   ;;  %v6058_v21 = vld [vmem:[#allocation56_spill] sm:$0xff] }
 0x510   :  { %2943 = vmatmul.mubr.bf16.vlgmr.msra.gmra.mxu0 %v2309_v40  ;;  %v2322_v50 = vpack.c.bf16 %v2284_v6, %v2283_v25  ;;  %v2244_v47 = vmul.f32 %v2237_v31, %v6054_v30  ;;  %v2275_v63 = vsel %vm751_vm3, %v2269_v32, %v2270_v20  ;;  %v2277_v38 = vmul.f32 %v2276_v49, %v6056_v19  ;;  %v4375_v7 = vld [vmem:[%s5952_s12 + $0xe0] sm:$0xff]   ;;  %v4378_v33 = vld [vmem:[%s5952_s12 + $0xd8] sm:$0xff]   ;;  %v4382_v6 = vld [vmem:[%s5952_s12 + $0x208] sm:$0xff]  }
 0x511   :  { %3881 = vmatpush3.bf16.msra.mxu0 %v4368_v11  ;;  %4057 = vmatpush3.bf16.msra.mxu1 %v4367_v53  ;;  %v2317_v1 = vpack.c.bf16 %v2306_v28, %v2305_v48  ;;  %v2243_v53 = vmul.f32 %v5722_v3, %v6055_v23  ;;  %v2278_v57 = vmul.f32 %v2275_v63, %v6057_v59  ;;  %v6059_v40 = vld [vmem:[#allocation57_spill] sm:$0xff]  ;;  %v4384_v32 = vld [vmem:[%s5952_s12 + $0xc8] sm:$0xff]   ;;  %v6060_v28 = vld [vmem:[#allocation52_spill] sm:$0xff]  ;;  %v6062_v48 = vlaneseq }
 0x512   :  { %2950 = vmatprep.mubr.bf16.mxu0 %v2319_v34  ;;  %3882 = vmatprep.subr.bf16.mxu0 %v4369_v43  ;;  %v5755_v29 = vmul.f32 %v2237_v31, %v6058_v21  ;;  %v5758_v11 = vmul.f32 %v2240_v54, %v6059_v40  ;;  %v4377_v15 = vld [vmem:[%s5952_s12 + $0xa0] sm:$0xff]   ;;  %v4379_v54 = vld [vmem:[%s5952_s12 + $0x210] sm:$0xff]   ;;  %v4380_v43 = vld [vmem:[%s5952_s12 + $0x98] sm:$0xff]   ;;  %v4709_v59 = vmov 1.0  }
 0x513   :  { %4058 = vmatprep.subr.bf16.mxu1 %v4370_v61  ;;  %v2318_v60 = vpack.c.bf16 %v2244_v47, %v2243_v53  ;;  %v2312_v35 = vpack.c.bf16 %v2278_v57, %v2277_v38  ;;  %v4383_v31 = vld [vmem:[%s5952_s12 + $0x90] sm:$0xff]   ;;  %v4385_v34 = vld [vmem:[%s5952_s12 + $0x200] sm:$0xff]   ;;  %v4386_v14 = vld [vmem:[%s5952_s12 + $0x88] sm:$0xff]   ;;  %v3305_v47 = vpop.permute.xlu0 %3304 }
 0x514   :  { %3049 = vmatmul.mubr.bf16.gmra.mxu1 %v2322_v50  ;;  %v2324_v56 = vpack.c.bf16 %v5758_v11, %v5755_v29  ;;  %v2271_v50 = vrot.slane %v5611_v44, 7  ;;  %v3330_v18 = vld [vmem:[#allocation18 + $0x78] sm:$0xff]  ;;  %v4388_v30 = vld [vmem:[%s5952_s12 + $0x80] sm:$0xff]  }
 0x515   :  { %3883 = vmatpush3.bf16.msra.mxu0 %v4371_v45  ;;  %4059 = vmatpush3.bf16.msra.mxu1 %v4370_v61  ;;  %v2260_v61 = vrot.slane %v5625_v12, 5  ;;  %v6064_v23 = vld [vmem:[#allocation39_spill] sm:$0xff]  ;;  %v6065_v19 = vld [vmem:[#allocation37_spill] sm:$0xff] }
 0x516   :  { %4070 = vmatprep.mubr.bf16.mxu1 %v2317_v1  ;;  %3884 = vmatprep.subr.bf16.mxu0 %v4372_v8  ;;  %v5812_v8 = vand.u32 127, %v6062_v48  ;;  %v2274_v12 = vsel %vm751_vm3, %v2270_v20, %v2271_v50  ;;  %v4389_v1 = vld [vmem:[%s5952_s12 + $0x1f8] sm:$0xff]   ;;  %v2266_v38 = vmul.f32 %v5705_v41, %v6065_v19  ;;  %v4391_v41 = vld [vmem:[%s5952_s12 + $0x1f0] sm:$0xff]   ;;  %v4401_v48 = vld [vmem:[%s5952_s12 + $0x1c8] sm:$0xff]  }
 0x517   :  { %4060 = vmatprep.subr.bf16.mxu1 %v4373_v42  ;;  %v2264_v26 = vsel %vm713_vm4, %v2260_v61, %v2257_v17  ;;  %v2261_v25 = vsel %vm713_vm4, %v2259_v27, %v2260_v61  ;;  %v6061_v17 = vld [vmem:[#allocation53_spill] sm:$0xff]  ;;  %v2273_v27 = vsel %vm751_vm3, %v2271_v50, %v2272_v58  ;;  %v3329_v58 = vld [vmem:[#allocation18 + $0x70] sm:$0xff]  ;;  %v3326_v21 = vld [vmem:[#allocation18 + $0x58] sm:$0xff] }
 0x518   :  { %2951 = vmatmul.mubr.bf16.gmra.mxu0 %v2318_v60  ;;  %v2307_v45 = vmul.f32 %v2261_v25, %v6060_v28  ;;  %v2308_v49 = vmul.f32 %v2264_v26, %v6061_v17  ;;  %v2280_v53 = vmul.f32 %v2273_v27, %v6064_v23  ;;  %vm3309_vm6 = vcmp.eq.s32.totalorder %v5812_v8, %v3305_v47  ;;  %v6067_v40 = vld [vmem:[#allocation41_spill] sm:$0xff]  ;;  %v4394_v61 = vld [vmem:[%s5952_s12 + $0x1a8] sm:$0xff]   ;;  %v3318_v27 = vld [vmem:[#allocation18 + $0x18] sm:$0xff] }
 0x519   :  { %3885 = vmatpush3.bf16.msra.mxu0 %v4374_v10  ;;  %4061 = vmatpush3.bf16.msra.mxu1 %v4373_v42  ;;  %v6063_v42 = vld [vmem:[#allocation36_spill] sm:$0xff]  ;;  %v3328_v10 = vld [vmem:[#allocation18 + $0x68] sm:$0xff]  ;;  %v2279_v60 = vmul.f32 %v2274_v12, %v6066_v62  ;;  %v3321_v28 = vld [vmem:[#allocation18 + $0x30] sm:$0xff]  ;;  %v3308_v12 = vpop.permute.xlu1 %3307  ;;  %vm3407_vm8 = vcmp.lt.s32.totalorder %v5812_v8, 32 }
 0x51a   :  { %2991 = vmatprep.mubr.bf16.mxu0 %v2312_v35  ;;  %3886 = vmatprep.subr.bf16.mxu0 %v4375_v7  ;;  %v2265_v63 = vmul.f32 %v2264_v26, %v6063_v42  ;;  %v2326_v44 = vpack.c.bf16 %v2308_v49, %v2307_v45  ;;  %v3327_v7 = vld [vmem:[#allocation18 + $0x60] sm:$0xff]  ;;  %v2268_v35 = vmul.f32 %v2261_v25, %v6067_v40  ;;  %v3320_v17 = vld [vmem:[#allocation18 + $0x28] sm:$0xff]  ;;  %v4399_v49 = vld [vmem:[%s5952_s12 + $0x1d0] sm:$0xff]  }
 0x51b   :  { %4062 = vmatprep.subr.bf16.mxu1 %v4376_v51  ;;  %v2321_v57 = vpack.c.bf16 %v2280_v53, %v2279_v60  ;;  %v3323_v25 = vld [vmem:[#allocation18 + $0x40] sm:$0xff]  ;;  %v4402_v47 = vld [vmem:[%s5952_s12 + $0x188] sm:$0xff]   ;;  %v3316_v42 = vld [vmem:[#allocation18 + $0x8] sm:$0xff]  ;;  %vm3310_vm7 = vcmp.eq.s32.totalorder %v5812_v8, %v3308_v12 }
 0x51c   :  { %v2311_v20 = vpack.c.bf16 %v2266_v38, %v2265_v63  ;;  %v4398_v45 = vld [vmem:[%s5952_s12 + $0x198] sm:$0xff]   ;;  %v4403_v63 = vld [vmem:[%s5952_s12 + $0x1c0] sm:$0xff]   ;;  %v6073_v38 = vld [vmem:[#allocation55_spill] sm:$0xff] }
 0x51d   :  { %3887 = vmatpush3.bf16.msra.mxu0 %v4377_v15  ;;  %4063 = vmatpush3.bf16.msra.mxu1 %v4376_v51  ;;  %v4392_v51 = vld [vmem:[%s5952_s12 + $0x1b0] sm:$0xff]   ;;  %v4393_v15 = vld [vmem:[%s5952_s12 + $0x1e8] sm:$0xff]   ;;  %v3319_v50 = vld [vmem:[#allocation18 + $0x20] sm:$0xff] }
 0x51e   :  { %3888 = vmatprep.subr.bf16.mxu0 %v4378_v33  ;;  %4064 = vmatprep.subr.bf16.mxu1 %v4379_v54  ;;  %v3325_v33 = vld [vmem:[#allocation18 + $0x50] sm:$0xff]  ;;  %v6074_v62 = vld [vmem:[#allocation48_spill] sm:$0xff] }
 0x51f   :  { %v6072_v53 = vld [vmem:[#allocation54_spill] sm:$0xff]  ;;  %v2297_v60 = vmul.f32 %v5637_v22, %v6074_v62  ;;  %v4411_v29 = vld [vmem:[#allocation12 + $0x8] sm:$0xff]  }
 0x520   :  { %v2303_v19 = vmul.f32 %v5674_v9, %v6072_v53  ;;  %v4405_v9 = vld [vmem:[#allocation12 + $0x38] sm:$0xff]   ;;  %v4408_v22 = vld [vmem:[#allocation12 + $0x20] sm:$0xff]  }
 0x521   :  { %3889 = vmatpush3.bf16.msra.mxu0 %v4380_v43  ;;  %4065 = vmatpush3.bf16.msra.mxu1 %v4379_v54  ;;  %v6068_v54 = vld [vmem:[#allocation40_spill] sm:$0xff]  ;;  %v4412_v11 = vld [vmem:[#allocation12] sm:$0xff]  }
 0x522   :  { %3890 = vmatprep.subr.bf16.mxu0 %v4381_v52  ;;  %4066 = vmatprep.subr.bf16.mxu1 %v4382_v6  ;;  %v2267_v43 = vmul.f32 %v5681_v39, %v6068_v54  ;;  %v6069_v52 = vld [vmem:[#allocation47_spill] sm:$0xff]  ;;  %v4395_v39 = vld [vmem:[%s5952_s12 + $0x1e0] sm:$0xff]  }
 0x525   :  { %3891 = vmatpush3.bf16.msra.mxu0 %v4383_v31  ;;  %4067 = vmatpush3.bf16.msra.mxu1 %v4382_v6  ;;  %v2302_v6 = vmul.f32 %v5652_v0, %v6069_v52  ;;  %v2320_v31 = vpack.c.bf16 %v2268_v35, %v2267_v43 }
 0x526   :  { %3892 = vmatprep.subr.bf16.mxu0 %v4384_v32  ;;  %4068 = vmatprep.subr.bf16.mxu1 %v4385_v34  ;;  %v3324_v32 = vld [vmem:[#allocation18 + $0x48] sm:$0xff] }
 0x529   :  { %3893 = vmatpush3.bf16.msra.mxu0 %v4386_v14  ;;  %4069 = vmatpush3.bf16.msra.mxu1 %v4385_v34  ;;  %v6070_v34 = vld [vmem:[#allocation46_spill] sm:$0xff] }
 0x52a   :  { %3894 = vmatprep.subr.bf16.mxu0 %v4387_v36  ;;  %4094 = vmatprep.subr.mxu1 %v3330_v18  ;;  %v2301_v26 = vmul.f32 %v5631_v4, %v6070_v34  ;;  %v4396_v14 = vld [vmem:[%s5952_s12 + $0x1a0] sm:$0xff]   ;;  %v3322_v36 = vld [vmem:[#allocation18 + $0x38] sm:$0xff]  ;;  %v4397_v4 = vld [vmem:[%s5952_s12 + $0x1d8] sm:$0xff]  }
 0x52c   :  { %4071 = vmatmul.mubr.bf16.vlgmr.msra.gmra.mxu1 %v2326_v44  ;;  %v2316_v0 = vpack.c.bf16 %v2302_v6, %v2301_v26  ;;  %v3315_v44 = vld [vmem:[#allocation18] sm:$0xff] }
 0x52d   :  { %3895 = vmatpush3.bf16.msra.mxu0 %v4388_v30  ;;  %4095 = vmatpush3.msra.mxu1 %v3330_v18  ;;  %v4400_v18 = vld [vmem:[%s5952_s12 + $0x190] sm:$0xff]   ;;  %v3317_v30 = vld [vmem:[#allocation18 + $0x10] sm:$0xff] }
 0x52e   :  { %4126 = vmatprep.mubr.msk.f32.mxu1 %vm3309_vm6, %v4709_v59  ;;  %4096 = vmatprep.subr.mxu1 %v3329_v58 }
 0x52f   :  { %4097 = vmatpush3.msra.mxu1 %v3329_v58  ;;  %3936 = vmatprep.subr.bf16.mxu0 %v4389_v1  ;;  %v4404_v58 = vld [vmem:[%s5952_s12 + $0x180] sm:$0xff]  }
 0x530   :  { %2992 = vmatmul.mubr.bf16.vlgmr.msra.gmra.mxu0 %v2311_v20  ;;  %4098 = vmatprep.subr.mxu1 %v3328_v10  ;;  %v6071_v1 = vld [vmem:[#allocation49_spill] sm:$0xff]  ;;  %v4407_v20 = vld [vmem:[#allocation12 + $0x28] sm:$0xff]  }
 0x531   :  { %2999 = vmatprep.mubr.bf16.mxu0 %v2321_v57  ;;  %3937 = vmatpush3.bf16.msra.mxu0 %v4390_v2  ;;  %v2298_v23 = vmul.f32 %v5722_v3, %v6071_v1 }
 0x532   :  { %4099 = vmatpush3.msra.mxu1 %v3328_v10  ;;  %3938 = vmatprep.subr.bf16.mxu0 %v4391_v41  ;;  %v2304_v10 = vmul.f32 %v5656_v13, %v6073_v38  ;;  %v4406_v13 = vld [vmem:[#allocation12 + $0x30] sm:$0xff]  }
 0x533   :  { %4100 = vmatprep.subr.mxu1 %v3327_v7  ;;  %v2315_v2 = vpack.c.bf16 %v2298_v23, %v2297_v60  ;;  %v4410_v41 = vld [vmem:[#allocation12 + $0x10] sm:$0xff]  }
 0x534   :  { %4101 = vmatpush3.msra.mxu1 %v3327_v7  ;;  %v2325_v3 = vpack.c.bf16 %v2304_v10, %v2303_v19 }
 0x535   :  { %4102 = vmatprep.subr.mxu1 %v3326_v21  ;;  %3939 = vmatpush3.bf16.msra.mxu0 %v4392_v51 }
 0x536   :  { %4103 = vmatpush3.msra.mxu1 %v3326_v21  ;;  %3940 = vmatprep.subr.bf16.mxu0 %v4393_v15 }
 0x537   :  { %4104 = vmatprep.subr.mxu1 %v3325_v33 }
 0x538   :  { %4105 = vmatpush3.msra.mxu1 %v3325_v33  ;;  %3000 = vmatmul.mubr.bf16.gmra.mxu0 %v2320_v31 }
 0x539   :  { %4106 = vmatprep.subr.mxu1 %v3324_v32  ;;  %3941 = vmatpush3.bf16.msra.mxu0 %v4394_v61 }
 0x53a   :  { %3089 = vmatprep.mubr.bf16.mxu0 %v2316_v0  ;;  %4107 = vmatpush3.msra.mxu1 %v3324_v32 }
 0x53b   :  { %4108 = vmatprep.subr.mxu1 %v3323_v25  ;;  %3942 = vmatprep.subr.bf16.mxu0 %v4395_v39 }
 0x53c   :  { %4109 = vmatpush3.msra.mxu1 %v3323_v25 }
 0x53d   :  { %4110 = vmatprep.subr.mxu1 %v3322_v36  ;;  %3943 = vmatpush3.bf16.msra.mxu0 %v4396_v14 }
 0x53e   :  { %4111 = vmatpush3.msra.mxu1 %v3322_v36  ;;  %3944 = vmatprep.subr.bf16.mxu0 %v4397_v4 }
 0x53f   :  { %4112 = vmatprep.subr.mxu1 %v3321_v28 }
 0x540   :  { %4113 = vmatpush3.msra.mxu1 %v3321_v28 }
 0x541   :  { %4114 = vmatprep.subr.mxu1 %v3320_v17  ;;  %3945 = vmatpush3.bf16.msra.mxu0 %v4398_v45 }
 0x542   :  { %4115 = vmatpush3.msra.mxu1 %v3320_v17  ;;  %3946 = vmatprep.subr.bf16.mxu0 %v4399_v49  ;;  %v3625_v17 = vld [vmem:[#allocation10] ss:$0 sm:$0xff] }
 0x543   :  { %4116 = vmatprep.subr.mxu1 %v3319_v50 }
 0x544   :  { %4117 = vmatpush3.msra.mxu1 %v3319_v50 }
 0x545   :  { %4118 = vmatprep.subr.mxu1 %v3318_v27  ;;  %3947 = vmatpush3.bf16.msra.mxu0 %v4400_v18 }
 0x546   :  { %4119 = vmatpush3.msra.mxu1 %v3318_v27  ;;  %3948 = vmatprep.subr.bf16.mxu0 %v4401_v48  ;;  %v3331_v27 = vld [vmem:[%s5959_s19] sm:$0xff] }
 0x547   :  { %4120 = vmatprep.subr.mxu1 %v3317_v30 }
 0x548   :  { %4121 = vmatpush3.msra.mxu1 %v3317_v30 }
 0x549   :  { %4122 = vmatprep.subr.mxu1 %v3316_v42  ;;  %3949 = vmatpush3.bf16.msra.mxu0 %v4402_v47 }
 0x54a   :  { %4123 = vmatpush3.msra.mxu1 %v3316_v42  ;;  %3950 = vmatprep.subr.bf16.mxu0 %v4403_v63  ;;  %v4710_v42 = vmov 0.0  }
 0x54b   :  { %4124 = vmatprep.subr.mxu1 %v3315_v44  ;;  %v5904_v63 = vsel %vm3407_vm8, 1.0, %v4710_v42 }
 0x54c   :  { %4125 = vmatpush3.msra.mxu1 %v3315_v44 }
 0x54d   :  { %4127 = vmatmul.mubr.msk.f32.vlgmr.msra.gmra.mxu1 %vm3310_vm7, %v4709_v59  ;;  %3951 = vmatpush3.bf16.msra.mxu0 %v4404_v58  ;;  %v4409_v59 = vld [vmem:[#allocation12 + $0x18] sm:$0xff]  }
 0x54e   :  { %4074 = vmatprep.subr.bf16.mxu0 %v4405_v9 }
 0x550   :  { %3090 = vmatmul.mubr.bf16.vlgmr.msra.gmra.mxu0 %v2315_v2 }
 0x551   :  { %3097 = vmatprep.mubr.bf16.mxu0 %v2325_v3  ;;  %4075 = vmatpush3.bf16.msra.mxu0 %v4405_v9 }
 0x552   :  { %4076 = vmatprep.subr.bf16.mxu0 %v4406_v13 }
 0x555   :  { %4077 = vmatpush3.bf16.msra.mxu0 %v4406_v13 }
 0x556   :  { %4078 = vmatprep.subr.bf16.mxu0 %v4407_v20 }
 0x558   :  { %3098 = vmatmul.mubr.bf16.gmra.mxu0 %v2324_v56 }
 0x559   :  { %4079 = vmatpush3.bf16.msra.mxu0 %v4407_v20 }
 0x55a   :  { %4080 = vmatprep.subr.bf16.mxu0 %v4408_v22 }
 0x55d   :  { %4081 = vmatpush3.bf16.msra.mxu0 %v4408_v22 }
 0x55e   :  { %4082 = vmatprep.subr.bf16.mxu0 %v4409_v59 }
 0x561   :  { %4083 = vmatpush3.bf16.msra.mxu0 %v4409_v59 }
 0x562   :  { %4084 = vmatprep.subr.bf16.mxu0 %v4410_v41 }
 0x565   :  { %4085 = vmatpush3.bf16.msra.mxu0 %v4410_v41 }
 0x566   :  { %4086 = vmatprep.subr.bf16.mxu0 %v4411_v29 }
 0x569   :  { %4087 = vmatpush3.bf16.msra.mxu0 %v4411_v29 }
 0x56a   :  { %4088 = vmatprep.subr.bf16.mxu0 %v4412_v11 }
 0x56d   :  { %4089 = vmatpush3.bf16.msra.mxu0 %v4412_v11 }
 0x5cc   :  { %v3924_v21 = vpop.f32.mrf.mxu1 }
 0x5ce   :  { %v3925_v35 = vpop.f32.mrf.mxu1 }
 0x5cf   :  { %v3926_v38 = vadd.f32 %v3925_v35, %v3924_v21 }
 0x5d0   :  { %v3868_v56 = vpop.f32.mrf.mxu0  ;;  %v3927_v33 = vpop.f32.mrf.mxu1 }
 0x5d2   :  { %v3869_v57 = vpop.f32.mrf.mxu0  ;;  %v3928_v43 = vpop.f32.mrf.mxu1 }
 0x5d3   :  { %v3870_v45 = vadd.f32 %v3869_v57, %v3868_v56  ;;  %v3929_v59 = vadd.f32 %v3928_v43, %v3927_v33 }
 0x5d4   :  { %v3871_v7 = vpop.f32.mrf.mxu0  ;;  %v3930_v6 = vpop.f32.mrf.mxu1 }
 0x5d5   :  { %v2945_v48 = vadd.f32 %v3870_v45, %v3625_v17 }
 0x5d6   :  { %v3872_v51 = vpop.f32.mrf.mxu0  ;;  %v3931_v31 = vpop.f32.mrf.mxu1 }
 0x5d7   :  { %v3873_v30 = vadd.f32 %v3872_v51, %v3871_v7  ;;  %v3932_v35 = vadd.f32 %v3931_v31, %v3930_v6 }
 0x5d8   :  { %v3874_v40 = vpop.f32.mrf.mxu0  ;;  %v3933_v34 = vpop.f32.mrf.mxu1 }
 0x5d9   :  { %v2948_v10 = vadd.f32 %v3873_v30, %v3625_v17 }
 0x5da   :  { %v3875_v15 = vpop.f32.mrf.mxu0  ;;  %v3934_v39 = vpop.f32.mrf.mxu1 }
 0x5db   :  { %v3876_v62 = vadd.f32 %v3875_v15, %v3874_v40  ;;  %v3935_v33 = vadd.f32 %v3934_v39, %v3933_v34 }
 0x5dc   :  { %v3877_v54 = vpop.f32.mrf.mxu0 }
 0x5dd   :  { %v2953_v41 = vadd.f32 %v3876_v62, %v3625_v17 }
 0x5de   :  { %v3878_v52 = vpop.f32.mrf.mxu0 }
 0x5df   :  { %v3879_v29 = vadd.f32 %v3878_v52, %v3877_v54 }
 0x5e1   :  { %v2956_v15 = vadd.f32 %v3879_v29, %v3625_v17 }
 0x5ec   :  { %v5896_v25 = vpop.f32.mrf.mxu1 }
 0x5ee   :  { %v3140_v36 = vpop.f32.mrf.mxu1 }
 0x5f0   :  { %v3896_v61 = vpop.f32.mrf.mxu0  ;;  %v5898_v28 = vpop.f32.mrf.mxu1 }
 0x5f2   :  { %v3897_v32 = vpop.f32.mrf.mxu0  ;;  %v3143_v18 = vpop.f32.mrf.mxu1 }
 0x5f3   :  { %v3898_v50 = vadd.f32 %v3897_v32, %v3896_v61 }
 0x5f4   :  { %v3899_v26 = vpop.f32.mrf.mxu0 }
 0x5f5   :  { %v2994_v58 = vadd.f32 %v3898_v50, %v2945_v48 }
 0x5f6   :  { %v3900_v0 = vpop.f32.mrf.mxu0 }
 0x5f7   :  { %v3901_v1 = vadd.f32 %v3900_v0, %v3899_v26  ;;  %v3043_v13 = vadd.f32 %v3926_v38, %v2994_v58  ;;  %v2009_v38 = vrot.slane %v5593_v24, %v5484_v37 }
 0x5f8   :  { %v3902_v14 = vpop.f32.mrf.mxu0 }
 0x5f9   :  { %v2997_v3 = vadd.f32 %v3901_v1, %v2948_v10  ;;  %v2221_v62 = vadd.f32 %v5601_v55, %v2009_v38 }
 0x5fa   :  { %v3903_v4 = vpop.f32.mrf.mxu0 }
 0x5fb   :  { %v3904_v9 = vadd.f32 %v3903_v4, %v3902_v14  ;;  %v3046_v51 = vadd.f32 %v3929_v59, %v2997_v3 }
 0x5fc   :  { %v3905_v49 = vpop.f32.mrf.mxu0 }
 0x5fd   :  { %v3002_v57 = vadd.f32 %v3904_v9, %v2953_v41  ;;  %v3289_v9 = vld [vmem:[#allocation15] sm:$0xff]  ;;  %v2215_v41 = vadd.f32 %v5599_v16, %v2009_v38 }
 0x5fe   :  { %v3906_v44 = vpop.f32.mrf.mxu0 }
 0x5ff   :  { %v3907_v7 = vadd.f32 %v3906_v44, %v3905_v49  ;;  %v3051_v4 = vadd.f32 %v3932_v35, %v3002_v57 }
 0x601   :  { %v3005_v0 = vadd.f32 %v3907_v7, %v2956_v15 }
 0x603   :  { %v3054_v48 = vadd.f32 %v3935_v33, %v3005_v0  ;;  %v3712_v0 = vld [vmem:[#allocation19] ss:$0 sm:$0xff] }
 0x60d   :  { %v4128_v47 = vpop.f32.mrf.mxu1 }
 0x60e   :  { %v5906_v12 = vadd.f32 %v4128_v47, %v3331_v27 }
 0x60f   :  { %v3398_v23 = vpop.f32.mrf.mxu1 }
 0x610   :  { %v3399_v53 = vadd.f32 %v3398_v23, %v3331_v27  ;;  %v3952_v8 = vpop.f32.mrf.mxu0  ;;  %v3411_v19 = vmul.f32 %v5904_v63, %v5906_v12 }
 0x612   :  { %3414 = vadd.xlane.f32.xlu1 %v3411_v19  ;;  %v3953_v60 = vpop.f32.mrf.mxu0  ;;  %v3410_v2 = vmul.f32 %v5904_v63, %v3399_v53 }
 0x613   :  { %v3954_v20 = vadd.f32 %v3953_v60, %v3952_v8 }
 0x614   :  { %3412 = vadd.xlane.f32.xlu0 %v3410_v2  ;;  %v3955_v22 = vpop.f32.mrf.mxu0 }
 0x615   :  { %v3092_v11 = vadd.f32 %v3954_v20, %v3043_v13 }
 0x616   :  { %v3956_v56 = vpop.f32.mrf.mxu0 }
 0x617   :  { %v3957_v21 = vadd.f32 %v3956_v56, %v3955_v22  ;;  %v3141_v61 = vadd.f32 %v3140_v36, %v3092_v11  ;;  %v3290_v56 = vld [vmem:[#allocation15 + $0x8] sm:$0xff] }
 0x618   :  { %v3958_v40 = vpop.f32.mrf.mxu0 }
 0x619   :  { %v3095_v32 = vadd.f32 %v3957_v21, %v3046_v51  ;;  %v3155_v43 = vmax.f32 %v3141_v61, 0.0 }
 0x61a   :  { %v3959_v26 = vpop.f32.mrf.mxu0 }
 0x61b   :  { %v3144_v14 = vadd.f32 %v3143_v18, %v3095_v32  ;;  %v3960_v45 = vadd.f32 %v3959_v26, %v3958_v40 }
 0x61c   :  { %v3961_v50 = vpop.f32.mrf.mxu0 }
 0x61d   :  { %v3156_v54 = vmax.f32 %v3144_v14, 0.0  ;;  %v3100_v52 = vadd.f32 %v3960_v45, %v3051_v4  ;;  %v3713_v4 = vld [vmem:[#allocation21] ss:$0 sm:$0xff] }
 0x61e   :  { %v3962_v27 = vpop.f32.mrf.mxu0 }
 0x61f   :  { %v3963_v49 = vadd.f32 %v3962_v27, %v3961_v50  ;;  %v3159_v30 = vpack.c.bf16 %v3156_v54, %v3155_v43  ;;  %v3149_v47 = vadd.f32 %v5896_v25, %v3100_v52 }
 0x621   :  { %v3103_v6 = vadd.f32 %v3963_v49, %v3054_v48  ;;  %4090 = vmatprep.mubr.bf16.mxu0 %v3159_v30  ;;  %v3157_v36 = vmax.f32 %v3149_v47, 0.0 }
 0x623   :  { %v3152_v31 = vadd.f32 %v5898_v28, %v3103_v6  ;;  %v3698_v28 = vld [vmem:[#allocation13] ss:$0 sm:$0xff] }
 0x625   :  { %v3158_v17 = vmax.f32 %v3152_v31, 0.0 }
 0x627   :  { %v3160_v18 = vpack.c.bf16 %v3158_v17, %v3157_v36 }
 0x629   :  { %4091 = vmatmul.mubr.bf16.vlgmr.msra.gmra.mxu0 %v3160_v18 }
 0x69b   :  { %v3415_v42 = vpop.xlane.xlu1 %3414 }
 0x69c   :  { %v3417_v44 = vmul.f32 0.03125, %v3415_v42 }
 0x69d   :  { %v3413_v34 = vpop.xlane.xlu0 %3412 }
 0x69e   :  { %v3416_v39 = vmul.f32 0.03125, %v3413_v34  ;;  %v3419_v58 = vsub.f32 %v5906_v12, %v3417_v44  ;;  %v2211_v12 = vadd.f32 %v5595_v5, %v2009_v38 }
 0x6a0   :  { %v3418_v1 = vsub.f32 %v3399_v53, %v3416_v39  ;;  %v3421_v25 = vmul.f32 %v5904_v63, %v3419_v58 }
 0x6a2   :  { %v3420_v23 = vmul.f32 %v5904_v63, %v3418_v1  ;;  %v3423_v19 = vmul.f32 %v3421_v25, %v3421_v25  ;;  %v2225_v63 = vadd.f32 %v5608_v46, %v2009_v38 }
 0x6a4   :  { %v3422_v8 = vmul.f32 %v3420_v23, %v3420_v23 }
 0x6a6   :  { %3424 = vadd.xlane.f32.xlu0 %v3422_v8 }
 0x6aa   :  { %3426 = vadd.xlane.f32.xlu0 %v3423_v19 }
 0x6e9   :  { %v4092_v10 = vpop.f32.mrf.mxu0 }
 0x6ea   :  { %v3275_v60 = vadd.f32 %v4092_v10, %v3698_v28 }
 0x6eb   :  { %v3266_v2 = vpop.f32.mrf.mxu0 }
 0x6ec   :  { %v3283_v53 = vadd.f32 %v3275_v60, %v2221_v62  ;;  %v3267_v3 = vadd.f32 %v3698_v28, %v3266_v2 }
 0x6ed   :  { %v4093_v13 = vpop.f32.mrf.mxu0 }
 0x6ee   :  { %v3287_v20 = vmax.f32 %v3283_v53, 0.0  ;;  %v3281_v22 = vadd.f32 %v3267_v3, %v2211_v12  ;;  %v3278_v59 = vadd.f32 %v4093_v13, %v3698_v28 }
 0x6ef   :  { %v3269_v29 = vpop.f32.mrf.mxu0 }
 0x6f0   :  { %v3293_v37 = vadd.f32 %v3289_v9, %v3287_v20  ;;  %v3285_v24 = vmax.f32 %v3281_v22, 0.0  ;;  %v3284_v11 = vadd.f32 %v3278_v59, %v2225_v63  ;;  %v3270_v55 = vadd.f32 %v3698_v28, %v3269_v29 }
 0x6f2   :  { %3297 = vst [vmem:[%s5962_s22 + $0x10] sm:$0xff] %v3293_v37  ;;  %v3291_v5 = vadd.f32 %v3289_v9, %v3285_v24  ;;  %v3288_v57 = vmax.f32 %v3284_v11, 0.0  ;;  %v3282_v7 = vadd.f32 %v3270_v55, %v2215_v41 }
 0x6f4   :  { %3295 = vst [vmem:[%s5962_s22] sm:$0xff] %v3291_v5  ;;  %v3294_v46 = vadd.f32 %v3290_v56, %v3288_v57  ;;  %v3286_v51 = vmax.f32 %v3282_v7, 0.0 }
 0x6f6   :  { %3298 = vst [vmem:[%s5962_s22 + $0x18] sm:$0xff] %v3294_v46  ;;  %v3292_v16 = vadd.f32 %v3290_v56, %v3286_v51 }
 0x6f8   :  { %3296 = vst [vmem:[%s5962_s22 + $0x8] sm:$0xff] %v3292_v16 }
 0x72f   :  { %v3425_v21 = vpop.xlane.xlu0 %3424 }
 0x730   :  { %v3428_v40 = vmul.f32 0.03125, %v3425_v21 }
 0x732   :  { %v3430_v35 = vadd.f32 1e-12, %v3428_v40 }
 0x733   :  { %v3427_v15 = vpop.xlane.xlu0 %3426 }
 0x734   :  { %4413 = vrsqrt.f32 %v3430_v35  ;;  %v3429_v61 = vmul.f32 0.03125, %v3427_v15 }
 0x736   :  { %v3431_v32 = vadd.f32 1e-12, %v3429_v61 }
 0x738   :  { %4415 = vrsqrt.f32 %v3431_v32 }
 0x741   :  { %v4414_v26 = vpop.eup %4413 }
 0x742   :  { %v3434_v14 = vmul.f32 %v4414_v26, %v3420_v23 }
 0x744   :  { %v3443_v45 = vmul.f32 %v3712_v0, %v3434_v14 }
 0x745   :  { %v4416_v50 = vpop.eup %4415 }
 0x746   :  { %v3452_v33 = vadd.f32 %v3713_v4, %v3443_v45  ;;  %v3435_v43 = vmul.f32 %v4416_v50, %v3421_v25 }
 0x748   :  { %3454 = vst [vmem:[%s5963_s23] sm:$0xff] %v3452_v33  ;;  %v3444_v54 = vmul.f32 %v3712_v0, %v3435_v43 }
 0x74a   :  { %v3453_v52 = vadd.f32 %v3713_v4, %v3444_v54 }
 0x74c   :  { %3455 = vst [vmem:[%s5963_s23 + $0x8] sm:$0xff] %v3453_v52 }
 0x74d   :  { %3464 = vsyncpa [#allocation3], 1 }
 0x74e   :  { %3465 = vsyncpa [#allocation5], 1 }
 0x74f   :  { %3466 = vsyncpa [#allocation8], 1 }
 0x750   :  { %3467 = vsyncpa [#allocation11], 1 }
 0x751   :  { %3468 = vsyncpa [#allocation14], 1 }
 0x752   :  { %3469 = vsyncpa [#allocation17], 1 }
 0x753   :  { %3470 = vsyncpa [#allocation20], 1 }

</bundles_post_ra>
